<compile_context>
chip_gen: v7x
topology: tpu7x:2x2x1
jax: 0.10.0
libtpu: 0.0.40
codegen_flags: <defaults>
</compile_context>

<pallas_src>
import functools

import jax
import jax.numpy as jnp
from jax import lax
from jax.experimental import pallas as pl
from jax.experimental.pallas import tpu as pltpu

_EPS = 1e-5  # nn.InstanceNorm2d default eps


# --------------------------- Pallas kernel body ------------------------------ #

def _gated_conv_kernel(xp_ref, w_ref, b_ref, *rest, h, w, c, act, has_residual):
    """Fused GatedConv2d for one batch image.

    xp_ref  : (1, H+2, W+2, C) bf16  reflect-padded input block.
    w_ref   : (9*C, 2*C)       bf16  fused [feature | mask] weights, tap-major rows.
    b_ref   : (1, 2*C)         f32   fused biases.
    res_ref : (1, H, W, C)     f32   optional block residual (original x).
    out_ref : (1, H, W, C)     bf16/f32 output (post norm/act [+ residual]).
    """
    if has_residual:
        res_ref, out_ref = rest
    else:
        (out_ref,) = rest
        res_ref = None

    xp = xp_ref[0]                                         # (H+2, W+2, C) bf16

    # Three column-shifted views, built once and reused by all three row taps,
    # packed on the lane axis -> (H+2, W, 3C).
    cols = jnp.concatenate(
        [xp[:, 0:w, :], xp[:, 1:w + 1, :], xp[:, 2:w + 2, :]], axis=-1)

    # Three row shifts packed on the lane axis -> im2col LHS (H*W, 9C) with
    # lane index = (di*3 + dj)*C + cin, matching the tap-major weight rows.
    lhs = jnp.concatenate(
        [cols[0:h], cols[1:h + 1], cols[2:h + 2]], axis=-1).reshape(h * w, 9 * c)

    # Single MXU matmul (K = 9C); feature and mask convs share it; f32 result.
    acc = jnp.dot(lhs, w_ref[...], preferred_element_type=jnp.float32)
    acc = acc + b_ref[...]                                 # (H*W, 2C)

    conv = acc[:, :c]
    # sigmoid via EUP exp + approximate reciprocal (keeps the VALU free).
    gate = pl.reciprocal(1.0 + jnp.exp(-acc[:, c:]), approx=True)
    g = conv * gate                                        # gated pre-norm acts

    # InstanceNorm over the fully-resident image: two-pass mean/var in f32.
    mean = jnp.mean(g, axis=0, keepdims=True)              # (1, C)
    gc = g - mean
    var = jnp.mean(gc * gc, axis=0, keepdims=True)
    y = gc * lax.rsqrt(var + _EPS)

    if act == "elu":                                       # nn.ELU(), alpha = 1
        # exp(min(y,0)) - 1 == expm1(y) for y <= 0 up to 1 ulp of f32; exp is EUP.
        y = jnp.where(y > 0.0, y, jnp.exp(jnp.minimum(y, 0.0)) - 1.0)

    if res_ref is not None:                                # x + pconv2(pconv1(x))
        y = y + res_ref[0].reshape(h * w, c)

    out_ref[...] = y.reshape(1, h, w, c).astype(out_ref.dtype)


# ------------------------------ layer wrapper -------------------------------- #

def gated_conv2d(x, w_cat, b_cat, *, act, residual=None, out_dtype=jnp.float32):
    """GatedConv2d(C, C, k=3, pad=1, pad_type='reflect', norm='in', act)."""
    N, H, W, C = x.shape
    assert W % 8 == 0 and C % 128 == 0, (N, H, W, C)

    # TODO(synk): the reflect pad + bf16 cast could be folded into the kernel
    # (pltpu.roll + boundary select) to save this small XLA copy pass; it is
    # kept in the wrapper (where XLA fuses it with the adjacent transpose/cast)
    # for robustness — the kernel itself is MXU-bound at C=128.
    xp = jnp.pad(x, ((0, 0), (1, 1), (1, 1), (0, 0)), mode="reflect")
    xp = xp.astype(jnp.bfloat16)

    has_res = residual is not None
    kern = functools.partial(_gated_conv_kernel, h=H, w=W, c=C, act=act,
                             has_residual=has_res)

    in_specs = [
        pl.BlockSpec((1, H + 2, W + 2, C), lambda n: (n, 0, 0, 0)),  # padded img
        pl.BlockSpec((9 * C, 2 * C), lambda n: (0, 0)),              # weights
        pl.BlockSpec((1, 2 * C), lambda n: (0, 0)),                  # biases
    ]
    args = [xp, w_cat, b_cat]
    if has_res:
        in_specs.append(pl.BlockSpec((1, H, W, C), lambda n: (n, 0, 0, 0)))
        args.append(residual)

    flops = 2 * N * H * W * (9 * C) * (2 * C)
    transcendentals = N * H * W * C * (3 if act == "elu" else 2)
    bytes_accessed = (sum(int(a.size) * a.dtype.itemsize for a in args)
                      + N * H * W * C * jnp.dtype(out_dtype).itemsize)

    return pl.pallas_call(
        kern,
        grid=(N,),
        in_specs=in_specs,
        out_specs=pl.BlockSpec((1, H, W, C), lambda n: (n, 0, 0, 0)),
        out_shape=jax.ShapeDtypeStruct((N, H, W, C), out_dtype),
        compiler_params=pltpu.CompilerParams(
            dimension_semantics=("parallel",)),   # batch axis -> megacore TCs
        cost_estimate=pl.CostEstimate(
            flops=int(flops), transcendentals=int(transcendentals),
            bytes_accessed=int(bytes_accessed)),
    )(*args)


# ------------------------------ block forward -------------------------------- #

def res_gconv_block(params, x_nchw):
    """ResGconvBlock.forward: x + pconv2(pconv1(x)).  NCHW in / NCHW out."""
    x = jnp.transpose(x_nchw, (0, 2, 3, 1)).astype(jnp.float32)     # -> NHWC f32
    h = gated_conv2d(x, params["w1"], params["b1"], act="elu",
                     out_dtype=jnp.bfloat16)                         # bf16 inter-layer
    out = gated_conv2d(h, params["w2"], params["b2"], act="none",
                       residual=x, out_dtype=jnp.float32)
    return jnp.transpose(out, (0, 3, 1, 2))                          # -> NCHW


# ------------------------- deterministic parameters -------------------------- #

def init_params(key, dim, gain=0.05):
    """Weights in im2col tap-major layout.

    w*: (9*dim, 2*dim) bf16 — row index = (ki*3+kj)*dim + cin, i.e. the PyTorch
        conv weight permuted (2,3,1,0) and reshaped; columns [:dim] are the
        feature conv, columns [dim:] the mask (gating) conv.
    b*: (1, 2*dim) f32, same column split.
    """
    ks = jax.random.split(key, 4)

    def w_cat(kf, km):
        wf = jax.random.normal(kf, (9 * dim, dim), jnp.float32) * gain
        wm = jax.random.normal(km, (9 * dim, dim), jnp.float32) * gain
        return jnp.concatenate([wf, wm], axis=1).astype(jnp.bfloat16)

    return {
        "w1": w_cat(ks[0], ks[1]), "b1": jnp.zeros((1, 2 * dim), jnp.float32),
        "w2": w_cat(ks[2], ks[3]), "b2": jnp.zeros((1, 2 * dim), jnp.float32),
    }


# ----------------------------- pure-JAX reference ---------------------------- #

def _ref_gated_conv(x, w_cat, b_cat, act):
    C = x.shape[-1]
    w = w_cat.astype(jnp.float32).reshape(3, 3, C, 2 * C)            # HWIO
    xp = jnp.pad(x, ((0, 0), (1, 1), (1, 1), (0, 0)), mode="reflect")
    xp = xp.astype(jnp.bfloat16).astype(jnp.float32)                 # emulate bf16 MXU inputs
    y = lax.conv_general_dilated(xp, w, (1, 1), "VALID",
                                 dimension_numbers=("NHWC", "HWIO", "NHWC"),
                                 precision=lax.Precision.HIGHEST)
    y = y + b_cat.reshape(1, 1, 1, 2 * C)
    g = y[..., :C] * jax.nn.sigmoid(y[..., C:])
    mean = jnp.mean(g, axis=(1, 2), keepdims=True)
    var = jnp.mean(jnp.square(g - mean), axis=(1, 2), keepdims=True)
    g = (g - mean) * lax.rsqrt(var + _EPS)
    if act == "elu":
        g = jnp.where(g > 0, g, jnp.expm1(g))
    return g


def _ref_block(params, x_nchw):
    x = jnp.transpose(x_nchw, (0, 2, 3, 1)).astype(jnp.float32)
    h = _ref_gated_conv(x, params["w1"], params["b1"], "elu")
    h = _ref_gated_conv(h, params["w2"], params["b2"], "none")
    return jnp.transpose(x + h, (0, 3, 1, 2))


# --------------------------------- main --------------------------------------- #

if __name__ == "__main__":
    key = jax.random.PRNGKey(0)
    pkey, xkey = jax.random.split(key)

    dim, N, H, W = 128, 2, 16, 16     # dim=128 keeps channels lane-dense
    params = init_params(pkey, dim)
    x = jax.random.normal(xkey, (N, dim, H, W), jnp.float32)

    fwd = jax.jit(res_gconv_block)
    out = fwd(params, x)
    jax.block_until_ready(out)

    assert out.shape == (N, dim, H, W), out.shape
    assert out.dtype == jnp.float32

    ref = _ref_block(params, x)
    err = float(jnp.max(jnp.abs(out - ref)))
    assert err < 5e-2, f"max abs error vs reference: {err}"

    print("KERNEL_OK")
</pallas_src>

<mosaic_0001>
module attributes {stable_mosaic.version = 11 : i64} {
  func.func @_gated_conv_kernel(%arg0: i32, %arg1: memref<1x18x18x128xbf16, #tpu.memory_space<vmem>>, %arg2: memref<1152x256xbf16, #tpu.memory_space<vmem>>, %arg3: memref<1x256xf32, #tpu.memory_space<vmem>>, %arg4: memref<1x16x16x128xbf16, #tpu.memory_space<vmem>>) attributes {dimension_semantics = [#tpu.dimension_semantics<parallel>], iteration_bounds = array<i64: 2>, scalar_prefetch = 0 : i64, scratch_operands = 0 : i64, tpu.core_type = #tpu.core_type<tc>, window_params = [{transform_indices = @transform_0, window_bounds = array<i64: 1, 18, 18, 128>}, {pipeline_mode = #tpu.pipeline_mode<synchronous>, transform_indices = @transform_1, window_bounds = array<i64: 1152, 256>}, {pipeline_mode = #tpu.pipeline_mode<synchronous>, transform_indices = @transform_2, window_bounds = array<i64: 1, 256>}, {transform_indices = @transform_3, window_bounds = array<i64: 1, 16, 16, 128>}]} {
    %c0 = arith.constant 0 : index
    %c0_0 = arith.constant 0 : index
    %c0_1 = arith.constant 0 : index
    %c0_2 = arith.constant 0 : index
    %0 = vector.load %arg1[%c0, %c0_0, %c0_1, %c0_2] : memref<1x18x18x128xbf16, #tpu.memory_space<vmem>>, vector<1x18x18x128xbf16>
    %1 = vector.shape_cast %0 : vector<1x18x18x128xbf16> to vector<18x18x128xbf16>
    %2 = vector.extract_strided_slice %1 {offsets = [0, 0, 0], sizes = [18, 16, 128], strides = [1, 1, 1]} : vector<18x18x128xbf16> to vector<18x16x128xbf16>
    %3 = vector.extract_strided_slice %1 {offsets = [0, 1, 0], sizes = [18, 16, 128], strides = [1, 1, 1]} : vector<18x18x128xbf16> to vector<18x16x128xbf16>
    %4 = vector.extract_strided_slice %1 {offsets = [0, 2, 0], sizes = [18, 16, 128], strides = [1, 1, 1]} : vector<18x18x128xbf16> to vector<18x16x128xbf16>
    %5 = tpu.concatenate %2, %3, %4 in 2 : vector<18x16x128xbf16>, vector<18x16x128xbf16>, vector<18x16x128xbf16> -> vector<18x16x384xbf16>
    %6 = vector.extract_strided_slice %5 {offsets = [0, 0, 0], sizes = [16, 16, 384], strides = [1, 1, 1]} : vector<18x16x384xbf16> to vector<16x16x384xbf16>
    %7 = vector.extract_strided_slice %5 {offsets = [1, 0, 0], sizes = [16, 16, 384], strides = [1, 1, 1]} : vector<18x16x384xbf16> to vector<16x16x384xbf16>
    %8 = vector.extract_strided_slice %5 {offsets = [2, 0, 0], sizes = [16, 16, 384], strides = [1, 1, 1]} : vector<18x16x384xbf16> to vector<16x16x384xbf16>
    %9 = tpu.concatenate %6, %7, %8 in 2 : vector<16x16x384xbf16>, vector<16x16x384xbf16>, vector<16x16x384xbf16> -> vector<16x16x1152xbf16>
    %10 = vector.shape_cast %9 : vector<16x16x1152xbf16> to vector<256x1152xbf16>
    %c0_3 = arith.constant 0 : index
    %c0_4 = arith.constant 0 : index
    %11 = vector.load %arg2[%c0_3, %c0_4] : memref<1152x256xbf16, #tpu.memory_space<vmem>>, vector<1152x256xbf16>
    %cst = arith.constant dense<0.000000e+00> : vector<256x256xf32>
    %12 = tpu.matmul %10, %11, %cst {dimension_numbers = #tpu.dot_dimension_numbers<[1], [0], [0], [1], [0, 0, 1, 1], [], []>} : vector<256x1152xbf16>, vector<1152x256xbf16>, vector<256x256xf32> -> vector<256x256xf32>
    %c0_5 = arith.constant 0 : index
    %c0_6 = arith.constant 0 : index
    %13 = vector.load %arg3[%c0_5, %c0_6] : memref<1x256xf32, #tpu.memory_space<vmem>>, vector<1x256xf32>
    %14 = vector.broadcast %13 : vector<1x256xf32> to vector<256x256xf32>
    %15 = arith.addf %12, %14 : vector<256x256xf32>
    %16 = vector.extract_strided_slice %15 {offsets = [0, 0], sizes = [256, 128], strides = [1, 1]} : vector<256x256xf32> to vector<256x128xf32>
    %17 = vector.extract_strided_slice %15 {offsets = [0, 128], sizes = [256, 128], strides = [1, 1]} : vector<256x256xf32> to vector<256x128xf32>
    %cst_7 = arith.constant 0.000000e+00 : f32
    %18 = vector.broadcast %cst_7 : f32 to vector<256x128xf32>
    %19 = arith.subf %18, %17 : vector<256x128xf32>
    %20 = math.exp %19 : vector<256x128xf32>
    %cst_8 = arith.constant 1.000000e+00 : f32
    %21 = vector.broadcast %cst_8 : f32 to vector<256x128xf32>
    %22 = arith.addf %21, %20 : vector<256x128xf32>
    %23 = tpu.reciprocal %22 {approx = true} : vector<256x128xf32> -> vector<256x128xf32>
    %24 = arith.mulf %16, %23 : vector<256x128xf32>
    %cst_9 = arith.constant dense<0.000000e+00> : vector<128xf32>
    %25 = vector.multi_reduction <add>, %24, %cst_9 [0] : vector<256x128xf32> to vector<128xf32>
    %26 = vector.shape_cast %25 : vector<128xf32> to vector<1x128xf32>
    %cst_10 = arith.constant 2.560000e+02 : f32
    %27 = vector.broadcast %cst_10 : f32 to vector<1x128xf32>
    %28 = arith.divf %26, %27 : vector<1x128xf32>
    %29 = vector.broadcast %28 : vector<1x128xf32> to vector<256x128xf32>
    %30 = arith.subf %24, %29 : vector<256x128xf32>
    %31 = arith.mulf %30, %30 : vector<256x128xf32>
    %cst_11 = arith.constant dense<0.000000e+00> : vector<128xf32>
    %32 = vector.multi_reduction <add>, %31, %cst_11 [0] : vector<256x128xf32> to vector<128xf32>
    %33 = vector.shape_cast %32 : vector<128xf32> to vector<1x128xf32>
    %cst_12 = arith.constant 2.560000e+02 : f32
    %34 = vector.broadcast %cst_12 : f32 to vector<1x128xf32>
    %35 = arith.divf %33, %34 : vector<1x128xf32>
    %cst_13 = arith.constant 9.99999974E-6 : f32
    %36 = vector.broadcast %cst_13 : f32 to vector<1x128xf32>
    %37 = arith.addf %35, %36 : vector<1x128xf32>
    %38 = math.rsqrt %37 : vector<1x128xf32>
    %39 = vector.broadcast %38 : vector<1x128xf32> to vector<256x128xf32>
    %40 = arith.mulf %30, %39 : vector<256x128xf32>
    %cst_14 = arith.constant 0.000000e+00 : f32
    %41 = vector.broadcast %cst_14 : f32 to vector<256x128xf32>
    %42 = arith.cmpf ogt, %40, %41 : vector<256x128xf32>
    %cst_15 = arith.constant 0.000000e+00 : f32
    %43 = vector.broadcast %cst_15 : f32 to vector<256x128xf32>
    %44 = arith.minimumf %40, %43 : vector<256x128xf32>
    %45 = math.exp %44 : vector<256x128xf32>
    %cst_16 = arith.constant 1.000000e+00 : f32
    %46 = vector.broadcast %cst_16 : f32 to vector<256x128xf32>
    %47 = arith.subf %45, %46 : vector<256x128xf32>
    %48 = arith.select %42, %40, %47 : vector<256x128xi1>, vector<256x128xf32>
    %49 = vector.shape_cast %48 : vector<256x128xf32> to vector<1x16x16x128xf32>
    %50 = arith.truncf %49 : vector<1x16x16x128xf32> to vector<1x16x16x128xbf16>
    %c0_17 = arith.constant 0 : index
    %c0_18 = arith.constant 0 : index
    %c0_19 = arith.constant 0 : index
    %c0_20 = arith.constant 0 : index
    %51 = vector.load %arg4[%c0_17, %c0_18, %c0_19, %c0_20] : memref<1x16x16x128xbf16, #tpu.memory_space<vmem>>, vector<1x16x16x128xbf16>
    tpu.vector_store %arg4[%c0_17, %c0_18, %c0_19, %c0_20], %50 {strides = array<i32>} : memref<1x16x16x128xbf16, #tpu.memory_space<vmem>>, vector<1x16x16x128xbf16>,
    return
  }
  func.func @transform_0(%arg0: i32) -> (i32, i32, i32, i32) {
    %c0_i32 = arith.constant 0 : i32
    %c0_i32_0 = arith.constant 0 : i32
    %c0_i32_1 = arith.constant 0 : i32
    %c0_i32_2 = arith.constant 0 : i32
    return %arg0, %c0_i32, %c0_i32_0, %c0_i32_1 : i32, i32, i32, i32
  }
  func.func @transform_1(%arg0: i32) -> (i32, i32) {
    %c0_i32 = arith.constant 0 : i32
    %c0_i32_0 = arith.constant 0 : i32
    %c0_i32_1 = arith.constant 0 : i32
    return %c0_i32, %c0_i32_0 : i32, i32
  }
  func.func @transform_2(%arg0: i32) -> (i32, i32) {
    %c0_i32 = arith.constant 0 : i32
    %c0_i32_0 = arith.constant 0 : i32
    %c0_i32_1 = arith.constant 0 : i32
    return %c0_i32, %c0_i32_0 : i32, i32
  }
  func.func @transform_3(%arg0: i32) -> (i32, i32, i32, i32) {
    %c0_i32 = arith.constant 0 : i32
    %c0_i32_0 = arith.constant 0 : i32
    %c0_i32_1 = arith.constant 0 : i32
    %c0_i32_2 = arith.constant 0 : i32
    return %arg0, %c0_i32, %c0_i32_0, %c0_i32_1 : i32, i32, i32, i32
  }
}

module attributes {stable_mosaic.version = 11 : i64} {
  func.func @_gated_conv_kernel(%arg0: i32, %arg1: memref<1x18x18x128xbf16, #tpu.memory_space<vmem>>, %arg2: memref<1152x256xbf16, #tpu.memory_space<vmem>>, %arg3: memref<1x256xf32, #tpu.memory_space<vmem>>, %arg4: memref<1x16x16x128xf32, #tpu.memory_space<vmem>>, %arg5: memref<1x16x16x128xf32, #tpu.memory_space<vmem>>) attributes {dimension_semantics = [#tpu.dimension_semantics<parallel>], iteration_bounds = array<i64: 2>, scalar_prefetch = 0 : i64, scratch_operands = 0 : i64, tpu.core_type = #tpu.core_type<tc>, window_params = [{transform_indices = @transform_0, window_bounds = array<i64: 1, 18, 18, 128>}, {pipeline_mode = #tpu.pipeline_mode<synchronous>, transform_indices = @transform_1, window_bounds = array<i64: 1152, 256>}, {pipeline_mode = #tpu.pipeline_mode<synchronous>, transform_indices = @transform_2, window_bounds = array<i64: 1, 256>}, {transform_indices = @transform_3, window_bounds = array<i64: 1, 16, 16, 128>}, {transform_indices = @transform_4, window_bounds = array<i64: 1, 16, 16, 128>}]} {
    %c0 = arith.constant 0 : index
    %c0_0 = arith.constant 0 : index
    %c0_1 = arith.constant 0 : index
    %c0_2 = arith.constant 0 : index
    %0 = vector.load %arg1[%c0, %c0_0, %c0_1, %c0_2] : memref<1x18x18x128xbf16, #tpu.memory_space<vmem>>, vector<1x18x18x128xbf16>
    %1 = vector.shape_cast %0 : vector<1x18x18x128xbf16> to vector<18x18x128xbf16>
    %2 = vector.extract_strided_slice %1 {offsets = [0, 0, 0], sizes = [18, 16, 128], strides = [1, 1, 1]} : vector<18x18x128xbf16> to vector<18x16x128xbf16>
    %3 = vector.extract_strided_slice %1 {offsets = [0, 1, 0], sizes = [18, 16, 128], strides = [1, 1, 1]} : vector<18x18x128xbf16> to vector<18x16x128xbf16>
    %4 = vector.extract_strided_slice %1 {offsets = [0, 2, 0], sizes = [18, 16, 128], strides = [1, 1, 1]} : vector<18x18x128xbf16> to vector<18x16x128xbf16>
    %5 = tpu.concatenate %2, %3, %4 in 2 : vector<18x16x128xbf16>, vector<18x16x128xbf16>, vector<18x16x128xbf16> -> vector<18x16x384xbf16>
    %6 = vector.extract_strided_slice %5 {offsets = [0, 0, 0], sizes = [16, 16, 384], strides = [1, 1, 1]} : vector<18x16x384xbf16> to vector<16x16x384xbf16>
    %7 = vector.extract_strided_slice %5 {offsets = [1, 0, 0], sizes = [16, 16, 384], strides = [1, 1, 1]} : vector<18x16x384xbf16> to vector<16x16x384xbf16>
    %8 = vector.extract_strided_slice %5 {offsets = [2, 0, 0], sizes = [16, 16, 384], strides = [1, 1, 1]} : vector<18x16x384xbf16> to vector<16x16x384xbf16>
    %9 = tpu.concatenate %6, %7, %8 in 2 : vector<16x16x384xbf16>, vector<16x16x384xbf16>, vector<16x16x384xbf16> -> vector<16x16x1152xbf16>
    %10 = vector.shape_cast %9 : vector<16x16x1152xbf16> to vector<256x1152xbf16>
    %c0_3 = arith.constant 0 : index
    %c0_4 = arith.constant 0 : index
    %11 = vector.load %arg2[%c0_3, %c0_4] : memref<1152x256xbf16, #tpu.memory_space<vmem>>, vector<1152x256xbf16>
    %cst = arith.constant dense<0.000000e+00> : vector<256x256xf32>
    %12 = tpu.matmul %10, %11, %cst {dimension_numbers = #tpu.dot_dimension_numbers<[1], [0], [0], [1], [0, 0, 1, 1], [], []>} : vector<256x1152xbf16>, vector<1152x256xbf16>, vector<256x256xf32> -> vector<256x256xf32>
    %c0_5 = arith.constant 0 : index
    %c0_6 = arith.constant 0 : index
    %13 = vector.load %arg3[%c0_5, %c0_6] : memref<1x256xf32, #tpu.memory_space<vmem>>, vector<1x256xf32>
    %14 = vector.broadcast %13 : vector<1x256xf32> to vector<256x256xf32>
    %15 = arith.addf %12, %14 : vector<256x256xf32>
    %16 = vector.extract_strided_slice %15 {offsets = [0, 0], sizes = [256, 128], strides = [1, 1]} : vector<256x256xf32> to vector<256x128xf32>
    %17 = vector.extract_strided_slice %15 {offsets = [0, 128], sizes = [256, 128], strides = [1, 1]} : vector<256x256xf32> to vector<256x128xf32>
    %cst_7 = arith.constant 0.000000e+00 : f32
    %18 = vector.broadcast %cst_7 : f32 to vector<256x128xf32>
    %19 = arith.subf %18, %17 : vector<256x128xf32>
    %20 = math.exp %19 : vector<256x128xf32>
    %cst_8 = arith.constant 1.000000e+00 : f32
    %21 = vector.broadcast %cst_8 : f32 to vector<256x128xf32>
    %22 = arith.addf %21, %20 : vector<256x128xf32>
    %23 = tpu.reciprocal %22 {approx = true} : vector<256x128xf32> -> vector<256x128xf32>
    %24 = arith.mulf %16, %23 : vector<256x128xf32>
    %cst_9 = arith.constant dense<0.000000e+00> : vector<128xf32>
    %25 = vector.multi_reduction <add>, %24, %cst_9 [0] : vector<256x128xf32> to vector<128xf32>
    %26 = vector.shape_cast %25 : vector<128xf32> to vector<1x128xf32>
    %cst_10 = arith.constant 2.560000e+02 : f32
    %27 = vector.broadcast %cst_10 : f32 to vector<1x128xf32>
    %28 = arith.divf %26, %27 : vector<1x128xf32>
    %29 = vector.broadcast %28 : vector<1x128xf32> to vector<256x128xf32>
    %30 = arith.subf %24, %29 : vector<256x128xf32>
    %31 = arith.mulf %30, %30 : vector<256x128xf32>
    %cst_11 = arith.constant dense<0.000000e+00> : vector<128xf32>
    %32 = vector.multi_reduction <add>, %31, %cst_11 [0] : vector<256x128xf32> to vector<128xf32>
    %33 = vector.shape_cast %32 : vector<128xf32> to vector<1x128xf32>
    %cst_12 = arith.constant 2.560000e+02 : f32
    %34 = vector.broadcast %cst_12 : f32 to vector<1x128xf32>
    %35 = arith.divf %33, %34 : vector<1x128xf32>
    %cst_13 = arith.constant 9.99999974E-6 : f32
    %36 = vector.broadcast %cst_13 : f32 to vector<1x128xf32>
    %37 = arith.addf %35, %36 : vector<1x128xf32>
    %38 = math.rsqrt %37 : vector<1x128xf32>
    %39 = vector.broadcast %38 : vector<1x128xf32> to vector<256x128xf32>
    %40 = arith.mulf %30, %39 : vector<256x128xf32>
    %c0_14 = arith.constant 0 : index
    %c0_15 = arith.constant 0 : index
    %c0_16 = arith.constant 0 : index
    %c0_17 = arith.constant 0 : index
    %41 = vector.load %arg4[%c0_14, %c0_15, %c0_16, %c0_17] : memref<1x16x16x128xf32, #tpu.memory_space<vmem>>, vector<1x16x16x128xf32>
    %42 = vector.shape_cast %41 : vector<1x16x16x128xf32> to vector<16x16x128xf32>
    %43 = vector.shape_cast %42 : vector<16x16x128xf32> to vector<256x128xf32>
    %44 = arith.addf %40, %43 : vector<256x128xf32>
    %45 = vector.shape_cast %44 : vector<256x128xf32> to vector<1x16x16x128xf32>
    %c0_18 = arith.constant 0 : index
    %c0_19 = arith.constant 0 : index
    %c0_20 = arith.constant 0 : index
    %c0_21 = arith.constant 0 : index
    %46 = vector.load %arg5[%c0_18, %c0_19, %c0_20, %c0_21] : memref<1x16x16x128xf32, #tpu.memory_space<vmem>>, vector<1x16x16x128xf32>
    tpu.vector_store %arg5[%c0_18, %c0_19, %c0_20, %c0_21], %45 {strides = array<i32>} : memref<1x16x16x128xf32, #tpu.memory_space<vmem>>, vector<1x16x16x128xf32>,
    return
  }
  func.func @transform_0(%arg0: i32) -> (i32, i32, i32, i32) {
    %c0_i32 = arith.constant 0 : i32
    %c0_i32_0 = arith.constant 0 : i32
    %c0_i32_1 = arith.constant 0 : i32
    %c0_i32_2 = arith.constant 0 : i32
    return %arg0, %c0_i32, %c0_i32_0, %c0_i32_1 : i32, i32, i32, i32
  }
  func.func @transform_1(%arg0: i32) -> (i32, i32) {
    %c0_i32 = arith.constant 0 : i32
    %c0_i32_0 = arith.constant 0 : i32
    %c0_i32_1 = arith.constant 0 : i32
    return %c0_i32, %c0_i32_0 : i32, i32
  }
  func.func @transform_2(%arg0: i32) -> (i32, i32) {
    %c0_i32 = arith.constant 0 : i32
    %c0_i32_0 = arith.constant 0 : i32
    %c0_i32_1 = arith.constant 0 : i32
    return %c0_i32, %c0_i32_0 : i32, i32
  }
  func.func @transform_3(%arg0: i32) -> (i32, i32, i32, i32) {
    %c0_i32 = arith.constant 0 : i32
    %c0_i32_0 = arith.constant 0 : i32
    %c0_i32_1 = arith.constant 0 : i32
    %c0_i32_2 = arith.constant 0 : i32
    return %arg0, %c0_i32, %c0_i32_0, %c0_i32_1 : i32, i32, i32, i32
  }
  func.func @transform_4(%arg0: i32) -> (i32, i32, i32, i32) {
    %c0_i32 = arith.constant 0 : i32
    %c0_i32_0 = arith.constant 0 : i32
    %c0_i32_1 = arith.constant 0 : i32
    %c0_i32_2 = arith.constant 0 : i32
    return %arg0, %c0_i32, %c0_i32_0, %c0_i32_1 : i32, i32, i32, i32
  }
}

</mosaic_0001>

<bundles_post_ra>
// kernel: res_gconv_block.2
= control target key start
LH: loop header
LB: loop body
LE: loop exit
PB: predicated region body
PF: predicated region fallthrough
CT: control target
= control target key end

     0   :  { %s4563_s12 = smov 0   ;;  %s6260_s0 = inlined_call_operand.vmem [shape: bf16[2,18,18,128], index: 0, kind: input, shape index: {}]   ;;  %s6261_s1 = inlined_call_operand.vmem [shape: bf16[1152,256], index: 1, kind: input, shape index: {}]   ;;  %s6262_s2 = inlined_call_operand.vmem [shape: f32[1,256], index: 2, kind: input, shape index: {}]   ;;  %s6263_s3 = inlined_call_operand.vmem [shape: bf16[2,16,16,128], index: 3, kind: output, shape index: {}]  }
   0x1 LB: > { %s3311_s13 = sadd.s32 4294967295, %s4540_s12   ;;  %p3315_p0 = scmp.ge.s32.totalorder %s4540_s12, 1  ;;  %s4540_s12 = sphi %s4563_s12, %s13_s12  }
   0x2   : > { %p137_p1 = scmp.lt.s32.totalorder %s4540_s12, 3 }
   0x4   : > { %p138_p2 = pnand %p3315_p0, %p137_p1 }
   0x5   : > { %v4055_v0 = vld [vmem:[%s6261_s1 + $0x4] ss:$8 sps:$4 sm:$0xff] (!%p138_p2)   ;;  %v4059_v2 = vld [vmem:[%s6261_s1] ss:$8 sps:$4 sm:$0xff] (!%p138_p2)   ;;  %v4061_v4 = vld [vmem:[%s6261_s1 + $0x14] ss:$8 sps:$4 sm:$0xff] (!%p138_p2)  }
   0x6   : > { %141 = sbr.rel (%p138_p2) target bundleno = 809 (0x329), region = 32  ;;  %v4057_v1 = vld [vmem:[%s6261_s1 + $0x204] ss:$8 sps:$4 sm:$0xff] (!%p138_p2)   ;;  %1572 = vmatprep.subr.bf16.mxu1 (!%p138_p2), %v4055_v0  ;;  %v4060_v3 = vld [vmem:[%s6261_s1 + $0x200] ss:$8 sps:$4 sm:$0xff] (!%p138_p2)   ;;  %p161_p3 = scmp.lt.s32.totalorder (!%p138_p2), %s3311_s13, 1 }
   0x7   : > { %1958 = vmatprep.subr.bf16.mxu0 (!%p138_p2), %v4057_v1  ;;  %1573 = vmatpush1.bf16.msra.mxu1 (!%p138_p2), %v4059_v2  ;;  %v4063_v5 = vld [vmem:[%s6261_s1 + $0x214] ss:$8 sps:$4 sm:$0xff] (!%p138_p2)   ;;  %v4065_v6 = vld [vmem:[%s6261_s1 + $0x10] ss:$8 sps:$4 sm:$0xff] (!%p138_p2)   ;;  %v4067_v8 = vld [vmem:[%s6261_s1 + $0x24] ss:$8 sps:$4 sm:$0xff] (!%p138_p2)  }
   0x8   : > { %1959 = vmatpush1.bf16.msra.mxu0 (!%p138_p2), %v4060_v3  ;;  %1574 = vmatprep.subr.bf16.mxu1 (!%p138_p2), %v4061_v4  ;;  %v4066_v7 = vld [vmem:[%s6261_s1 + $0x210] ss:$8 sps:$4 sm:$0xff] (!%p138_p2)   ;;  %v4069_v9 = vld [vmem:[%s6261_s1 + $0x224] ss:$8 sps:$4 sm:$0xff] (!%p138_p2)   ;;  %v4071_v10 = vld [vmem:[%s6261_s1 + $0x20] ss:$8 sps:$4 sm:$0xff] (!%p138_p2)  }
   0x9   : > { %1960 = vmatprep.subr.bf16.mxu0 (!%p138_p2), %v4063_v5  ;;  %v4072_v11 = vld [vmem:[%s6261_s1 + $0x220] ss:$8 sps:$4 sm:$0xff] (!%p138_p2)   ;;  %v4073_v12 = vld [vmem:[%s6261_s1 + $0x34] ss:$8 sps:$4 sm:$0xff] (!%p138_p2)   ;;  %v4077_v14 = vld [vmem:[%s6261_s1 + $0x30] ss:$8 sps:$4 sm:$0xff] (!%p138_p2)  }
   0xa   : > { %v4075_v13 = vld [vmem:[%s6261_s1 + $0x234] ss:$8 sps:$4 sm:$0xff] (!%p138_p2)   ;;  %v4078_v15 = vld [vmem:[%s6261_s1 + $0x230] ss:$8 sps:$4 sm:$0xff] (!%p138_p2)   ;;  %v4079_v16 = vld [vmem:[%s6261_s1 + $0x44] ss:$8 sps:$4 sm:$0xff] (!%p138_p2)  }
   0xb   : > { %1575 = vmatpush1.bf16.msra.mxu1 (!%p138_p2), %v4065_v6  ;;  %v4081_v17 = vld [vmem:[%s6261_s1 + $0x244] ss:$8 sps:$4 sm:$0xff] (!%p138_p2)   ;;  %v4083_v18 = vld [vmem:[%s6261_s1 + $0x40] ss:$8 sps:$4 sm:$0xff] (!%p138_p2)   ;;  %v4085_v20 = vld [vmem:[%s6261_s1 + $0x54] ss:$8 sps:$4 sm:$0xff] (!%p138_p2)  }
   0xc   : > { %1961 = vmatpush1.bf16.msra.mxu0 (!%p138_p2), %v4066_v7  ;;  %1576 = vmatprep.subr.bf16.mxu1 (!%p138_p2), %v4067_v8  ;;  %v4084_v19 = vld [vmem:[%s6261_s1 + $0x240] ss:$8 sps:$4 sm:$0xff] (!%p138_p2)   ;;  %v4087_v21 = vld [vmem:[%s6261_s1 + $0x254] ss:$8 sps:$4 sm:$0xff] (!%p138_p2)   ;;  %v4089_v22 = vld [vmem:[%s6261_s1 + $0x50] ss:$8 sps:$4 sm:$0xff] (!%p138_p2)  }
   0xd   : > { %1962 = vmatprep.subr.bf16.mxu0 %v4069_v9  ;;  %v4090_v23 = vld [vmem:[%s6261_s1 + $0x250] ss:$8 sps:$4 sm:$0xff]   ;;  %v4091_v24 = vld [vmem:[%s6261_s1 + $0x64] ss:$8 sps:$4 sm:$0xff]   ;;  %v4095_v26 = vld [vmem:[%s6261_s1 + $0x60] ss:$8 sps:$4 sm:$0xff]  }
   0xe   : > { %v4093_v25 = vld [vmem:[%s6261_s1 + $0x264] ss:$8 sps:$4 sm:$0xff]   ;;  %v4096_v27 = vld [vmem:[%s6261_s1 + $0x260] ss:$8 sps:$4 sm:$0xff]   ;;  %v4097_v28 = vld [vmem:[%s6261_s1 + $0x74] ss:$8 sps:$4 sm:$0xff]  }
   0xf   : > { %1577 = vmatpush1.bf16.msra.mxu1 %v4071_v10  ;;  %v4099_v29 = vld [vmem:[%s6261_s1 + $0x274] ss:$8 sps:$4 sm:$0xff]   ;;  %v4101_v30 = vld [vmem:[%s6261_s1 + $0x70] ss:$8 sps:$4 sm:$0xff]   ;;  %v4103_v32 = vld [vmem:[%s6261_s1 + $0x84] ss:$8 sps:$4 sm:$0xff]  }
  0x10   : > { %1963 = vmatpush1.bf16.msra.mxu0 %v4072_v11  ;;  %1578 = vmatprep.subr.bf16.mxu1 %v4073_v12  ;;  %v4102_v31 = vld [vmem:[%s6261_s1 + $0x270] ss:$8 sps:$4 sm:$0xff]   ;;  %v4105_v33 = vld [vmem:[%s6261_s1 + $0x284] ss:$8 sps:$4 sm:$0xff]   ;;  %v4107_v34 = vld [vmem:[%s6261_s1 + $0x80] ss:$8 sps:$4 sm:$0xff]  }
  0x11   : > { %1964 = vmatprep.subr.bf16.mxu0 %v4075_v13  ;;  %v4108_v35 = vld [vmem:[%s6261_s1 + $0x280] ss:$8 sps:$4 sm:$0xff]   ;;  %v4109_v36 = vld [vmem:[%s6261_s1 + $0x94] ss:$8 sps:$4 sm:$0xff]   ;;  %s6268_s13 = smov (!%p161_p3, %s3311_s13), 1  ;;  %vm623_vm1 = vcmask 1046528  }
  0x12   : > { %v4111_v37 = vld [vmem:[%s6261_s1 + $0x294] ss:$8 sps:$4 sm:$0xff]   ;;  %v4113_v38 = vld [vmem:[%s6261_s1 + $0x90] ss:$8 sps:$4 sm:$0xff]   ;;  %v4115_v40 = vld [vmem:[%s6261_s1 + $0xa4] ss:$8 sps:$4 sm:$0xff]  }
  0x13   : > { %1579 = vmatpush1.bf16.msra.mxu1 %v4077_v14  ;;  %v4114_v39 = vld [vmem:[%s6261_s1 + $0x290] ss:$8 sps:$4 sm:$0xff]   ;;  %s4045_s21 = smul.u32 216, %s6268_s13  ;;  %v4117_v41 = vld [vmem:[%s6261_s1 + $0x2a4] ss:$8 sps:$4 sm:$0xff]   ;;  %s3565_s30 = sshll.u32 %s6268_s13, 7 }
  0x14   : > { %1965 = vmatpush1.bf16.msra.mxu0 %v4078_v15  ;;  %1580 = vmatprep.subr.bf16.mxu1 %v4079_v16  ;;  %v4119_v42 = vld [vmem:[%s6261_s1 + $0xa0] ss:$8 sps:$4 sm:$0xff]   ;;  %v4121_v44 = vld [vmem:[%s6261_s1 + $0xb4] ss:$8 sps:$4 sm:$0xff]   ;;  %vm388_vm0 = vsmask.f32 7424  ;;  %s6133_s6 = scalar_lea.vmem %s6263_s3, %s3565_s30 }
  0x15   : > { %1966 = vmatprep.subr.bf16.mxu0 %v4081_v17  ;;  %v4120_v43 = vld [vmem:[%s6261_s1 + $0x2a0] ss:$8 sps:$4 sm:$0xff]   ;;  %s4716_s5 = scalar_lea.vmem %s6260_s0, %s4045_s21  ;;  %v4123_v45 = vld [vmem:[%s6261_s1 + $0x2b4] ss:$8 sps:$4 sm:$0xff]   ;;  %v4125_v46 = vld [vmem:[%s6261_s1 + $0xb0] ss:$8 sps:$4 sm:$0xff]  }
  0x16   : > { %v4126_v47 = vld [vmem:[%s6261_s1 + $0x2b0] ss:$8 sps:$4 sm:$0xff]   ;;  %v4127_v48 = vld [vmem:[%s6261_s1 + $0xc4] ss:$8 sps:$4 sm:$0xff]   ;;  %v4131_v58 = vld [vmem:[%s6261_s1 + $0xc0] ss:$8 sps:$4 sm:$0xff]  }
  0x17   : > { %1581 = vmatpush1.bf16.msra.mxu1 %v4083_v18  ;;  %v4129_v49 = vld [vmem:[%s6261_s1 + $0x2c4] ss:$8 sps:$4 sm:$0xff]   ;;  %v4737_v51 = vld [vmem:[%s4716_s5 + $0x8] ss:$0 sps:$4 sm:$0x11]   ;;  %v4785_v14 = vld [vmem:[%s4716_s5 + $0x18] sm:$0xff]  }
  0x18   : > { %1967 = vmatpush1.bf16.msra.mxu0 %v4084_v19  ;;  %1582 = vmatprep.subr.bf16.mxu1 %v4085_v20  ;;  %v4734_v50 = vld [vmem:[%s4716_s5] sm:$0xff]   ;;  %v4740_v52 = vld [vmem:[%s4716_s5 + $0xc] sm:$0xff]   ;;  %v397_v55 = vshll.u32 %v4737_v51, 16  ;;  %v4154_v56 = vld [vmem:[%s4716_s5 + $0x14] ss:$0 sps:$4 sm:$0x11]  }
  0x19   : > { %1968 = vmatprep.subr.bf16.mxu0 %v4087_v21  ;;  %v390_v53 = vshrl.u32 %v4734_v50, 16  ;;  %v392_v54 = vshll.u32 %v4734_v50, 16  ;;  %v627_v57 = vrot.slane %v4740_v52, 1  ;;  %v4132_v60 = vld [vmem:[%s6261_s1 + $0x2c0] ss:$8 sps:$4 sm:$0xff]   ;;  %v628_v63 = vrot.slane %v4154_v56, 1 }
  0x1a   : > { %v4133_v61 = vld [vmem:[%s6261_s1 + $0xd4] ss:$8 sps:$4 sm:$0xff]   ;;  %v399_v62 = vrot.slane %v397_v55, 1  ;;  %v4137_v2 = vld [vmem:[%s6261_s1 + $0xd0] ss:$8 sps:$4 sm:$0xff]   ;;  %v404_v7 = vshll.u32 %v4740_v52, 16 }
  0x1b   : > { %1583 = vmatpush1.bf16.msra.mxu1 %v4089_v22  ;;  %v394_v59 = vrot.slane %v392_v54, 1  ;;  %v4135_v0 = vld [vmem:[%s6261_s1 + $0x2d4] ss:$8 sps:$4 sm:$0xff]   ;;  %v4763_v3 = vsel %vm623_vm1, %v627_v57, %v628_v63  ;;  %v4138_v4 = vld [vmem:[%s6261_s1 + $0x2d0] ss:$8 sps:$4 sm:$0xff]   ;;  %v402_v11 = vshrl.u32 %v4740_v52, 16 }
  0x1c   : > { %1969 = vmatpush1.bf16.msra.mxu0 %v4090_v23  ;;  %1584 = vmatprep.subr.bf16.mxu1 %v4091_v24  ;;  %v4139_v5 = vld [vmem:[%s6261_s1 + $0xe4] ss:$8 sps:$4 sm:$0xff]   ;;  %v4143_v9 = vld [vmem:[%s6261_s1 + $0xe0] ss:$8 sps:$4 sm:$0xff]   ;;  %v406_v12 = vrot.slane %v404_v7, 1  ;;  %v409_v13 = vshll.u32 %v4154_v56, 16 }
  0x1d   : > { %1970 = vmatprep.subr.bf16.mxu0 %v4093_v25  ;;  %v395_v1 = vor.u32 %v394_v59, %v390_v53  ;;  %1990 = vmatprep.mubr.bf16.mxu0 %v4763_v3  ;;  %v4141_v8 = vld [vmem:[%s6261_s1 + $0x2e4] ss:$8 sps:$4 sm:$0xff]   ;;  %v4144_v10 = vld [vmem:[%s6261_s1 + $0x2e0] ss:$8 sps:$4 sm:$0xff]   ;;  %v4145_v15 = vld [vmem:[%s6261_s1 + $0xf4] ss:$8 sps:$4 sm:$0xff]  }
  0x1e   : > { %v4147_v16 = vld [vmem:[%s6261_s1 + $0x2f4] ss:$8 sps:$4 sm:$0xff]   ;;  %v625_v17 = vrot.slane %v4737_v51, 1  ;;  %v4149_v18 = vld [vmem:[%s6261_s1 + $0xf0] ss:$8 sps:$4 sm:$0xff]   ;;  %v407_v22 = vor.u32 %v406_v12, %v402_v11  ;;  %v411_v23 = vrot.slane %v409_v13, 1 }
  0x1f   : > { %1585 = vmatpush1.bf16.msra.mxu1 %v4095_v26  ;;  %v400_v6 = vsel %vm388_vm0, %v395_v1, %v399_v62  ;;  %v4150_v19 = vld [vmem:[%s6261_s1 + $0x2f0] ss:$8 sps:$4 sm:$0xff]   ;;  %v4157_v20 = vld [vmem:[%s6261_s1 + $0x104] ss:$8 sps:$4 sm:$0xff]   ;;  %v416_v25 = vshll.u32 %v4785_v14, 16  ;;  %v624_v26 = vrot.slane %v4734_v50, 1 }
  0x20   : > { %1971 = vmatpush1.bf16.msra.mxu0 %v4096_v27  ;;  %1586 = vmatprep.subr.bf16.mxu1 %v4097_v28  ;;  %v4165_v21 = vld [vmem:[%s4716_s5 + $0x20] ss:$0 sps:$4 sm:$0x11]   ;;  %v4160_v24 = vld [vmem:[%s6261_s1 + $0x304] ss:$8 sps:$4 sm:$0xff]   ;;  %v4858_v56 = vld [vmem:[%s4716_s5 + $0x30] sm:$0xff]  }
  0x21   : > { %1972 = vmatprep.subr.bf16.mxu0 %v4099_v29  ;;  %1604 = vmatprep.mubr.bf16.mxu1 %v400_v6  ;;  %v4155_v27 = vld [vmem:[%s6261_s1 + $0x100] ss:$8 sps:$4 sm:$0xff]   ;;  %v4816_v29 = vsel %vm623_vm1, %v624_v26, %v625_v17  ;;  %v4174_v57 = vld [vmem:[%s6261_s1 + $0x334] ss:$8 sps:$4 sm:$0xff]   ;;  %v4172_v62 = vld [vmem:[%s6261_s1 + $0x330] ss:$8 sps:$4 sm:$0xff]  }
  0x22   : > { %v4158_v28 = vld [vmem:[%s6261_s1 + $0x300] ss:$8 sps:$4 sm:$0xff]   ;;  %v4182_v1 = vld [vmem:[%s6261_s1 + $0x344] ss:$8 sps:$4 sm:$0xff]   ;;  %v4185_v7 = vld [vmem:[%s6261_s1 + $0x354] ss:$8 sps:$4 sm:$0xff]  }
  0x23   : > { %1587 = vmatpush1.bf16.msra.mxu1 %v4101_v30  ;;  %v630_v30 = vrot.slane %v4785_v14, 1  ;;  %v4180_v6 = vld [vmem:[%s6261_s1 + $0x340] ss:$8 sps:$4 sm:$0xff]   ;;  %v4198_v13 = vld [vmem:[%s4716_s5 + $0x44] ss:$0 sps:$4 sm:$0x11]  }
  0x24   : > { %1973 = vmatpush1.bf16.msra.mxu0 %v4102_v31  ;;  %1588 = vmatprep.subr.bf16.mxu1 %v4103_v32  ;;  %v631_v31 = vrot.slane %v4165_v21, 1  ;;  %v414_v32 = vshrl.u32 %v4785_v14, 16  ;;  %v4899_v12 = vld [vmem:[%s4716_s5 + $0x3c] sm:$0xff]   ;;  %v640_v26 = vrot.slane %v4198_v13, 1 }
  0x25   : > { %1974 = vmatprep.subr.bf16.mxu0 %v4105_v33  ;;  %v421_v33 = vshll.u32 %v4165_v21, 16  ;;  %v4199_v17 = vld [vmem:[%s6261_s1 + $0x140] ss:$8 sps:$4 sm:$0xff]   ;;  %v452_v21 = vshll.u32 %v4899_v12, 16 }
  0x27   : > { %1589 = vmatpush1.bf16.msra.mxu1 %v4107_v34  ;;  %v412_v34 = vsel %vm388_vm0, %v407_v22, %v411_v23  ;;  %v4212_v22 = vld [vmem:[%s6261_s1 + $0x154] ss:$8 sps:$4 sm:$0xff]   ;;  %v4193_v23 = vld [vmem:[%s6261_s1 + $0x364] ss:$8 sps:$4 sm:$0xff]  }
  0x28   : > { %1975 = vmatpush1.bf16.msra.mxu0 %v4108_v35  ;;  %1590 = vmatprep.subr.bf16.mxu1 %v4109_v36  ;;  %v418_v35 = vrot.slane %v416_v25, 1  ;;  %v4822_v36 = vld [vmem:[%s4716_s5 + $0x24] sm:$0xff]   ;;  %v639_v25 = vrot.slane %v4899_v12, 1 }
  0x29   : > { %1976 = vmatprep.subr.bf16.mxu0 %v4111_v37  ;;  %v4163_v37 = vld [vmem:[%s6261_s1 + $0x314] ss:$8 sps:$4 sm:$0xff]   ;;  %v426_v53 = vshrl.u32 %v4822_v36, 16 }
  0x2b   : > { %1591 = vmatpush1.bf16.msra.mxu1 %v4113_v38  ;;  %v4168_v38 = vld [vmem:[%s6261_s1 + $0x114] ss:$8 sps:$4 sm:$0xff]  }
  0x2c   : > { %1977 = vmatpush1.bf16.msra.mxu0 %v4114_v39  ;;  %1592 = vmatprep.subr.bf16.mxu1 %v4115_v40  ;;  %v4176_v39 = vld [vmem:[%s4716_s5 + $0x2c] ss:$0 sps:$4 sm:$0x11]   ;;  %v4161_v40 = vld [vmem:[%s6261_s1 + $0x310] ss:$8 sps:$4 sm:$0xff]  }
  0x2d   : > { %1978 = vmatprep.subr.bf16.mxu0 %v4117_v41  ;;  %v4836_v41 = vsel %vm623_vm1, %v630_v30, %v631_v31  ;;  %v433_v55 = vshll.u32 %v4176_v39, 16  ;;  %v454_v31 = vrot.slane %v452_v21, 1  ;;  %v4251_v21 = vld [vmem:[%s6261_s1 + $0x194] ss:$8 sps:$4 sm:$0xff]  }
  0x2f   : > { %1593 = vmatpush1.bf16.msra.mxu1 %v4119_v42  ;;  %v4166_v42 = vld [vmem:[%s6261_s1 + $0x110] ss:$8 sps:$4 sm:$0xff]  }
  0x30   : > { %1979 = vmatpush1.bf16.msra.mxu0 %v4120_v43  ;;  %1594 = vmatprep.subr.bf16.mxu1 %v4121_v44  ;;  %v419_v43 = vor.u32 %v418_v35, %v414_v32  ;;  %v423_v44 = vrot.slane %v421_v33, 1  ;;  %v457_v32 = vshll.u32 %v4198_v13, 16  ;;  %v4937_v33 = vld [vmem:[%s4716_s5 + $0x48] sm:$0xff]   ;;  %v4941_v35 = vsel %vm623_vm1, %v639_v25, %v640_v26 }
  0x31   : > { %1980 = vmatprep.subr.bf16.mxu0 %v4123_v45  ;;  %v4171_v45 = vld [vmem:[%s6261_s1 + $0x324] ss:$8 sps:$4 sm:$0xff]  }
  0x32   : > { %v4854_v51 = vsel %vm388_vm0, %v419_v43, %v423_v44  ;;  %v464_v43 = vshll.u32 %v4937_v33, 16  ;;  %v4204_v44 = vld [vmem:[%s6261_s1 + $0x384] ss:$8 sps:$4 sm:$0xff]  }
  0x33   : > { %1595 = vmatpush1.bf16.msra.mxu1 %v4125_v46  ;;  %v428_v46 = vshll.u32 %v4822_v36, 16  ;;  %v4226_v26 = vld [vmem:[%s6261_s1 + $0x3c4] ss:$8 sps:$4 sm:$0xff]  }
  0x34   : > { %1981 = vmatpush1.bf16.msra.mxu0 %v4126_v47  ;;  %1596 = vmatprep.subr.bf16.mxu1 %v4127_v48  ;;  %v4179_v47 = vld [vmem:[%s6261_s1 + $0x124] ss:$8 sps:$4 sm:$0xff]   ;;  %v4169_v48 = vld [vmem:[%s6261_s1 + $0x320] ss:$8 sps:$4 sm:$0xff]  }
  0x35   : > { %1982 = vmatprep.subr.bf16.mxu0 %v4129_v49  ;;  %v633_v49 = vrot.slane %v4822_v36, 1  ;;  %v430_v54 = vrot.slane %v428_v46, 1 }
  0x37   : > { %1597 = vmatpush1.bf16.msra.mxu1 %v4131_v58  ;;  %v4177_v58 = vld [vmem:[%s6261_s1 + $0x120] ss:$8 sps:$4 sm:$0xff]   ;;  %v431_v63 = vor.u32 %v430_v54, %v426_v53  ;;  %v4969_v53 = vld [vmem:[%s4716_s5 + $0x54] sm:$0xff]  }
  0x38   : > { %1983 = vmatpush1.bf16.msra.mxu0 %v4132_v60  ;;  %1598 = vmatprep.subr.bf16.mxu1 %v4133_v61  ;;  %v4187_v60 = vld [vmem:[%s4716_s5 + $0x38] ss:$0 sps:$4 sm:$0x11]   ;;  %v4190_v61 = vld [vmem:[%s6261_s1 + $0x134] ss:$8 sps:$4 sm:$0xff]  }
  0x39   : > { %1984 = vmatprep.subr.bf16.mxu0 %v4135_v0  ;;  %v435_v0 = vrot.slane %v433_v55, 1  ;;  %v445_v11 = vshll.u32 %v4187_v60, 16  ;;  %v466_v55 = vrot.slane %v464_v43, 1  ;;  %v4256_v43 = vld [vmem:[%s6261_s1 + $0x1a4] ss:$8 sps:$4 sm:$0xff]  }
  0x3b   : > { %1599 = vmatpush1.bf16.msra.mxu1 %v4137_v2  ;;  %v636_v2 = vrot.slane %v4858_v56, 1 }
  0x3c   : > { %1985 = vmatpush1.bf16.msra.mxu0 %v4138_v4  ;;  %1600 = vmatprep.subr.bf16.mxu1 %v4139_v5  ;;  %v637_v4 = vrot.slane %v4187_v60, 1  ;;  %v4188_v5 = vld [vmem:[%s6261_s1 + $0x130] ss:$8 sps:$4 sm:$0xff]  }
  0x3d   : > { %1986 = vmatprep.subr.bf16.mxu0 %v4141_v8  ;;  %v4895_v8 = vsel %vm388_vm0, %v431_v63, %v435_v0  ;;  %v4205_v60 = vld [vmem:[%s6261_s1 + $0x390] ss:$8 sps:$4 sm:$0xff]  }
  0x3e   : > { %v4232_v63 = vld [vmem:[%s6261_s1 + $0x170] ss:$8 sps:$4 sm:$0xff]  }
  0x3f   : > { %1601 = vmatpush1.bf16.msra.mxu1 %v4143_v9  ;;  %v438_v9 = vshrl.u32 %v4858_v56, 16 }
  0x40   : > { %1987 = vmatpush1.bf16.msra.mxu0 %v4144_v10  ;;  %1602 = vmatprep.subr.bf16.mxu1 %v4145_v15  ;;  %v4183_v15 = vld [vmem:[%s6261_s1 + $0x350] ss:$8 sps:$4 sm:$0xff]  }
  0x41   : > { %1988 = vmatprep.subr.bf16.mxu0 %v4147_v16  ;;  %v4906_v16 = vsel %vm623_vm1, %v636_v2, %v637_v4  ;;  %v476_v2 = vshll.u32 %v4969_v53, 16  ;;  %v4243_v4 = vld [vmem:[%s6261_s1 + $0x184] ss:$8 sps:$4 sm:$0xff]  }
  0x43   : > { %1603 = vmatpush1.bf16.msra.mxu1 %v4149_v18  ;;  %v4201_v18 = vld [vmem:[%s6261_s1 + $0x144] ss:$8 sps:$4 sm:$0xff]   ;;  %v478_v13 = vrot.slane %v476_v2, 1  ;;  %v4262_v2 = vld [vmem:[%s6261_s1 + $0x1b0] ss:$8 sps:$4 sm:$0xff]  }
  0x44   : > { %1989 = vmatpush1.bf16.msra.mxu0 %v4150_v19  ;;  %1765 = vmatprep.subr.bf16.mxu1 %v4157_v20  ;;  %v447_v20 = vrot.slane %v445_v11, 1  ;;  %v474_v11 = vshrl.u32 %v4969_v53, 16 }
  0x45   : > { %2151 = vmatprep.subr.bf16.mxu0 %v4160_v24  ;;  %v4191_v24 = vld [vmem:[%s6261_s1 + $0x360] ss:$8 sps:$4 sm:$0xff]  }
  0x46   : > { %1605 = vmatmul.mubr.bf16.vlgmr.msra.gmra.mrb[0].mxu1 %v4734_v50  ;;  %v634_v50 = vrot.slane %v4176_v39, 1  ;;  %v4194_v39 = vld [vmem:[%s6261_s1 + $0x370] ss:$8 sps:$4 sm:$0xff]  }
  0x47   : > { %1991 = vmatmul.mubr.bf16.vlgmr.msra.gmra.mrb[0].mxu0 %v412_v34  ;;  %1766 = vmatpush1.bf16.msra.mxu1 %v4155_v27  ;;  %v4196_v27 = vld [vmem:[%s6261_s1 + $0x374] ss:$8 sps:$4 sm:$0xff]  }
  0x48   : > { %2152 = vmatpush1.bf16.msra.mxu0 %v4158_v28  ;;  %1614 = vmatprep.mubr.bf16.mxu1 %v412_v34  ;;  %v4867_v59 = vsel %vm623_vm1, %v633_v49, %v634_v50  ;;  %v450_v28 = vshrl.u32 %v4899_v12, 16  ;;  %v4209_v34 = vld [vmem:[%s4716_s5 + $0x50] ss:$0 sps:$4 sm:$0x11]   ;;  %v462_v49 = vshrl.u32 %v4937_v33, 16 }
  0x49   : > { %2153 = vmatprep.subr.bf16.mxu0 %v4163_v37  ;;  %2000 = vmatprep.mubr.bf16.mxu0 %v4836_v41  ;;  %v4210_v37 = vld [vmem:[%s6261_s1 + $0x150] ss:$8 sps:$4 sm:$0xff]   ;;  %v643_v46 = vrot.slane %v4209_v34, 1  ;;  %v469_v50 = vshll.u32 %v4209_v34, 16 }
  0x4a   : > { %1767 = vmatprep.subr.bf16.mxu1 %v4168_v38  ;;  %v4223_v38 = vld [vmem:[%s6261_s1 + $0x164] ss:$8 sps:$4 sm:$0xff]   ;;  %v467_v0 = vor.u32 %v466_v55, %v462_v49  ;;  %v4264_v55 = vld [vmem:[%s6261_s1 + $0x1b4] ss:$8 sps:$4 sm:$0xff]  }
  0x4b   : > { %1768 = vmatpush1.bf16.msra.mxu1 %v4166_v42  ;;  %v459_v42 = vrot.slane %v457_v32, 1 }
  0x4c   : > { %2154 = vmatpush1.bf16.msra.mxu0 %v4161_v40  ;;  %1769 = vmatprep.subr.bf16.mxu1 %v4179_v47  ;;  %v455_v40 = vor.u32 %v454_v31, %v450_v28  ;;  %v4221_v47 = vld [vmem:[%s6261_s1 + $0x160] ss:$8 sps:$4 sm:$0xff]   ;;  %v4249_v31 = vld [vmem:[%s6261_s1 + $0x190] ss:$8 sps:$4 sm:$0xff]  }
  0x4d   : > { %2155 = vmatprep.subr.bf16.mxu0 %v4171_v45  ;;  %v642_v45 = vrot.slane %v4937_v33, 1 }
  0x4e   : > { %1615 = vmatmul.mubr.bf16.gmra.mrb[4].mxu1 %v4740_v52  ;;  %v440_v52 = vshll.u32 %v4858_v56, 16  ;;  %v4972_v54 = vsel %vm388_vm0, %v455_v40, %v459_v42  ;;  %v4229_v40 = vld [vmem:[%s6261_s1 + $0x3d4] ss:$8 sps:$4 sm:$0xff]   ;;  %v5051_v42 = vld [vmem:[%s4716_s5 + $0x6c] sm:$0xff]  }
  0x4f   : > { %2001 = vmatmul.mubr.bf16.gmra.mrb[4].mxu0 %v4854_v51  ;;  %1624 = vmatprep.mubr.bf16.mxu1 %v4854_v51 }
  0x50   : > { %2156 = vmatpush1.bf16.msra.mxu0 %v4169_v48  ;;  %2010 = vmatprep.mubr.bf16.mxu0 %v4867_v59  ;;  %v442_v10 = vrot.slane %v440_v52, 1  ;;  %v4202_v48 = vld [vmem:[%s6261_s1 + $0x380] ss:$8 sps:$4 sm:$0xff]   ;;  %v4215_v52 = vld [vmem:[%s6261_s1 + $0x3a4] ss:$8 sps:$4 sm:$0xff]  }
  0x51   : > { %2157 = vmatprep.subr.bf16.mxu0 %v4174_v57  ;;  %1770 = vmatpush1.bf16.msra.mxu1 %v4177_v58  ;;  %v4220_v57 = vld [vmem:[%s4716_s5 + $0x5c] ss:$0 sps:$4 sm:$0x11]  }
  0x52   : > { %1771 = vmatprep.subr.bf16.mxu1 %v4190_v61  ;;  %v443_v19 = vor.u32 %v442_v10, %v438_v9  ;;  %v4207_v58 = vld [vmem:[%s6261_s1 + $0x394] ss:$8 sps:$4 sm:$0xff]   ;;  %v4982_v61 = vsel %vm623_vm1, %v642_v45, %v643_v46 }
  0x53   : > { %v4218_v9 = vld [vmem:[%s6261_s1 + $0x3b4] ss:$8 sps:$4 sm:$0xff]  }
  0x54   : > { %2158 = vmatpush1.bf16.msra.mxu0 %v4172_v62  ;;  %v4934_v30 = vsel %vm388_vm0, %v443_v19, %v447_v20  ;;  %v4234_v62 = vld [vmem:[%s6261_s1 + $0x174] ss:$8 sps:$4 sm:$0xff]   ;;  %v4241_v19 = vld [vmem:[%s6261_s1 + $0x180] ss:$8 sps:$4 sm:$0xff]  }
  0x55   : > { %2159 = vmatprep.subr.bf16.mxu0 %v4182_v1  ;;  %1772 = vmatpush1.bf16.msra.mxu1 %v4188_v5  ;;  %v471_v1 = vrot.slane %v469_v50, 1  ;;  %v4213_v5 = vld [vmem:[%s6261_s1 + $0x3a0] ss:$8 sps:$4 sm:$0xff]   ;;  %v5072_v50 = vld [vmem:[%s4716_s5 + $0x74] ss:$0 sps:$4 sm:$0x11]  }
  0x56   : > { %1625 = vmatmul.mubr.bf16.gmra.mrb[8].mxu1 %v4785_v14  ;;  %1773 = vmatprep.subr.bf16.mxu1 %v4201_v18  ;;  %v4231_v18 = vld [vmem:[%s4716_s5 + $0x68] ss:$0 sps:$4 sm:$0x11]  }
  0x57   : > { %2011 = vmatmul.mubr.bf16.gmra.mrb[8].mxu0 %v4895_v8  ;;  %1634 = vmatprep.mubr.bf16.mxu1 %v4895_v8  ;;  %v5009_v10 = vsel %vm388_vm0, %v467_v0, %v471_v1  ;;  %v649_v28 = vrot.slane %v4231_v18, 1  ;;  %v493_v32 = vshll.u32 %v4231_v18, 16  ;;  %v498_v0 = vshrl.u32 %v5051_v42, 16  ;;  %v4244_v18 = vld [vmem:[%s6261_s1 + $0x400] ss:$8 sps:$4 sm:$0xff]  }
  0x58   : > { %2160 = vmatpush1.bf16.msra.mxu0 %v4180_v6  ;;  %2020 = vmatprep.mubr.bf16.mxu0 %v4906_v16  ;;  %v645_v6 = vrot.slane %v4969_v53, 1 }
  0x59   : > { %2161 = vmatprep.subr.bf16.mxu0 %v4185_v7  ;;  %1774 = vmatpush1.bf16.msra.mxu1 %v4199_v17  ;;  %v646_v7 = vrot.slane %v4220_v57, 1  ;;  %v5013_v17 = vld [vmem:[%s4716_s5 + $0x60] sm:$0xff]   ;;  %v495_v46 = vrot.slane %v493_v32, 1 }
  0x5a   : > { %1775 = vmatprep.subr.bf16.mxu1 %v4212_v22  ;;  %v4216_v22 = vld [vmem:[%s6261_s1 + $0x3b0] ss:$8 sps:$4 sm:$0xff]   ;;  %v488_v25 = vshll.u32 %v5013_v17, 16 }
  0x5b   : > { %v5020_v20 = vsel %vm623_vm1, %v645_v6, %v646_v7  ;;  %v5106_v6 = vld [vmem:[%s4716_s5 + $0x80] ss:$0 sps:$4 sm:$0x11]  }
  0x5c   : > { %2162 = vmatpush1.bf16.msra.mxu0 %v4183_v15  ;;  %v481_v15 = vshll.u32 %v4220_v57, 16  ;;  %v500_v57 = vshll.u32 %v5051_v42, 16 }
  0x5d   : > { %2163 = vmatprep.subr.bf16.mxu0 %v4193_v23  ;;  %1776 = vmatpush1.bf16.msra.mxu1 %v4210_v37  ;;  %v479_v23 = vor.u32 %v478_v13, %v474_v11  ;;  %v4224_v37 = vld [vmem:[%s6261_s1 + $0x3c0] ss:$8 sps:$4 sm:$0xff]  }
  0x5e   : > { %1635 = vmatmul.mubr.bf16.gmra.mrb[12].mxu1 %v4822_v36  ;;  %1777 = vmatprep.subr.bf16.mxu1 %v4223_v38  ;;  %v486_v38 = vshrl.u32 %v5013_v17, 16  ;;  %v502_v1 = vrot.slane %v500_v57, 1  ;;  %v5178_v57 = vld [vmem:[%s4716_s5 + $0x98] ss:$0 sps:$4 sm:$0x11]  }
  0x5f   : > { %2021 = vmatmul.mubr.bf16.gmra.mrb[12].mxu0 %v4934_v30  ;;  %1644 = vmatprep.mubr.bf16.mxu1 %v4934_v30 }
  0x60   : > { %2164 = vmatpush1.bf16.msra.mxu0 %v4191_v24  ;;  %2030 = vmatprep.mubr.bf16.mxu0 %v4941_v35  ;;  %v483_v24 = vrot.slane %v481_v15, 1  ;;  %v503_v11 = vor.u32 %v502_v1, %v498_v0  ;;  %v4267_v15 = vld [vmem:[%s6261_s1 + $0x1c0] ss:$8 sps:$4 sm:$0xff]   ;;  %v4283_v1 = vld [vmem:[%s6261_s1 + $0x430] ss:$8 sps:$4 sm:$0xff]  }
  0x61   : > { %2165 = vmatprep.subr.bf16.mxu0 %v4196_v27  ;;  %1778 = vmatpush1.bf16.msra.mxu1 %v4221_v47  ;;  %v648_v27 = vrot.slane %v5013_v17, 1  ;;  %v4237_v47 = vld [vmem:[%s6261_s1 + $0x3e4] ss:$8 sps:$4 sm:$0xff]  }
  0x62   : > { %1779 = vmatprep.subr.bf16.mxu1 %v4234_v62  ;;  %v5041_v34 = vsel %vm388_vm0, %v479_v23, %v483_v24  ;;  %v4240_v62 = vld [vmem:[%s6261_s1 + $0x3f4] ss:$8 sps:$4 sm:$0xff]   ;;  %v5125_v23 = vld [vmem:[%s4716_s5 + $0x84] sm:$0xff]  }
  0x63   : > { %v5060_v45 = vsel %vm623_vm1, %v648_v27, %v649_v28  ;;  %v5139_v27 = vld [vmem:[%s4716_s5 + $0x8c] ss:$0 sps:$4 sm:$0x11]   ;;  %v4275_v28 = vld [vmem:[%s6261_s1 + $0x1d0] ss:$8 sps:$4 sm:$0xff]   ;;  %v524_v32 = vshll.u32 %v5125_v23, 16 }
  0x64   : > { %2166 = vmatpush1.bf16.msra.mxu0 %v4194_v39  ;;  %v490_v39 = vrot.slane %v488_v25, 1  ;;  %v4257_v25 = vld [vmem:[%s6261_s1 + $0x410] ss:$8 sps:$4 sm:$0xff]  }
  0x65   : > { %2167 = vmatprep.subr.bf16.mxu0 %v4204_v44  ;;  %1780 = vmatpush1.bf16.msra.mxu1 %v4232_v63  ;;  %v4227_v44 = vld [vmem:[%s6261_s1 + $0x3d0] ss:$8 sps:$4 sm:$0xff]  }
  0x66   : > { %1645 = vmatmul.mubr.bf16.gmra.mrb[16].mxu1 %v4858_v56  ;;  %1781 = vmatprep.subr.bf16.mxu1 %v4243_v4  ;;  %v491_v49 = vor.u32 %v490_v39, %v486_v38  ;;  %v5089_v63 = vld [vmem:[%s4716_s5 + $0x78] sm:$0xff]   ;;  %v4272_v39 = vld [vmem:[%s6261_s1 + $0x424] ss:$8 sps:$4 sm:$0xff]  }
  0x67   : > { %2031 = vmatmul.mubr.bf16.gmra.mrb[16].mxu0 %v4972_v54  ;;  %1654 = vmatprep.mubr.bf16.mxu1 %v4972_v54  ;;  %v4238_v4 = vld [vmem:[%s6261_s1 + $0x3f0] ss:$8 sps:$4 sm:$0xff]   ;;  %v512_v7 = vshll.u32 %v5089_v63, 16 }
  0x68   : > { %2168 = vmatpush1.bf16.msra.mxu0 %v4202_v48  ;;  %2040 = vmatprep.mubr.bf16.mxu0 %v4982_v61  ;;  %v4254_v48 = vld [vmem:[%s6261_s1 + $0x1a0] ss:$8 sps:$4 sm:$0xff]  }
  0x69   : > { %2169 = vmatprep.subr.bf16.mxu0 %v4207_v58  ;;  %1782 = vmatpush1.bf16.msra.mxu1 %v4241_v19  ;;  %v4235_v58 = vld [vmem:[%s6261_s1 + $0x3e0] ss:$8 sps:$4 sm:$0xff]   ;;  %v510_v19 = vshrl.u32 %v5089_v63, 16 }
  0x6a   : > { %1783 = vmatprep.subr.bf16.mxu1 %v4251_v21  ;;  %v517_v21 = vshll.u32 %v5106_v6, 16 }
  0x6c   : > { %2170 = vmatpush1.bf16.msra.mxu0 %v4205_v60  ;;  %v5083_v60 = vsel %vm388_vm0, %v491_v49, %v495_v46  ;;  %v526_v46 = vrot.slane %v524_v32, 1  ;;  %v4285_v49 = vld [vmem:[%s6261_s1 + $0x434] ss:$8 sps:$4 sm:$0xff]   ;;  %v5227_v32 = vld [vmem:[%s4716_s5 + $0xa8] sm:$0xff]  }
  0x6d   : > { %2171 = vmatprep.subr.bf16.mxu0 %v4215_v52  ;;  %1784 = vmatpush1.bf16.msra.mxu1 %v4249_v31  ;;  %v505_v52 = vshll.u32 %v5072_v50, 16  ;;  %v519_v31 = vrot.slane %v517_v21, 1 }
  0x6e   : > { %1655 = vmatmul.mubr.bf16.gmra.mrb[20].mxu1 %v4899_v12  ;;  %1785 = vmatprep.subr.bf16.mxu1 %v4256_v43  ;;  %v529_v43 = vshll.u32 %v5139_v27, 16 }
  0x6f   : > { %2041 = vmatmul.mubr.bf16.gmra.mrb[20].mxu0 %v5009_v10  ;;  %1664 = vmatprep.mubr.bf16.mxu1 %v5009_v10  ;;  %v507_v13 = vrot.slane %v505_v52, 1  ;;  %v4288_v52 = vld [vmem:[%s6261_s1 + $0x1f0] ss:$8 sps:$4 sm:$0xff]  }
  0x70   : > { %2172 = vmatpush1.bf16.msra.mxu0 %v4213_v5  ;;  %2050 = vmatprep.mubr.bf16.mxu0 %v5020_v20  ;;  %v4269_v5 = vld [vmem:[%s6261_s1 + $0x1c4] ss:$8 sps:$4 sm:$0xff]  }
  0x71   : > { %2173 = vmatprep.subr.bf16.mxu0 %v4218_v9  ;;  %1786 = vmatpush1.bf16.msra.mxu1 %v4254_v48  ;;  %v4246_v9 = vld [vmem:[%s6261_s1 + $0x404] ss:$8 sps:$4 sm:$0xff]   ;;  %v5128_v24 = vsel %vm388_vm0, %v503_v11, %v507_v13  ;;  %v4280_v48 = vld [vmem:[%s6261_s1 + $0x1e0] ss:$8 sps:$4 sm:$0xff]  }
  0x72   : > { %1787 = vmatprep.subr.bf16.mxu1 %v4264_v55  ;;  %v4290_v55 = vld [vmem:[%s6261_s1 + $0x1f4] ss:$8 sps:$4 sm:$0xff]   ;;  %v4291_v11 = vld [vmem:[%s6261_s1 + $0x440] ss:$8 sps:$4 sm:$0xff]   ;;  %v4501_v13 = vld [vmem:[%s6261_s1 + $0x204] ss:$8 sps:$4 sm:$0xff]  }
  0x74   : > { %2174 = vmatpush1.bf16.msra.mxu0 %v4216_v22  ;;  %v4259_v22 = vld [vmem:[%s6261_s1 + $0x414] ss:$8 sps:$4 sm:$0xff]  }
  0x75   : > { %2175 = vmatprep.subr.bf16.mxu0 %v4226_v26  ;;  %1788 = vmatpush1.bf16.msra.mxu1 %v4262_v2  ;;  %v4277_v26 = vld [vmem:[%s6261_s1 + $0x1d4] ss:$8 sps:$4 sm:$0xff]   ;;  %v541_v2 = vshll.u32 %v5178_v57, 16 }
  0x76   : > { %1665 = vmatmul.mubr.bf16.gmra.mrb[24].mxu1 %v4937_v33  ;;  %1789 = vmatprep.subr.bf16.mxu1 %v4269_v5 }
  0x77   : > { %2051 = vmatmul.mubr.bf16.gmra.mrb[24].mxu0 %v5041_v34  ;;  %1674 = vmatprep.mubr.bf16.mxu1 %v5041_v34 }
  0x78   : > { %2176 = vmatpush1.bf16.msra.mxu0 %v4224_v37  ;;  %2060 = vmatprep.mubr.bf16.mxu0 %v5060_v45  ;;  %v4282_v37 = vld [vmem:[%s6261_s1 + $0x1e4] ss:$8 sps:$4 sm:$0xff]  }
  0x79   : > { %2177 = vmatprep.subr.bf16.mxu0 %v4229_v40  ;;  %1790 = vmatpush1.bf16.msra.mxu1 %v4267_v15  ;;  %v522_v40 = vshrl.u32 %v5125_v23, 16  ;;  %v4296_v15 = vld [vmem:[%s6261_s1 + $0x454] ss:$8 sps:$4 sm:$0xff]  }
  0x7a   : > { %1791 = vmatprep.subr.bf16.mxu1 %v4277_v26 }
  0x7c   : > { %2178 = vmatpush1.bf16.msra.mxu0 %v4227_v44 }
  0x7d   : > { %2179 = vmatprep.subr.bf16.mxu0 %v4237_v47  ;;  %1792 = vmatpush1.bf16.msra.mxu1 %v4275_v28  ;;  %v4270_v47 = vld [vmem:[%s6261_s1 + $0x420] ss:$8 sps:$4 sm:$0xff]  }
  0x7e   : > { %1675 = vmatmul.mubr.bf16.gmra.mrb[28].mxu1 %v4969_v53  ;;  %1793 = vmatprep.subr.bf16.mxu1 %v4282_v37  ;;  %v4297_v37 = vld [vmem:[%s6261_s1 + $0x460] ss:$8 sps:$4 sm:$0xff]  }
  0x7f   : > { %2061 = vmatmul.mubr.bf16.gmra.mrb[28].mxu0 %v5083_v60  ;;  %1684 = vmatprep.mubr.bf16.mxu1 %v5083_v60 }
  0x80   : > { %2180 = vmatpush1.bf16.msra.mxu0 %v4235_v58  ;;  %2183 = vmatprep.mubr.bf16.mxu0 %v4854_v51  ;;  %v514_v51 = vrot.slane %v512_v7, 1  ;;  %v527_v58 = vor.u32 %v526_v46, %v522_v40  ;;  %v560_v46 = vshll.u32 %v5227_v32, 16 }
  0x81   : > { %2181 = vmatprep.subr.bf16.mxu0 %v4240_v62  ;;  %v531_v62 = vrot.slane %v529_v43, 1  ;;  %1794 = vmatpush1.bf16.msra.mxu1 %v4280_v48 }
  0x82   : > { %v515_v38 = vor.u32 %v514_v51, %v510_v19  ;;  %1795 = vmatprep.subr.bf16.mxu1 %v4290_v55  ;;  %v5212_v51 = vld [vmem:[%s4716_s5 + $0xa4] ss:$0 sps:$4 sm:$0x11]   ;;  %v562_v55 = vrot.slane %v560_v46, 1 }
  0x84   : > { %2182 = vmatpush1.bf16.msra.mxu0 %v4238_v4  ;;  %v5156_v44 = vsel %vm388_vm0, %v515_v38, %v519_v31  ;;  %v5192_v4 = vsel %vm388_vm0, %v527_v58, %v531_v62  ;;  %v553_v31 = vshll.u32 %v5212_v51, 16  ;;  %v4304_v38 = vld [vmem:[%s6261_s1 + $0x474] ss:$8 sps:$4 sm:$0xff]  }
  0x85   : > { %2344 = vmatprep.subr.bf16.mxu0 %v4246_v9  ;;  %v5196_v9 = vld [vmem:[%s4716_s5 + $0x9c] sm:$0xff]   ;;  %1796 = vmatpush1.bf16.msra.mxu1 %v4288_v52  ;;  %v5252_v58 = vld [vmem:[%s4716_s5 + $0xb4] sm:$0xff]  }
  0x86   : > { %1685 = vmatmul.mubr.bf16.gmra.mrb[32].mxu1 %v5013_v17  ;;  %3693 = vmatprep.subr.bf16.mxu1 %v4501_v13  ;;  %v548_v21 = vshll.u32 %v5196_v9, 16  ;;  %v555_v43 = vrot.slane %v553_v31, 1  ;;  %v572_v52 = vshll.u32 %v5252_v58, 16  ;;  %v5338_v31 = vld [vmem:[%s4716_s5 + $0xc8] ss:$0 sps:$4 sm:$0x11]  }
  0x87   : > { %2184 = vmatmul.mubr.bf16.vlgmr.msra.gmra.mrb[0].mxu0 %v4785_v14  ;;  %1694 = vmatprep.mubr.bf16.mxu1 %v5128_v24  ;;  %v589_v46 = vshll.u32 %v5338_v31, 16 }
  0x88   : > { %2345 = vmatpush1.bf16.msra.mxu0 %v4244_v18  ;;  %2193 = vmatprep.mubr.bf16.mxu0 %v4895_v8  ;;  %v5159_v8 = vld [vmem:[%s4716_s5 + $0x90] sm:$0xff]   ;;  %v543_v18 = vrot.slane %v541_v2, 1  ;;  %v550_v28 = vrot.slane %v548_v21, 1  ;;  %v570_v2 = vshrl.u32 %v5252_v58, 16 }
  0x89   : > { %2346 = vmatprep.subr.bf16.mxu0 %v4259_v22  ;;  %v536_v0 = vshll.u32 %v5159_v8, 16  ;;  %v534_v5 = vshrl.u32 %v5159_v8, 16  ;;  %v4294_v22 = vld [vmem:[%s6261_s1 + $0x450] ss:$8 sps:$4 sm:$0xff]   ;;  %v4508_v21 = vld [vmem:[%s6261_s1 + $0x234] ss:$8 sps:$4 sm:$0xff]  }
  0x8b   : > { %v538_v7 = vrot.slane %v536_v0, 1 }
  0x8c   : > { %2347 = vmatpush1.bf16.msra.mxu0 %v4257_v25  ;;  %v4299_v25 = vld [vmem:[%s6261_s1 + $0x464] ss:$8 sps:$4 sm:$0xff]  }
  0x8d   : > { %2348 = vmatprep.subr.bf16.mxu0 %v4272_v39  ;;  %v539_v19 = vor.u32 %v538_v7, %v534_v5  ;;  %v5240_v39 = vld [vmem:[%s4716_s5 + $0xb0] ss:$0 sps:$4 sm:$0x11]   ;;  %v574_v5 = vrot.slane %v572_v52, 1 }
  0x8e   : > { %1695 = vmatmul.mubr.bf16.gmra.mrb[36].mxu1 %v5051_v42 }
  0x8f   : > { %2194 = vmatmul.mubr.bf16.gmra.mrb[4].mxu0 %v4822_v36  ;;  %1704 = vmatprep.mubr.bf16.mxu1 %v5156_v44  ;;  %v5222_v26 = vsel %vm388_vm0, %v539_v19, %v543_v18  ;;  %v4504_v18 = vld [vmem:[%s6261_s1 + $0x214] ss:$8 sps:$4 sm:$0xff]   ;;  %v4506_v19 = vld [vmem:[%s6261_s1 + $0x224] ss:$8 sps:$4 sm:$0xff]  }
  0x90   : > { %2203 = vmatprep.mubr.bf16.mxu0 %v4934_v30  ;;  %2349 = vmatpush1.bf16.msra.mxu0 %v4270_v47  ;;  %v4293_v30 = vld [vmem:[%s6261_s1 + $0x444] ss:$8 sps:$4 sm:$0xff]   ;;  %v4302_v47 = vld [vmem:[%s6261_s1 + $0x470] ss:$8 sps:$4 sm:$0xff]  }
  0x91   : > { %2350 = vmatprep.subr.bf16.mxu0 %v4285_v49  ;;  %v558_v49 = vshrl.u32 %v5227_v32, 16 }
  0x93   : > { %v563_v62 = vor.u32 %v562_v55, %v558_v49  ;;  %v4517_v49 = vld [vmem:[%s6261_s1 + $0x270] ss:$8 sps:$4 sm:$0xff]   ;;  %v4518_v55 = vld [vmem:[%s6261_s1 + $0x284] ss:$8 sps:$4 sm:$0xff]  }
  0x94   : > { %2351 = vmatpush1.bf16.msra.mxu0 %v4283_v1  ;;  %v5259_v1 = vld [vmem:[%s4716_s5 + $0xbc] ss:$0 sps:$4 sm:$0x11]  }
  0x95   : > { %2352 = vmatprep.subr.bf16.mxu0 %v4293_v30  ;;  %v577_v7 = vshll.u32 %v5259_v1, 16 }
  0x96   : > { %1705 = vmatmul.mubr.bf16.gmra.mrb[40].mxu1 %v5089_v63 }
  0x97   : > { %2204 = vmatmul.mubr.bf16.gmra.mrb[8].mxu0 %v4858_v56  ;;  %1714 = vmatprep.mubr.bf16.mxu1 %v5192_v4 }
  0x98   : > { %2213 = vmatprep.mubr.bf16.mxu0 %v4972_v54  ;;  %2353 = vmatpush1.bf16.msra.mxu0 %v4291_v11  ;;  %v546_v54 = vshrl.u32 %v5196_v9, 16  ;;  %v579_v11 = vrot.slane %v577_v7, 1 }
  0x99   : > { %2354 = vmatprep.subr.bf16.mxu0 %v4296_v15  ;;  %v4502_v15 = vld [vmem:[%s4716_s5 + $0xc] sm:$0xff]  }
  0x9a   : > { %v551_v40 = vor.u32 %v550_v28, %v546_v54  ;;  %v4513_v54 = vld [vmem:[%s6261_s1 + $0x250] ss:$8 sps:$4 sm:$0xff]   ;;  %v5328_v28 = vld [vmem:[%s4716_s5 + $0xc0] sm:$0xff]  }
  0x9c   : > { %2355 = vmatpush1.bf16.msra.mxu0 %v4294_v22  ;;  %v5247_v48 = vsel %vm388_vm0, %v551_v40, %v555_v43  ;;  %v4511_v22 = vld [vmem:[%s6261_s1 + $0x240] ss:$8 sps:$4 sm:$0xff]   ;;  %v4516_v40 = vld [vmem:[%s6261_s1 + $0x274] ss:$8 sps:$4 sm:$0xff]   ;;  %v582_v43 = vshrl.u32 %v5328_v28, 16 }
  0x9d   : > { %2356 = vmatprep.subr.bf16.mxu0 %v4299_v25  ;;  %v4512_v25 = vld [vmem:[%s6261_s1 + $0x254] ss:$8 sps:$4 sm:$0xff]  }
  0x9e   : > { %1715 = vmatmul.mubr.bf16.gmra.mrb[44].mxu1 %v5125_v23 }
  0x9f   : > { %2214 = vmatmul.mubr.bf16.gmra.mrb[12].mxu0 %v4899_v12  ;;  %1724 = vmatprep.mubr.bf16.mxu1 %v5222_v26 }
  0xa0   : > { %2223 = vmatprep.mubr.bf16.mxu0 %v5009_v10  ;;  %2357 = vmatpush1.bf16.msra.mxu0 %v4297_v37  ;;  %v565_v10 = vshll.u32 %v5240_v39, 16  ;;  %v584_v37 = vshll.u32 %v5328_v28, 16 }
  0xa1   : > { %2358 = vmatprep.subr.bf16.mxu0 %v4304_v38  ;;  %v4515_v38 = vld [vmem:[%s6261_s1 + $0x260] ss:$8 sps:$4 sm:$0xff]  }
  0xa2   : > { %v567_v0 = vrot.slane %v565_v10, 1 }
  0xa4   : > { %2359 = vmatpush1.bf16.msra.mxu0 %v4302_v47  ;;  %v5263_v30 = vsel %vm388_vm0, %v563_v62, %v567_v0  ;;  %v5350_v47 = vld [vmem:[%s4716_s5 + $0xcc] sm:$0xff]   ;;  %v591_v62 = vrot.slane %v589_v46, 1  ;;  %v5363_v0 = vld [vmem:[%s4716_s5 + $0xd4] ss:$0 sps:$4 sm:$0x11]   ;;  %v654_v46 = vrot.slane %v5089_v63, 1 }
  0xa5   : > { %v596_v52 = vshll.u32 %v5350_v47, 16  ;;  %v594_v7 = vshrl.u32 %v5350_v47, 16 }
  0xa6   : > { %1725 = vmatmul.mubr.bf16.gmra.mrb[48].mxu1 %v5159_v8 }
  0xa7   : > { %2224 = vmatmul.mubr.bf16.gmra.mrb[16].mxu0 %v4937_v33  ;;  %1734 = vmatprep.mubr.bf16.mxu1 %v5247_v48 }
  0xa8   : > { %2233 = vmatprep.mubr.bf16.mxu0 %v5041_v34  ;;  %v575_v34 = vor.u32 %v574_v5, %v570_v2  ;;  %v4519_v2 = vld [vmem:[%s6261_s1 + $0x280] ss:$8 sps:$4 sm:$0xff]   ;;  %v4520_v5 = vld [vmem:[%s6261_s1 + $0x294] ss:$8 sps:$4 sm:$0xff]  }
  0xaa   : > { %v5272_v13 = vsel %vm388_vm0, %v575_v34, %v579_v11  ;;  %v598_v34 = vrot.slane %v596_v52, 1  ;;  %v601_v11 = vshll.u32 %v5363_v0, 16 }
  0xae   : > { %1735 = vmatmul.mubr.bf16.gmra.mrb[52].mxu1 %v5196_v9 }
  0xaf   : > { %2234 = vmatmul.mubr.bf16.gmra.mrb[20].mxu0 %v4969_v53  ;;  %1744 = vmatprep.mubr.bf16.mxu1 %v5263_v30 }
  0xb0   : > { %2243 = vmatprep.mubr.bf16.mxu0 %v5083_v60  ;;  %v4503_v60 = vld [vmem:[%s6261_s1 + $0x200] ss:$8 sps:$4 sm:$0xff]  }
  0xb6   : > { %1745 = vmatmul.mubr.bf16.gmra.mrb[56].mxu1 %v5227_v32 }
  0xb7   : > { %2244 = vmatmul.mubr.bf16.gmra.mrb[24].mxu0 %v5013_v17  ;;  %1754 = vmatprep.mubr.bf16.mxu1 %v5272_v13 }
  0xb8   : > { %2253 = vmatprep.mubr.bf16.mxu0 %v5128_v24 }
  0xbe   : > { %1755 = vmatmul.mubr.bf16.gmra.mrb[60].mxu1 %v5252_v58 }
  0xbf   : > { %2254 = vmatmul.mubr.bf16.gmra.mrb[28].mxu0 %v5051_v42  ;;  %1797 = vmatprep.mubr.bf16.mxu1 %v4502_v15  ;;  %v4521_v15 = vld [vmem:[%s6261_s1 + $0x290] ss:$8 sps:$4 sm:$0xff]  }
  0xc0   : > { %2263 = vmatprep.mubr.bf16.mxu0 %v5156_v44 }
  0xc6   : > { %1798 = vmatmul.mubr.bf16.vlgmr.msra.gmra.mrb[0].mxu1 %v4816_v29  ;;  %v4505_v29 = vld [vmem:[%s6261_s1 + $0x210] ss:$8 sps:$4 sm:$0xff]  }
  0xc7   : > { %2264 = vmatmul.mubr.bf16.gmra.mrb[32].mxu0 %v5089_v63  ;;  %3709 = vmatpush1.bf16.msra.mxu1 %v4503_v60  ;;  %v4522_v60 = vld [vmem:[%s6261_s1 + $0x2a4] ss:$8 sps:$4 sm:$0xff]  }
  0xc8   : > { %1807 = vmatprep.mubr.bf16.mxu1 %v4785_v14  ;;  %2273 = vmatprep.mubr.bf16.mxu0 %v5192_v4  ;;  %v4507_v14 = vld [vmem:[%s6261_s1 + $0x220] ss:$8 sps:$4 sm:$0xff]  }
  0xc9   : > { %3694 = vmatprep.subr.bf16.mxu1 %v4504_v18  ;;  %v599_v18 = vor.u32 %v598_v34, %v594_v7 }
  0xcb   : > { %3710 = vmatpush1.bf16.msra.mxu1 %v4505_v29  ;;  %v603_v29 = vrot.slane %v601_v11, 1 }
  0xcc   : > { %3695 = vmatprep.subr.bf16.mxu1 %v4506_v19  ;;  %v4523_v19 = vld [vmem:[%s6261_s1 + $0x2a0] ss:$8 sps:$4 sm:$0xff]  }
  0xce   : > { %1808 = vmatmul.mubr.bf16.gmra.mrb[4].mxu1 %v4763_v3  ;;  %v4509_v3 = vld [vmem:[%s6261_s1 + $0x230] ss:$8 sps:$4 sm:$0xff]  }
  0xcf   : > { %2274 = vmatmul.mubr.bf16.gmra.mrb[36].mxu0 %v5125_v23  ;;  %1817 = vmatprep.mubr.bf16.mxu1 %v4822_v36  ;;  %v4510_v36 = vld [vmem:[%s6261_s1 + $0x244] ss:$8 sps:$4 sm:$0xff]  }
  0xd0   : > { %2283 = vmatprep.mubr.bf16.mxu0 %v5222_v26  ;;  %3711 = vmatpush1.bf16.msra.mxu1 %v4507_v14  ;;  %v4524_v14 = vld [vmem:[%s6261_s1 + $0x2b4] ss:$8 sps:$4 sm:$0xff]  }
  0xd1   : > { %3696 = vmatprep.subr.bf16.mxu1 %v4508_v21  ;;  %v604_v21 = vsel %vm388_vm0, %v599_v18, %v603_v29 }
  0xd4   : > { %3712 = vmatpush1.bf16.msra.mxu1 %v4509_v3  ;;  %v4526_v3 = vld [vmem:[%s6261_s1 + $0x2c4] ss:$8 sps:$4 sm:$0xff]  }
  0xd5   : > { %3697 = vmatprep.subr.bf16.mxu1 %v4510_v36  ;;  %v4527_v36 = vld [vmem:[%s6261_s1 + $0x2c0] ss:$8 sps:$4 sm:$0xff]  }
  0xd6   : > { %1818 = vmatmul.mubr.bf16.gmra.mrb[8].mxu1 %v4836_v41 }
  0xd7   : > { %2284 = vmatmul.mubr.bf16.gmra.mrb[40].mxu0 %v5159_v8  ;;  %1827 = vmatprep.mubr.bf16.mxu1 %v4858_v56  ;;  %v4514_v56 = vld [vmem:[%s6261_s1 + $0x264] ss:$8 sps:$4 sm:$0xff]  }
  0xd8   : > { %2293 = vmatprep.mubr.bf16.mxu0 %v5247_v48  ;;  %3713 = vmatpush1.bf16.msra.mxu1 %v4511_v22  ;;  %v4528_v22 = vld [vmem:[%s6261_s1 + $0x2d4] ss:$8 sps:$4 sm:$0xff]  }
  0xd9   : > { %3698 = vmatprep.subr.bf16.mxu1 %v4512_v25  ;;  %v4529_v25 = vld [vmem:[%s6261_s1 + $0x2d0] ss:$8 sps:$4 sm:$0xff]  }
  0xdc   : > { %3714 = vmatpush1.bf16.msra.mxu1 %v4513_v54  ;;  %v4542_v54 = vmov 0  }
  0xdd   : > { %3699 = vmatprep.subr.bf16.mxu1 %v4514_v56  ;;  %v4531_v56 = vld [vmem:[%s6261_s1 + $0x2e0] ss:$8 sps:$4 sm:$0xff]  }
  0xde   : > { %1828 = vmatmul.mubr.bf16.gmra.mrb[12].mxu1 %v4867_v59 }
  0xdf   : > { %2294 = vmatmul.mubr.bf16.gmra.mrb[44].mxu0 %v5196_v9  ;;  %1837 = vmatprep.mubr.bf16.mxu1 %v4899_v12  ;;  %v586_v12 = vrot.slane %v584_v37, 1  ;;  %v4532_v37 = vld [vmem:[%s6261_s1 + $0x2f4] ss:$8 sps:$4 sm:$0xff]  }
  0xe0   : > { %2303 = vmatprep.mubr.bf16.mxu0 %v5263_v30  ;;  %3715 = vmatpush1.bf16.msra.mxu1 %v4515_v38  ;;  %v4533_v38 = vld [vmem:[%s6261_s1 + $0x2f0] ss:$8 sps:$4 sm:$0xff]  }
  0xe1   : > { %3700 = vmatprep.subr.bf16.mxu1 %v4516_v40  ;;  %v587_v10 = vor.u32 %v586_v12, %v582_v43  ;;  %v651_v40 = vrot.slane %v5051_v42, 1  ;;  %v652_v43 = vrot.slane %v5072_v50, 1 }
  0xe3   : > { %v653_v12 = vsel %vm623_vm1, %v651_v40, %v652_v43 }
  0xe4   : > { %3716 = vmatpush1.bf16.msra.mxu1 %v4517_v49 }
  0xe5   : > { %3701 = vmatprep.subr.bf16.mxu1 %v4518_v55 }
  0xe6   : > { %1838 = vmatmul.mubr.bf16.gmra.mrb[16].mxu1 %v4906_v16 }
  0xe7   : > { %2304 = vmatmul.mubr.bf16.gmra.mrb[48].mxu0 %v5227_v32  ;;  %1847 = vmatprep.mubr.bf16.mxu1 %v4937_v33  ;;  %v5373_v33 = vsel %vm388_vm0, %v587_v10, %v591_v62 }
  0xe8   : > { %2313 = vmatprep.mubr.bf16.mxu0 %v5272_v13  ;;  %3717 = vmatpush1.bf16.msra.mxu1 %v4519_v2 }
  0xe9   : > { %3702 = vmatprep.subr.bf16.mxu1 %v4520_v5 }
  0xec   : > { %3718 = vmatpush1.bf16.msra.mxu1 %v4521_v15 }
  0xed   : > { %3703 = vmatprep.subr.bf16.mxu1 %v4522_v60 }
  0xee   : > { %1848 = vmatmul.mubr.bf16.gmra.mrb[20].mxu1 %v4941_v35 }
  0xef   : > { %2314 = vmatmul.mubr.bf16.gmra.mrb[52].mxu0 %v5252_v58  ;;  %1857 = vmatprep.mubr.bf16.mxu1 %v4969_v53  ;;  %v4525_v53 = vld [vmem:[%s6261_s1 + $0x2b0] ss:$8 sps:$4 sm:$0xff]  }
  0xf0   : > { %2323 = vmatprep.mubr.bf16.mxu0 %v5373_v33  ;;  %3719 = vmatpush1.bf16.msra.mxu1 %v4523_v19  ;;  %v842_v19 = vlaneseq }
  0xf1   : > { %3704 = vmatprep.subr.bf16.mxu1 %v4524_v14 }
  0xf4   : > { %3720 = vmatpush1.bf16.msra.mxu1 %v4525_v53 }
  0xf5   : > { %3705 = vmatprep.subr.bf16.mxu1 %v4526_v3  ;;  %v843_v3 = vshrl.u32 %v842_v19, 7 }
  0xf6   : > { %1858 = vmatmul.mubr.bf16.gmra.mrb[24].mxu1 %v4982_v61 }
  0xf7   : > { %2324 = vmatmul.mubr.bf16.gmra.mrb[56].mxu0 %v5328_v28  ;;  %1867 = vmatprep.mubr.bf16.mxu1 %v5013_v17  ;;  %v4530_v17 = vld [vmem:[%s6261_s1 + $0x2e4] ss:$8 sps:$4 sm:$0xff]  }
  0xf8   : > { %2333 = vmatprep.mubr.bf16.mxu0 %v604_v21  ;;  %3721 = vmatpush1.bf16.msra.mxu1 %v4527_v36 }
  0xf9   : > { %3706 = vmatprep.subr.bf16.mxu1 %v4528_v22  ;;  %v844_v22 = vsub.s32 0, %v843_v3 }
  0xfc   : > { %3722 = vmatpush1.bf16.msra.mxu1 %v4529_v25  ;;  %v840_v25 = vld [vmem:[%s6262_s2] sm:$0x3] }
  0xfd   : > { %3707 = vmatprep.subr.bf16.mxu1 %v4530_v17  ;;  %v848_v17 = vsub.s32 1, %v843_v3 }
  0xfe   : > { %1868 = vmatmul.mubr.bf16.gmra.mrb[28].mxu1 %v5020_v20 }
  0xff   : > { %2334 = vmatmul.mubr.bf16.gmra.mrb[60].mxu0 %v5350_v47  ;;  %1877 = vmatprep.mubr.bf16.mxu1 %v5051_v42  ;;  %v657_v42 = vrot.slane %v5125_v23, 1  ;;  %v5546_v43 = vrot.slane %v840_v25, %v848_v17 }
 0x100   : > { %2376 = vmatprep.mubr.bf16.mxu0 %v4542_v54  ;;  %3723 = vmatpush1.bf16.msra.mxu1 %v4531_v56 }
 0x101   : > { %3708 = vmatprep.subr.bf16.mxu1 %v4532_v37 }
 0x104   : > { %3724 = vmatpush1.bf16.msra.mxu1 %v4533_v38  ;;  %v5542_v38 = vrot.slane %v840_v25, %v844_v22 }
 0x106   : > { %1878 = vmatmul.mubr.bf16.gmra.mrb[32].mxu1 %v5060_v45 }
 0x107   : > { %2377 = vmatmul.mubr.bf16.vlgmr.msra.gmra.mrb[0].mxu0 %v4836_v41  ;;  %1887 = vmatprep.mubr.bf16.mxu1 %v5089_v63  ;;  %v655_v41 = vrot.slane %v5106_v6, 1  ;;  %v660_v63 = vrot.slane %v5159_v8, 1 }
 0x108   : > { %2386 = vmatprep.mubr.bf16.mxu0 %v4542_v54 }
 0x109   : > { %v656_v49 = vsel %vm623_vm1, %v654_v46, %v655_v41 }
 0x10e   : > { %1888 = vmatmul.mubr.bf16.gmra.mrb[36].mxu1 %v653_v12 }
 0x10f   : > { %2387 = vmatmul.mubr.bf16.gmra.mrb[4].mxu0 %v4867_v59  ;;  %1897 = vmatprep.mubr.bf16.mxu1 %v5125_v23  ;;  %v658_v59 = vrot.slane %v5139_v27, 1  ;;  %v663_v23 = vrot.slane %v5196_v9, 1 }
 0x110   : > { %2396 = vmatprep.mubr.bf16.mxu0 %v4542_v54 }
 0x111   : > { %v659_v50 = vsel %vm623_vm1, %v657_v42, %v658_v59 }
 0x116   : > { %1898 = vmatmul.mubr.bf16.gmra.mrb[40].mxu1 %v656_v49 }
 0x117   : > { %2397 = vmatmul.mubr.bf16.gmra.mrb[8].mxu0 %v4906_v16  ;;  %1907 = vmatprep.mubr.bf16.mxu1 %v5159_v8  ;;  %v661_v16 = vrot.slane %v5178_v57, 1  ;;  %v666_v8 = vrot.slane %v5227_v32, 1 }
 0x118   : > { %2406 = vmatprep.mubr.bf16.mxu0 %v4542_v54 }
 0x119   : > { %v662_v6 = vsel %vm623_vm1, %v660_v63, %v661_v16 }
 0x11e   : > { %1908 = vmatmul.mubr.bf16.gmra.mrb[44].mxu1 %v659_v50 }
 0x11f   : > { %2407 = vmatmul.mubr.bf16.gmra.mrb[12].mxu0 %v4941_v35  ;;  %1917 = vmatprep.mubr.bf16.mxu1 %v5196_v9  ;;  %v664_v35 = vrot.slane %v5212_v51, 1  ;;  %v669_v9 = vrot.slane %v5252_v58, 1 }
 0x120   : > { %2416 = vmatprep.mubr.bf16.mxu0 %v4542_v54 }
 0x121   : > { %v665_v27 = vsel %vm623_vm1, %v663_v23, %v664_v35 }
 0x126   : > { %1918 = vmatmul.mubr.bf16.gmra.mrb[48].mxu1 %v662_v6 }
 0x127   : > { %2417 = vmatmul.mubr.bf16.gmra.mrb[16].mxu0 %v4982_v61  ;;  %1927 = vmatprep.mubr.bf16.mxu1 %v5227_v32  ;;  %v667_v61 = vrot.slane %v5240_v39, 1 }
 0x128   : > { %2426 = vmatprep.mubr.bf16.mxu0 %v4542_v54 }
 0x129   : > { %v668_v57 = vsel %vm623_vm1, %v666_v8, %v667_v61 }
 0x12e   : > { %1928 = vmatmul.mubr.bf16.gmra.mrb[52].mxu1 %v665_v27 }
 0x12f   : > { %2427 = vmatmul.mubr.bf16.gmra.mrb[20].mxu0 %v5020_v20  ;;  %1937 = vmatprep.mubr.bf16.mxu1 %v5252_v58  ;;  %v670_v20 = vrot.slane %v5259_v1, 1 }
 0x130   : > { %2436 = vmatprep.mubr.bf16.mxu0 %v4542_v54 }
 0x131   : > { %v671_v51 = vsel %vm623_vm1, %v669_v9, %v670_v20 }
 0x136   : > { %1938 = vmatmul.mubr.bf16.gmra.mrb[56].mxu1 %v668_v57 }
 0x137   : > { %2437 = vmatmul.mubr.bf16.gmra.mrb[24].mxu0 %v5060_v45  ;;  %1947 = vmatprep.mubr.bf16.mxu1 %v5328_v28  ;;  %v672_v45 = vrot.slane %v5328_v28, 1 }
 0x138   : > { %2446 = vmatprep.mubr.bf16.mxu0 %v4542_v54 }
 0x13e   : > { %1948 = vmatmul.mubr.bf16.gmra.mrb[60].mxu1 %v671_v51 }
 0x13f   : > { %2447 = vmatmul.mubr.bf16.gmra.mrb[28].mxu0 %v653_v12  ;;  %2070 = vmatprep.mubr.bf16.mxu1 %v653_v12 }
 0x140   : > { %2456 = vmatprep.mubr.bf16.mxu0 %v4542_v54 }
 0x146   : > { %2071 = vmatmul.mubr.bf16.vlgmr.msra.gmra.mrb[32].mxu1 %v5128_v24  ;;  %v673_v24 = vrot.slane %v5338_v31, 1 }
 0x147   : > { %2457 = vmatmul.mubr.bf16.gmra.mrb[32].mxu0 %v656_v49  ;;  %2080 = vmatprep.mubr.bf16.mxu1 %v656_v49 }
 0x148   : > { %2466 = vmatprep.mubr.bf16.mxu0 %v4542_v54 }
 0x14e   : > { %2081 = vmatmul.mubr.bf16.gmra.mrb[36].mxu1 %v5156_v44  ;;  %v674_v44 = vsel %vm623_vm1, %v672_v45, %v673_v24 }
 0x14f   : > { %2467 = vmatmul.mubr.bf16.gmra.mrb[36].mxu0 %v659_v50  ;;  %2090 = vmatprep.mubr.bf16.mxu1 %v659_v50 }
 0x150   : > { %2476 = vmatprep.mubr.bf16.mxu0 %v4542_v54 }
 0x156   : > { %2091 = vmatmul.mubr.bf16.gmra.mrb[40].mxu1 %v5192_v4  ;;  %v675_v4 = vrot.slane %v5350_v47, 1 }
 0x157   : > { %2477 = vmatmul.mubr.bf16.gmra.mrb[40].mxu0 %v662_v6  ;;  %2100 = vmatprep.mubr.bf16.mxu1 %v662_v6 }
 0x158   : > { %2486 = vmatprep.mubr.bf16.mxu0 %v4542_v54 }
 0x15e   : > { %2101 = vmatmul.mubr.bf16.gmra.mrb[44].mxu1 %v5222_v26  ;;  %v676_v26 = vrot.slane %v5363_v0, 1 }
 0x15f   : > { %2487 = vmatmul.mubr.bf16.gmra.mrb[44].mxu0 %v665_v27  ;;  %2110 = vmatprep.mubr.bf16.mxu1 %v665_v27 }
 0x160   : > { %2496 = vmatprep.mubr.bf16.mxu0 %v4542_v54  ;;  %v677_v32 = vsel %vm623_vm1, %v675_v4, %v676_v26 }
 0x166   : > { %2111 = vmatmul.mubr.bf16.gmra.mrb[48].mxu1 %v5247_v48 }
 0x167   : > { %2497 = vmatmul.mubr.bf16.gmra.mrb[48].mxu0 %v668_v57  ;;  %2120 = vmatprep.mubr.bf16.mxu1 %v668_v57 }
 0x168   : > { %2506 = vmatprep.mubr.bf16.mxu0 %v4542_v54 }
 0x16e   : > { %2121 = vmatmul.mubr.bf16.gmra.mrb[52].mxu1 %v5263_v30 }
 0x16f   : > { %2507 = vmatmul.mubr.bf16.gmra.mrb[52].mxu0 %v671_v51  ;;  %2130 = vmatprep.mubr.bf16.mxu1 %v671_v51 }
 0x170   : > { %2516 = vmatprep.mubr.bf16.mxu0 %v4542_v54 }
 0x176   : > { %2131 = vmatmul.mubr.bf16.gmra.mrb[56].mxu1 %v5272_v13 }
 0x177   : > { %2517 = vmatmul.mubr.bf16.gmra.mrb[56].mxu0 %v674_v44  ;;  %2140 = vmatprep.mubr.bf16.mxu1 %v674_v44 }
 0x178   : > { %2526 = vmatprep.mubr.bf16.mxu0 %v4542_v54 }
 0x17e   : > { %2141 = vmatmul.mubr.bf16.gmra.mrb[60].mxu1 %v5373_v33 }
 0x17f   : > { %2527 = vmatmul.mubr.bf16.gmra.mrb[60].mxu0 %v677_v32 }
 0x199   : > { %v1799_v39 = vpop.f32.mrb[0].mxu1 }
 0x19a   : > { %v1801_v48 = vpop.f32.mrb[1].mxu1  ;;  %v3725_v12 = vadd.f32 %v1799_v39, %v5542_v38 }
 0x19b   : > { %v1803_v58 = vpop.f32.mrb[2].mxu1  ;;  %v3727_v46 = vadd.f32 %v1801_v48, %v5546_v43 }
 0x19c   : > { %v1805_v1 = vpop.f32.mrb[3].mxu1  ;;  %v3729_v49 = vadd.f32 %v1803_v58, %v5542_v38 }
 0x19d   : > { %v3731_v50 = vadd.f32 %v1805_v1, %v5546_v43 }
 0x1a1   : > { %v1809_v30 = vpop.f32.mrb[4].mxu1 }
 0x1a2   : > { %v1811_v28 = vpop.f32.mrb[5].mxu1  ;;  %v3733_v57 = vadd.f32 %v1809_v30, %v5542_v38 }
 0x1a3   : > { %v1813_v13 = vpop.f32.mrb[6].mxu1  ;;  %v3735_v9 = vadd.f32 %v1811_v28, %v5546_v43 }
 0x1a4   : > { %v1815_v31 = vpop.f32.mrb[7].mxu1  ;;  %v3737_v45 = vadd.f32 %v1813_v13, %v5542_v38 }
 0x1a5   : > { %v3739_v4 = vadd.f32 %v1815_v31, %v5546_v43 }
 0x1a9   : > { %v5493_v55 = vpop.f32.mrb[8].mxu1 }
 0x1aa   : > { %v5495_v10 = vpop.f32.mrb[9].mxu1  ;;  %v3741_v19 = vadd.f32 %v5493_v55, %v5542_v38 }
 0x1ab   : > { %v5497_v47 = vpop.f32.mrb[10].mxu1  ;;  %v3743_v13 = vadd.f32 %v5495_v10, %v5546_v43 }
 0x1ac   : > { %v5499_v62 = vpop.f32.mrb[11].mxu1  ;;  %v3745_v31 = vadd.f32 %v5497_v47, %v5542_v38 }
 0x1b1   : > { %v5501_v0 = vpop.f32.mrb[12].mxu1 }
 0x1b2   : > { %v5503_v52 = vpop.f32.mrb[13].mxu1 }
 0x1b3   : > { %v5505_v2 = vpop.f32.mrb[14].mxu1 }
 0x1b4   : > { %v5507_v5 = vpop.f32.mrb[15].mxu1 }
 0x1b9   : > { %v5509_v33 = vpop.f32.mrb[16].mxu1 }
 0x1ba   : > { %v5511_v7 = vpop.f32.mrb[17].mxu1 }
 0x1bb   : > { %v5513_v34 = vpop.f32.mrb[18].mxu1 }
 0x1bc   : > { %v5515_v11 = vpop.f32.mrb[19].mxu1 }
 0x1c1   : > { %v5517_v15 = vpop.f32.mrb[20].mxu1 }
 0x1c2   : > { %v5519_v60 = vpop.f32.mrb[21].mxu1 }
 0x1c3   : > { %v5521_v18 = vpop.f32.mrb[22].mxu1 }
 0x1c4   : > { %v5523_v29 = vpop.f32.mrb[23].mxu1 }
 0x1c9   : > { %v5525_v14 = vpop.f32.mrb[24].mxu1 }
 0x1ca   : > { %v5527_v21 = vpop.f32.mrb[25].mxu1 }
 0x1cb   : > { %v5529_v53 = vpop.f32.mrb[26].mxu1 }
 0x1cc   : > { %v5531_v36 = vpop.f32.mrb[27].mxu1 }
 0x1d1   : > { %v5536_v54 = vpop.f32.mrb[28].mxu1 }
 0x1d2   : > { %v5538_v56 = vpop.f32.mrb[29].mxu1 }
 0x1d3   : > { %v5540_v37 = vpop.f32.mrb[30].mxu1 }
 0x1d4   : > { %v5544_v40 = vpop.f32.mrb[31].mxu1 }
 0x1da   : > { %v2378_v41 = vpop.f32.mrb[0].mxu0 }
 0x1db   : > { %v5551_v42 = vadd.f32 %v3725_v12, %v2378_v41  ;;  %v2380_v59 = vpop.f32.mrb[1].mxu0 }
 0x1dc   : > { %v3728_v63 = vadd.f32 %v3727_v46, %v2380_v59  ;;  %v2382_v16 = vpop.f32.mrb[2].mxu0  ;;  %v3747_v46 = vadd.f32 %v5499_v62, %v5546_v43  ;;  %v3751_v62 = vadd.f32 %v5503_v52, %v5546_v43 }
 0x1dd   : > { %v5554_v6 = vadd.f32 %v3729_v49, %v2382_v16  ;;  %v2384_v23 = vpop.f32.mrb[3].mxu0 }
 0x1de   : > { %v2537_v35 = vsub.f32 0.0, %v3728_v63  ;;  %v3732_v27 = vadd.f32 %v3731_v50, %v2384_v23 }
 0x1e0   : > { %v2569_v8 = vmul.f32 1.442695, %v2537_v35  ;;  %v2538_v61 = vsub.f32 0.0, %v3732_v27  ;;  %v3749_v27 = vadd.f32 %v5501_v0, %v5542_v38 }
 0x1e2   : > { %4307 = vpow2.f32 %v2569_v8  ;;  %v2571_v20 = vmul.f32 1.442695, %v2538_v61  ;;  %v2388_v51 = vpop.f32.mrb[4].mxu0 }
 0x1e3   : > { %v5559_v24 = vadd.f32 %v3733_v57, %v2388_v51  ;;  %v2390_v44 = vpop.f32.mrb[5].mxu0  ;;  %v3753_v57 = vadd.f32 %v5505_v2, %v5542_v38 }
 0x1e4   : > { %4309 = vpow2.f32 %v2571_v20  ;;  %v3736_v26 = vadd.f32 %v3735_v9, %v2390_v44  ;;  %v2392_v32 = vpop.f32.mrb[6].mxu0 }
 0x1e5   : > { %v5562_v39 = vadd.f32 %v3737_v45, %v2392_v32  ;;  %v2394_v48 = vpop.f32.mrb[7].mxu0  ;;  %v3755_v45 = vadd.f32 %v5507_v5, %v5546_v43  ;;  %v3759_v5 = vadd.f32 %v5511_v7, %v5546_v43 }
 0x1e6   : > { %v2539_v58 = vsub.f32 0.0, %v3736_v26  ;;  %v3740_v1 = vadd.f32 %v3739_v4, %v2394_v48 }
 0x1e8   : > { %v2573_v30 = vmul.f32 1.442695, %v2539_v58  ;;  %v2540_v28 = vsub.f32 0.0, %v3740_v1 }
 0x1ea   : > { %4311 = vpow2.f32 %v2573_v30  ;;  %v2575_v3 = vmul.f32 1.442695, %v2540_v28  ;;  %v2398_v22 = vpop.f32.mrb[8].mxu0 }
 0x1eb   : > { %v5570_v25 = vadd.f32 %v3741_v19, %v2398_v22  ;;  %v2400_v17 = vpop.f32.mrb[9].mxu0  ;;  %v3757_v19 = vadd.f32 %v5509_v33, %v5542_v38  ;;  %v3763_v33 = vadd.f32 %v5515_v11, %v5546_v43  ;;  %v3765_v11 = vadd.f32 %v5517_v15, %v5542_v38 }
 0x1ec   : > { %v4308_v12 = vpop.eup %4307  ;;  %4313 = vpow2.f32 %v2575_v3  ;;  %v3744_v41 = vadd.f32 %v3743_v13, %v2400_v17  ;;  %v2402_v49 = vpop.f32.mrb[10].mxu0  ;;  %v3761_v17 = vadd.f32 %v5513_v34, %v5542_v38  ;;  %v3771_v15 = vadd.f32 %v5523_v29, %v5546_v43 }
 0x1ed   : > { %v2633_v55 = vadd.f32 1.0, %v4308_v12  ;;  %v5574_v59 = vadd.f32 %v3745_v31, %v2402_v49  ;;  %v2404_v10 = vpop.f32.mrb[11].mxu0  ;;  %v3773_v29 = vadd.f32 %v5525_v14, %v5542_v38  ;;  %v3779_v14 = vadd.f32 %v5531_v36, %v5546_v43 }
 0x1ee   : > { %v4310_v50 = vpop.eup %4309  ;;  %v2541_v63 = vsub.f32 0.0, %v3744_v41  ;;  %v3748_v16 = vadd.f32 %v3747_v46, %v2404_v10  ;;  %v3781_v36 = vadd.f32 %v5536_v54, %v5542_v38 }
 0x1ef   : > { %4315 = vrcp.f32 %v2633_v55  ;;  %v2634_v23 = vadd.f32 1.0, %v4310_v50 }
 0x1f0   : > { %v2577_v47 = vmul.f32 1.442695, %v2541_v63  ;;  %v2542_v35 = vsub.f32 0.0, %v3748_v16 }
 0x1f1   : > { %4317 = vrcp.f32 %v2634_v23 }
 0x1f2   : > { %4319 = vpow2.f32 %v2577_v47  ;;  %v2579_v8 = vmul.f32 1.442695, %v2542_v35  ;;  %v2408_v61 = vpop.f32.mrb[12].mxu0 }
 0x1f3   : > { %v5582_v9 = vadd.f32 %v3749_v27, %v2408_v61  ;;  %v2410_v20 = vpop.f32.mrb[13].mxu0 }
 0x1f4   : > { %v4312_v51 = vpop.eup %4311  ;;  %4321 = vpow2.f32 %v2579_v8  ;;  %v3752_v44 = vadd.f32 %v3751_v62, %v2410_v20  ;;  %v2412_v0 = vpop.f32.mrb[14].mxu0  ;;  %v3769_v20 = vadd.f32 %v5521_v18, %v5542_v38 }
 0x1f5   : > { %v2635_v4 = vadd.f32 1.0, %v4312_v51  ;;  %v5586_v26 = vadd.f32 %v3753_v57, %v2412_v0  ;;  %v2414_v52 = vpop.f32.mrb[15].mxu0 }
 0x1f6   : > { %v4314_v32 = vpop.eup %4313  ;;  %v2543_v48 = vsub.f32 0.0, %v3752_v44  ;;  %v3756_v58 = vadd.f32 %v3755_v45, %v2414_v52 }
 0x1f7   : > { %4323 = vrcp.f32 %v2635_v4  ;;  %v2636_v1 = vadd.f32 1.0, %v4314_v32 }
 0x1f8   : > { %v2581_v2 = vmul.f32 1.442695, %v2543_v48  ;;  %v2544_v30 = vsub.f32 0.0, %v3756_v58 }
 0x1f9   : > { %v4316_v28 = vpop.eup %4315  ;;  %4325 = vrcp.f32 %v2636_v1 }
 0x1fa   : > { %v5593_v13 = vmul.f32 %v4316_v28, %v5551_v42  ;;  %4327 = vpow2.f32 %v2581_v2  ;;  %v2583_v3 = vmul.f32 1.442695, %v2544_v30  ;;  %v2418_v22 = vpop.f32.mrb[16].mxu0 }
 0x1fb   : > { %v4318_v31 = vpop.eup %4317  ;;  %v5597_v12 = vadd.f32 %v3757_v19, %v2418_v22  ;;  %v2420_v46 = vpop.f32.mrb[17].mxu0 }
 0x1fc   : > { %v4320_v41 = vpop.eup %4319  ;;  %v5602_v49 = vmul.f32 %v4318_v31, %v5554_v6  ;;  %4329 = vpow2.f32 %v2583_v3  ;;  %v3760_v7 = vadd.f32 %v3759_v5, %v2420_v46  ;;  %v2422_v42 = vpop.f32.mrb[18].mxu0  ;;  %v3767_v6 = vadd.f32 %v5519_v60, %v5546_v43 }
 0x1fd   : > { %v2637_v55 = vadd.f32 1.0, %v4320_v41  ;;  %v5604_v10 = vadd.f32 %v3761_v17, %v2422_v42  ;;  %v2424_v50 = vpop.f32.mrb[19].mxu0  ;;  %v3777_v31 = vadd.f32 %v5529_v53, %v5542_v38 }
 0x1fe   : > { %v4322_v63 = vpop.eup %4321  ;;  %v2545_v16 = vsub.f32 0.0, %v3760_v7  ;;  %v3764_v34 = vadd.f32 %v3763_v33, %v2424_v50 }
 0x1ff   : > { %4331 = vrcp.f32 %v2637_v55  ;;  %v2638_v23 = vadd.f32 1.0, %v4322_v63 }
 0x200   : > { %v2585_v47 = vmul.f32 1.442695, %v2545_v16  ;;  %v2546_v35 = vsub.f32 0.0, %v3764_v34 }
 0x201   : > { %v4324_v27 = vpop.eup %4323  ;;  %4333 = vrcp.f32 %v2638_v23 }
 0x202   : > { %v5611_v62 = vmul.f32 %v4324_v27, %v5559_v24  ;;  %4335 = vpow2.f32 %v2585_v47  ;;  %v2587_v8 = vmul.f32 1.442695, %v2546_v35  ;;  %v2428_v61 = vpop.f32.mrb[20].mxu0 }
 0x203   : > { %v4326_v57 = vpop.eup %4325  ;;  %v5615_v51 = vadd.f32 %v3765_v11, %v2428_v61  ;;  %v2430_v45 = vpop.f32.mrb[21].mxu0  ;;  %v3787_v61 = vadd.f32 %v5544_v40, %v5546_v43 }
 0x204   : > { %v4328_v44 = vpop.eup %4327  ;;  %v5620_v0 = vmul.f32 %v4326_v57, %v5562_v39  ;;  %4337 = vpow2.f32 %v2587_v8  ;;  %v3768_v60 = vadd.f32 %v3767_v6, %v2430_v45  ;;  %v2432_v24 = vpop.f32.mrb[22].mxu0  ;;  %v3775_v39 = vadd.f32 %v5527_v21, %v5546_v43 }
 0x205   : > { %v2639_v4 = vadd.f32 1.0, %v4328_v44  ;;  %v5622_v52 = vadd.f32 %v3769_v20, %v2432_v24  ;;  %v2434_v32 = vpop.f32.mrb[23].mxu0  ;;  %v3785_v8 = vadd.f32 %v5540_v37, %v5542_v38 }
 0x206   : > { %v4330_v48 = vpop.eup %4329  ;;  %v2547_v58 = vsub.f32 0.0, %v3768_v60  ;;  %v3772_v18 = vadd.f32 %v3771_v15, %v2434_v32 }
 0x207   : > { %4339 = vrcp.f32 %v2639_v4  ;;  %v2640_v1 = vadd.f32 1.0, %v4330_v48 }
 0x208   : > { %v2589_v2 = vmul.f32 1.442695, %v2547_v58  ;;  %v2548_v30 = vsub.f32 0.0, %v3772_v18 }
 0x209   : > { %v4332_v28 = vpop.eup %4331  ;;  %4341 = vrcp.f32 %v2640_v1 }
 0x20a   : > { %v5629_v19 = vmul.f32 %v4332_v28, %v5570_v25  ;;  %4343 = vpow2.f32 %v2589_v2  ;;  %v2591_v5 = vmul.f32 1.442695, %v2548_v30  ;;  %v2438_v3 = vpop.f32.mrb[24].mxu0 }
 0x20b   : > { %v4334_v22 = vpop.eup %4333  ;;  %v5633_v17 = vadd.f32 %v3773_v29, %v2438_v3  ;;  %v2440_v46 = vpop.f32.mrb[25].mxu0 }
 0x20c   : > { %v4336_v41 = vpop.eup %4335  ;;  %v5638_v33 = vmul.f32 %v4334_v22, %v5574_v59  ;;  %4345 = vpow2.f32 %v2591_v5  ;;  %v3776_v21 = vadd.f32 %v3775_v39, %v2440_v46  ;;  %v2442_v25 = vpop.f32.mrb[26].mxu0  ;;  %v3783_v59 = vadd.f32 %v5538_v56, %v5546_v43 }
 0x20d   : > { %v2641_v7 = vadd.f32 1.0, %v4336_v41  ;;  %v5640_v42 = vadd.f32 %v3777_v31, %v2442_v25  ;;  %v2444_v55 = vpop.f32.mrb[27].mxu0  ;;  %v2729_v56 = vadd.f32 %v5602_v49, %v5593_v13 }
 0x20e   : > { %v4338_v50 = vpop.eup %4337  ;;  %v2549_v63 = vsub.f32 0.0, %v3776_v21  ;;  %v3780_v53 = vadd.f32 %v3779_v14, %v2444_v55 }
 0x20f   : > { %4347 = vrcp.f32 %v2641_v7  ;;  %v2642_v16 = vadd.f32 1.0, %v4338_v50  ;;  %v2730_v40 = vadd.f32 %v2729_v56, %v5611_v62 }
 0x210   : > { %v2593_v34 = vmul.f32 1.442695, %v2549_v63  ;;  %v2550_v23 = vsub.f32 0.0, %v3780_v53 }
 0x211   : > { %v4340_v47 = vpop.eup %4339  ;;  %4349 = vrcp.f32 %v2642_v16 }
 0x212   : > { %v5647_v35 = vmul.f32 %v4340_v47, %v5582_v9  ;;  %4351 = vpow2.f32 %v2593_v34  ;;  %v2595_v27 = vmul.f32 1.442695, %v2550_v23  ;;  %v2448_v11 = vpop.f32.mrb[28].mxu0 }
 0x213   : > { %v4342_v6 = vpop.eup %4341  ;;  %v5653_v57 = vadd.f32 %v3781_v36, %v2448_v11  ;;  %v2450_v54 = vpop.f32.mrb[29].mxu0 }
 0x214   : > { %v4344_v20 = vpop.eup %4343  ;;  %v5658_v9 = vmul.f32 %v4342_v6, %v5586_v26  ;;  %4353 = vpow2.f32 %v2595_v27  ;;  %v3784_v45 = vadd.f32 %v3783_v59, %v2450_v54  ;;  %v2452_v44 = vpop.f32.mrb[30].mxu0  ;;  %v2731_v26 = vadd.f32 %v2730_v40, %v5620_v0 }
 0x215   : > { %v2643_v15 = vadd.f32 1.0, %v4344_v20  ;;  %v5660_v60 = vadd.f32 %v3785_v8, %v2452_v44  ;;  %v2454_v37 = vpop.f32.mrb[31].mxu0 }
 0x216   : > { %v4346_v24 = vpop.eup %4345  ;;  %v2551_v4 = vsub.f32 0.0, %v3784_v45  ;;  %v3788_v32 = vadd.f32 %v3787_v61, %v2454_v37  ;;  %v2732_v46 = vadd.f32 %v2731_v26, %v5629_v19 }
 0x217   : > { %4355 = vrcp.f32 %v2643_v15  ;;  %v2644_v48 = vadd.f32 1.0, %v4346_v24 }
 0x218   : > { %v2597_v58 = vmul.f32 1.442695, %v2551_v4  ;;  %v2552_v18 = vsub.f32 0.0, %v3788_v32  ;;  %v2733_v47 = vadd.f32 %v2732_v46, %v5638_v33 }
 0x219   : > { %v4348_v1 = vpop.eup %4347  ;;  %4357 = vrcp.f32 %v2644_v48  ;;  %v2072_v28 = vpop.f32.mrb[32].mxu1 }
 0x21a   : > { %v5665_v2 = vmul.f32 %v4348_v1, %v5597_v12  ;;  %4359 = vpow2.f32 %v2597_v58  ;;  %v2599_v30 = vmul.f32 1.442695, %v2552_v18  ;;  %v2458_v29 = vpop.f32.mrb[32].mxu0  ;;  %v3789_v5 = vadd.f32 %v2072_v28, %v5542_v38  ;;  %v2074_v3 = vpop.f32.mrb[33].mxu1 }
 0x21b   : > { %v4350_v39 = vpop.eup %4349  ;;  %v2460_v22 = vpop.f32.mrb[33].mxu0  ;;  %v3791_v14 = vadd.f32 %v2074_v3, %v5546_v43  ;;  %v2734_v11 = vadd.f32 %v2733_v47, %v5647_v35 }
 0x21c   : > { %v4352_v31 = vpop.eup %4351  ;;  %v5670_v41 = vmul.f32 %v4350_v39, %v5604_v10  ;;  %4361 = vpow2.f32 %v2599_v30  ;;  %v2076_v12 = vpop.f32.mrb[34].mxu1  ;;  %v5673_v7 = vadd.f32 %v3789_v5, %v2458_v29 }
 0x21d   : > { %v2462_v21 = vpop.f32.mrb[34].mxu0  ;;  %v2645_v25 = vadd.f32 1.0, %v4352_v31  ;;  %v3793_v55 = vadd.f32 %v2076_v12, %v5542_v38  ;;  %v2078_v50 = vpop.f32.mrb[35].mxu1  ;;  %v3792_v16 = vadd.f32 %v3791_v14, %v2460_v22  ;;  %v2735_v28 = vadd.f32 %v2734_v11, %v5658_v9 }
 0x21e   : > { %v2464_v63 = vpop.f32.mrb[35].mxu0  ;;  %v4354_v53 = vpop.eup %4353  ;;  %v3795_v34 = vadd.f32 %v2078_v50, %v5546_v43 }
 0x21f   : > { %4363 = vrcp.f32 %v2645_v25  ;;  %v2646_v23 = vadd.f32 1.0, %v4354_v53  ;;  %v5677_v10 = vadd.f32 %v3793_v55, %v2462_v21  ;;  %v2553_v36 = vsub.f32 0.0, %v3792_v16 }
 0x220   : > { %v3796_v59 = vadd.f32 %v3795_v34, %v2464_v63  ;;  %v2736_v3 = vadd.f32 %v2735_v28, %v5665_v2 }
 0x221   : > { %v4356_v27 = vpop.eup %4355  ;;  %4365 = vrcp.f32 %v2646_v23  ;;  %v2601_v8 = vmul.f32 1.442695, %v2553_v36  ;;  %v2082_v54 = vpop.f32.mrb[36].mxu1 }
 0x222   : > { %v5682_v6 = vmul.f32 %v4356_v27, %v5615_v51  ;;  %v2554_v61 = vsub.f32 0.0, %v3796_v59  ;;  %v2468_v20 = vpop.f32.mrb[36].mxu0  ;;  %v3797_v45 = vadd.f32 %v2082_v54, %v5542_v38  ;;  %v2084_v44 = vpop.f32.mrb[37].mxu1  ;;  %v2737_v34 = vadd.f32 %v2736_v3, %v5670_v41 }
 0x223   : > { %v4358_v56 = vpop.eup %4357  ;;  %v2470_v15 = vpop.f32.mrb[37].mxu0  ;;  %4367 = vpow2.f32 %v2601_v8  ;;  %v3799_v58 = vadd.f32 %v2084_v44, %v5546_v43 }
 0x224   : > { %v4360_v37 = vpop.eup %4359  ;;  %v5686_v24 = vmul.f32 %v4358_v56, %v5622_v52  ;;  %v2603_v40 = vmul.f32 1.442695, %v2554_v61  ;;  %v2086_v4 = vpop.f32.mrb[38].mxu1  ;;  %v5688_v51 = vadd.f32 %v3797_v45, %v2468_v20  ;;  %v2738_v20 = vadd.f32 %v2737_v34, %v5682_v6 }
 0x225   : > { %v2472_v32 = vpop.f32.mrb[38].mxu0  ;;  %v2647_v48 = vadd.f32 1.0, %v4360_v37  ;;  %v3801_v18 = vadd.f32 %v2086_v4, %v5542_v38  ;;  %v2088_v1 = vpop.f32.mrb[39].mxu1  ;;  %v3800_v39 = vadd.f32 %v3799_v58, %v2470_v15 }
 0x226   : > { %v2474_v26 = vpop.f32.mrb[39].mxu0  ;;  %v4362_v30 = vpop.eup %4361  ;;  %4369 = vpow2.f32 %v2603_v40  ;;  %v3803_v52 = vadd.f32 %v2088_v1, %v5546_v43 }
 0x227   : > { %4371 = vrcp.f32 %v2647_v48  ;;  %v2648_v29 = vadd.f32 1.0, %v4362_v30  ;;  %v5694_v5 = vadd.f32 %v3801_v18, %v2472_v32  ;;  %v2555_v46 = vsub.f32 0.0, %v3800_v39 }
 0x228   : > { %v3804_v22 = vadd.f32 %v3803_v52, %v2474_v26  ;;  %v2739_v48 = vadd.f32 %v2738_v20, %v5686_v24 }
 0x229   : > { %v4364_v31 = vpop.eup %4363  ;;  %4373 = vrcp.f32 %v2648_v29  ;;  %v2092_v21 = vpop.f32.mrb[40].mxu1  ;;  %v2605_v50 = vmul.f32 1.442695, %v2555_v46 }
 0x22a   : > { %v5698_v14 = vmul.f32 %v4364_v31, %v5633_v17  ;;  %v2556_v12 = vsub.f32 0.0, %v3804_v22  ;;  %v2478_v25 = vpop.f32.mrb[40].mxu0  ;;  %v3805_v63 = vadd.f32 %v2092_v21, %v5542_v38  ;;  %v2094_v53 = vpop.f32.mrb[41].mxu1 }
 0x22b   : > { %v4366_v55 = vpop.eup %4365  ;;  %v2480_v16 = vpop.f32.mrb[41].mxu0  ;;  %v3807_v36 = vadd.f32 %v2094_v53, %v5546_v43  ;;  %4375 = vpow2.f32 %v2605_v50 }
 0x22c   : > { %v5703_v23 = vmul.f32 %v4366_v55, %v5640_v42  ;;  %v2607_v47 = vmul.f32 1.442695, %v2556_v12  ;;  %v2096_v59 = vpop.f32.mrb[42].mxu1  ;;  %v2482_v17 = vpop.f32.mrb[42].mxu0  ;;  %v5706_v27 = vadd.f32 %v3805_v63, %v2478_v25  ;;  %v2740_v3 = vadd.f32 %v2739_v48, %v5698_v14 }
 0x22d   : > { %v3809_v11 = vadd.f32 %v2096_v59, %v5542_v38  ;;  %v2098_v8 = vpop.f32.mrb[43].mxu1  ;;  %v2484_v61 = vpop.f32.mrb[43].mxu0  ;;  %v3808_v56 = vadd.f32 %v3807_v36, %v2480_v16 }
 0x22e   : > { %v4368_v54 = vpop.eup %4367  ;;  %4377 = vpow2.f32 %v2607_v47  ;;  %v3811_v42 = vadd.f32 %v2098_v8, %v5546_v43  ;;  %v2741_v47 = vadd.f32 %v2740_v3, %v5703_v23 }
 0x22f   : > { %v2649_v45 = vadd.f32 1.0, %v4368_v54  ;;  %v5711_v44 = vadd.f32 %v3809_v11, %v2482_v17  ;;  %v2557_v37 = vsub.f32 0.0, %v3808_v56 }
 0x230   : > { %v4370_v15 = vpop.eup %4369  ;;  %v3812_v40 = vadd.f32 %v3811_v42, %v2484_v61 }
 0x231   : > { %v4372_v4 = vpop.eup %4371  ;;  %4379 = vrcp.f32 %v2649_v45  ;;  %v2650_v32 = vadd.f32 1.0, %v4370_v15  ;;  %v2609_v18 = vmul.f32 1.442695, %v2557_v37  ;;  %v2102_v26 = vpop.f32.mrb[44].mxu1 }
 0x232   : > { %v5715_v58 = vmul.f32 %v4372_v4, %v5653_v57  ;;  %v2558_v1 = vsub.f32 0.0, %v3812_v40  ;;  %v2488_v30 = vpop.f32.mrb[44].mxu0  ;;  %v3813_v52 = vadd.f32 %v2102_v26, %v5542_v38  ;;  %v2104_v29 = vpop.f32.mrb[45].mxu1 }
 0x233   : > { %v4374_v28 = vpop.eup %4373  ;;  %4381 = vrcp.f32 %v2650_v32  ;;  %v2490_v39 = vpop.f32.mrb[45].mxu0  ;;  %v3815_v21 = vadd.f32 %v2104_v29, %v5546_v43 }
 0x234   : > { %v5720_v22 = vmul.f32 %v4374_v28, %v5660_v60  ;;  %4383 = vpow2.f32 %v2609_v18  ;;  %v2611_v31 = vmul.f32 1.442695, %v2558_v1  ;;  %v2106_v46 = vpop.f32.mrb[46].mxu1  ;;  %v2492_v57 = vpop.f32.mrb[46].mxu0  ;;  %v5722_v12 = vadd.f32 %v3813_v52, %v2488_v30 }
 0x235   : > { %v3817_v25 = vadd.f32 %v2106_v46, %v5542_v38  ;;  %v2108_v55 = vpop.f32.mrb[47].mxu1  ;;  %v2494_v50 = vpop.f32.mrb[47].mxu0  ;;  %v3816_v16 = vadd.f32 %v3815_v21, %v2490_v39  ;;  %v2742_v8 = vadd.f32 %v2741_v47, %v5715_v58 }
 0x236   : > { %4385 = vpow2.f32 %v2611_v31  ;;  %v3819_v63 = vadd.f32 %v2108_v55, %v5546_v43  ;;  %v4376_v53 = vpop.eup %4375 }
 0x237   : > { %v5727_v34 = vadd.f32 %v3817_v25, %v2492_v57  ;;  %v2651_v36 = vadd.f32 1.0, %v4376_v53  ;;  %v2559_v11 = vsub.f32 0.0, %v3816_v16  ;;  %v2743_v39 = vadd.f32 %v2742_v8, %v5720_v22 }
 0x238   : > { %v4378_v60 = vpop.eup %4377  ;;  %v3820_v59 = vadd.f32 %v3819_v63, %v2494_v50 }
 0x239   : > { %v2652_v17 = vadd.f32 1.0, %v4378_v60  ;;  %4387 = vrcp.f32 %v2651_v36  ;;  %v2112_v54 = vpop.f32.mrb[48].mxu1  ;;  %v2613_v42 = vmul.f32 1.442695, %v2559_v11 }
 0x23a   : > { %v2560_v61 = vsub.f32 0.0, %v3820_v59  ;;  %v2498_v20 = vpop.f32.mrb[48].mxu0  ;;  %v3821_v45 = vadd.f32 %v2112_v54, %v5542_v38  ;;  %v2114_v15 = vpop.f32.mrb[49].mxu1 }
 0x23b   : > { %v4380_v56 = vpop.eup %4379  ;;  %4389 = vrcp.f32 %v2652_v17  ;;  %v2500_v37 = vpop.f32.mrb[49].mxu0  ;;  %v3823_v32 = vadd.f32 %v2114_v15, %v5546_v43 }
 0x23c   : > { %v5733_v40 = vmul.f32 %v4380_v56, %v5673_v7  ;;  %v2615_v4 = vmul.f32 1.442695, %v2560_v61  ;;  %v2116_v48 = vpop.f32.mrb[50].mxu1  ;;  %v2502_v18 = vpop.f32.mrb[50].mxu0  ;;  %4391 = vpow2.f32 %v2613_v42  ;;  %v5736_v26 = vadd.f32 %v3821_v45, %v2498_v20 }
 0x23d   : > { %v4382_v1 = vpop.eup %4381  ;;  %v3825_v30 = vadd.f32 %v2116_v48, %v5542_v38  ;;  %v2118_v28 = vpop.f32.mrb[51].mxu1  ;;  %v3824_v7 = vadd.f32 %v3823_v32, %v2500_v37 }
 0x23e   : > { %v2504_v52 = vpop.f32.mrb[51].mxu0  ;;  %v4384_v29 = vpop.eup %4383  ;;  %v5741_v3 = vmul.f32 %v4382_v1, %v5677_v10  ;;  %4393 = vpow2.f32 %v2615_v4  ;;  %v3827_v57 = vadd.f32 %v2118_v28, %v5546_v43  ;;  %v2744_v25 = vadd.f32 %v2743_v39, %v5733_v40 }
 0x23f   : > { %v2653_v31 = vadd.f32 1.0, %v4384_v29  ;;  %v5743_v46 = vadd.f32 %v3825_v30, %v2502_v18  ;;  %v2561_v55 = vsub.f32 0.0, %v3824_v7 }
 0x240   : > { %v4386_v21 = vpop.eup %4385  ;;  %v3828_v63 = vadd.f32 %v3827_v57, %v2504_v52  ;;  %v2745_v11 = vadd.f32 %v2744_v25, %v5741_v3 }
 0x241   : > { %4395 = vrcp.f32 %v2653_v31  ;;  %v2654_v50 = vadd.f32 1.0, %v4386_v21  ;;  %v2617_v53 = vmul.f32 1.442695, %v2561_v55  ;;  %v2122_v16 = vpop.f32.mrb[52].mxu1 }
 0x242   : > { %v2508_v60 = vpop.f32.mrb[52].mxu0  ;;  %v2562_v10 = vsub.f32 0.0, %v3828_v63  ;;  %v3829_v47 = vadd.f32 %v2122_v16, %v5542_v38  ;;  %v2124_v36 = vpop.f32.mrb[53].mxu1 }
 0x243   : > { %4397 = vrcp.f32 %v2654_v50  ;;  %v2510_v59 = vpop.f32.mrb[53].mxu0  ;;  %v4388_v17 = vpop.eup %4387  ;;  %v3831_v8 = vadd.f32 %v2124_v36, %v5546_v43 }
 0x244   : > { %4399 = vpow2.f32 %v2617_v53  ;;  %v2126_v61 = vpop.f32.mrb[54].mxu1  ;;  %v2512_v54 = vpop.f32.mrb[54].mxu0  ;;  %v5751_v56 = vmul.f32 %v4388_v17, %v5688_v51  ;;  %v2619_v42 = vmul.f32 1.442695, %v2562_v10  ;;  %v5753_v45 = vadd.f32 %v3829_v47, %v2508_v60 }
 0x245   : > { %v4390_v20 = vpop.eup %4389  ;;  %v3833_v15 = vadd.f32 %v2126_v61, %v5542_v38  ;;  %v2128_v37 = vpop.f32.mrb[55].mxu1  ;;  %v3832_v48 = vadd.f32 %v3831_v8, %v2510_v59 }
 0x246   : > { %v2514_v4 = vpop.f32.mrb[55].mxu0  ;;  %v5757_v32 = vmul.f32 %v4390_v20, %v5694_v5  ;;  %v3835_v18 = vadd.f32 %v2128_v37, %v5546_v43  ;;  %v4392_v1 = vpop.eup %4391  ;;  %v2746_v30 = vadd.f32 %v2745_v11, %v5751_v56  ;;  %4401 = vpow2.f32 %v2619_v42 }
 0x247   : > { %v5761_v28 = vadd.f32 %v3833_v15, %v2512_v54  ;;  %v2655_v52 = vadd.f32 1.0, %v4392_v1  ;;  %v2563_v29 = vsub.f32 0.0, %v3832_v48 }
 0x248   : > { %v4394_v51 = vpop.eup %4393  ;;  %v3836_v39 = vadd.f32 %v3835_v18, %v2514_v4  ;;  %v2747_v55 = vadd.f32 %v2746_v30, %v5757_v32 }
 0x249   : > { %v2656_v7 = vadd.f32 1.0, %v4394_v51  ;;  %4403 = vrcp.f32 %v2655_v52  ;;  %v2621_v31 = vmul.f32 1.442695, %v2563_v29  ;;  %v2132_v21 = vpop.f32.mrb[56].mxu1 }
 0x24a   : > { %v2564_v57 = vsub.f32 0.0, %v3836_v39  ;;  %v2518_v5 = vpop.f32.mrb[56].mxu0  ;;  %v3837_v50 = vadd.f32 %v2132_v21, %v5542_v38  ;;  %v2134_v63 = vpop.f32.mrb[57].mxu1 }
 0x24b   : > { %v4396_v25 = vpop.eup %4395  ;;  %4405 = vrcp.f32 %v2656_v7  ;;  %v2520_v53 = vpop.f32.mrb[57].mxu0  ;;  %v3839_v10 = vadd.f32 %v2134_v63, %v5546_v43 }
 0x24c   : > { %v5766_v16 = vmul.f32 %v4396_v25, %v5706_v27  ;;  %4407 = vpow2.f32 %v2621_v31  ;;  %v2623_v60 = vmul.f32 1.442695, %v2564_v57  ;;  %v2136_v47 = vpop.f32.mrb[58].mxu1  ;;  %v2522_v36 = vpop.f32.mrb[58].mxu0  ;;  %v5769_v17 = vadd.f32 %v3837_v50, %v2518_v5 }
 0x24d   : > { %v4398_v59 = vpop.eup %4397  ;;  %v3841_v11 = vadd.f32 %v2136_v47, %v5542_v38  ;;  %v2138_v8 = vpop.f32.mrb[59].mxu1  ;;  %v3840_v27 = vadd.f32 %v3839_v10, %v2520_v53 }
 0x24e   : > { %v2524_v61 = vpop.f32.mrb[59].mxu0  ;;  %v4400_v54 = vpop.eup %4399  ;;  %v2748_v20 = vadd.f32 %v2747_v55, %v5766_v16  ;;  %v5774_v42 = vmul.f32 %v4398_v59, %v5711_v44  ;;  %4409 = vpow2.f32 %v2623_v60  ;;  %v3843_v4 = vadd.f32 %v2138_v8, %v5546_v43 }
 0x24f   : > { %v2657_v15 = vadd.f32 1.0, %v4400_v54  ;;  %v5776_v37 = vadd.f32 %v3841_v11, %v2522_v36  ;;  %v2565_v18 = vsub.f32 0.0, %v3840_v27 }
 0x250   : > { %v2749_v48 = vadd.f32 %v2748_v20, %v5774_v42  ;;  %v4402_v1 = vpop.eup %4401  ;;  %v3844_v30 = vadd.f32 %v3843_v4, %v2524_v61 }
 0x251   : > { %4411 = vrcp.f32 %v2657_v15  ;;  %v2658_v51 = vadd.f32 1.0, %v4402_v1  ;;  %v2625_v52 = vmul.f32 1.442695, %v2565_v18  ;;  %v2142_v29 = vpop.f32.mrb[60].mxu1 }
 0x252   : > { %v2528_v39 = vpop.f32.mrb[60].mxu0  ;;  %v2566_v7 = vsub.f32 0.0, %v3844_v30  ;;  %v3845_v44 = vadd.f32 %v2142_v29, %v5542_v38  ;;  %v2144_v31 = vpop.f32.mrb[61].mxu1 }
 0x253   : > { %v2530_v57 = vpop.f32.mrb[61].mxu0  ;;  %v4404_v21 = vpop.eup %4403  ;;  %4413 = vrcp.f32 %v2658_v51  ;;  %v3847_v5 = vadd.f32 %v2144_v31, %v5546_v43 }
 0x254   : > { %v2146_v25 = vpop.f32.mrb[62].mxu1  ;;  %v2532_v55 = vpop.f32.mrb[62].mxu0  ;;  %v5783_v63 = vmul.f32 %v4404_v21, %v5722_v12  ;;  %4415 = vpow2.f32 %v2625_v52  ;;  %v2627_v53 = vmul.f32 1.442695, %v2566_v7  ;;  %v3846_v60 = vadd.f32 %v3845_v44, %v2528_v39 }
 0x255   : > { %v4406_v50 = vpop.eup %4405  ;;  %v2148_v10 = vpop.f32.mrb[63].mxu1  ;;  %v3848_v11 = vadd.f32 %v3847_v5, %v2530_v57  ;;  %v3849_v8 = vadd.f32 %v2146_v25, %v5542_v38 }
 0x256   : > { %v2534_v47 = vpop.f32.mrb[63].mxu0  ;;  %v4408_v36 = vpop.eup %4407  ;;  %v5786_v59 = vmul.f32 %v4406_v50, %v5727_v34  ;;  %v3851_v61 = vadd.f32 %v2148_v10, %v5546_v43  ;;  %v2750_v54 = vadd.f32 %v2749_v48, %v5783_v63  ;;  %4417 = vpow2.f32 %v2627_v53 }
 0x257   : > { %v2659_v20 = vadd.f32 1.0, %v4408_v36  ;;  %v2567_v27 = vsub.f32 0.0, %v3848_v11  ;;  %v3850_v15 = vadd.f32 %v3849_v8, %v2532_v55 }
 0x258   : > { %v4410_v12 = vpop.eup %4409  ;;  %v3852_v4 = vadd.f32 %v3851_v61, %v2534_v47  ;;  %v2751_v18 = vadd.f32 %v2750_v54, %v5786_v59 }
 0x259   : > { %4419 = vrcp.f32 %v2659_v20  ;;  %v2660_v1 = vadd.f32 1.0, %v4410_v12  ;;  %v2629_v30 = vmul.f32 1.442695, %v2567_v27 }
 0x25a   : > { %v2568_v34 = vsub.f32 0.0, %v3852_v4 }
 0x25b   : > { %v4412_v51 = vpop.eup %4411  ;;  %4421 = vrcp.f32 %v2660_v1 }
 0x25c   : > { %v2721_v38 = vmul.f32 %v4412_v51, %v5736_v26  ;;  %4423 = vpow2.f32 %v2629_v30  ;;  %v2631_v43 = vmul.f32 1.442695, %v2568_v34 }
 0x25d   : > { %v4414_v52 = vpop.eup %4413 }
 0x25e   : > { %v2752_v48 = vadd.f32 %v2751_v18, %v2721_v38  ;;  %4425 = vpow2.f32 %v2631_v43  ;;  %v4416_v29 = vpop.eup %4415  ;;  %v2722_v39 = vmul.f32 %v4414_v52, %v5743_v46 }
 0x25f   : > { %v2661_v7 = vadd.f32 1.0, %v4416_v29 }
 0x260   : > { %v4418_v44 = vpop.eup %4417  ;;  %v2753_v31 = vadd.f32 %v2752_v48, %v2722_v39 }
 0x261   : > { %4427 = vrcp.f32 %v2661_v7  ;;  %v2662_v57 = vadd.f32 1.0, %v4418_v44 }
 0x263   : > { %v4420_v21 = vpop.eup %4419  ;;  %4429 = vrcp.f32 %v2662_v57 }
 0x264   : > { %v2723_v5 = vmul.f32 %v4420_v21, %v5753_v45 }
 0x265   : > { %v4422_v25 = vpop.eup %4421 }
 0x266   : > { %v4424_v55 = vpop.eup %4423  ;;  %v2754_v26 = vadd.f32 %v2753_v31, %v2723_v5  ;;  %v2724_v50 = vmul.f32 %v4422_v25, %v5761_v28 }
 0x267   : > { %v2663_v53 = vadd.f32 1.0, %v4424_v55 }
 0x268   : > { %v4426_v10 = vpop.eup %4425  ;;  %v2755_v47 = vadd.f32 %v2754_v26, %v2724_v50 }
 0x269   : > { %4431 = vrcp.f32 %v2663_v53  ;;  %v2664_v36 = vadd.f32 1.0, %v4426_v10 }
 0x26b   : > { %4433 = vrcp.f32 %v2664_v36  ;;  %v4428_v46 = vpop.eup %4427 }
 0x26c   : > { %v2725_v11 = vmul.f32 %v4428_v46, %v5769_v17 }
 0x26d   : > { %v4430_v8 = vpop.eup %4429 }
 0x26e   : > { %v2756_v61 = vadd.f32 %v2755_v47, %v2725_v11  ;;  %v2726_v54 = vmul.f32 %v4430_v8, %v5776_v37 }
 0x270   : > { %v2757_v45 = vadd.f32 %v2756_v61, %v2726_v54 }
 0x273   : > { %v4432_v20 = vpop.eup %4431 }
 0x274   : > { %v2727_v12 = vmul.f32 %v4432_v20, %v3846_v60 }
 0x275   : > { %v4434_v27 = vpop.eup %4433 }
 0x276   : > { %v2758_v4 = vadd.f32 %v2757_v45, %v2727_v12  ;;  %v2728_v18 = vmul.f32 %v4434_v27, %v3850_v15 }
 0x278   : > { %v2759_v28 = vadd.f32 %v2758_v4, %v2728_v18 }
 0x27a   : > { %v2760_v1 = vrot.slane %v2759_v28, 4 }
 0x27c   : > { %v2761_v30 = vadd.f32 %v2760_v1, %v2759_v28 }
 0x27e   : > { %v2762_v34 = vrot.slane %v2761_v30, 2 }
 0x280   : > { %v2763_v51 = vadd.f32 %v2762_v34, %v2761_v30 }
 0x282   : > { %v2764_v43 = vrot.slane %v2763_v51, 1 }
 0x284   : > { %v2765_v52 = vadd.f32 %v2764_v43, %v2763_v51 }
 0x286   : > { %v5798_v48 = vmul.f32 0.00390625, %v2765_v52 }
 0x288   : > { %v5802_v17 = vsub.f32 %v5766_v16, %v5798_v48  ;;  %v5806_v37 = vsub.f32 %v5774_v42, %v5798_v48  ;;  %v5810_v60 = vsub.f32 %v5783_v63, %v5798_v48  ;;  %v5814_v15 = vsub.f32 %v5786_v59, %v5798_v48 }
 0x289   : > { %v5817_v29 = vsub.f32 %v2721_v38, %v5798_v48  ;;  %v5820_v7 = vsub.f32 %v2722_v39, %v5798_v48  ;;  %v5823_v16 = vsub.f32 %v2723_v5, %v5798_v48  ;;  %v5826_v42 = vsub.f32 %v2724_v50, %v5798_v48 }
 0x28a   : > { %v5829_v44 = vsub.f32 %v2725_v11, %v5798_v48  ;;  %v5832_v63 = vsub.f32 %v2726_v54, %v5798_v48  ;;  %v5835_v59 = vsub.f32 %v2727_v12, %v5798_v48  ;;  %v5838_v38 = vsub.f32 %v2728_v18, %v5798_v48 }
 0x28b   : > { %v5842_v39 = vsub.f32 %v5593_v13, %v5798_v48  ;;  %v5846_v31 = vsub.f32 %v5602_v49, %v5798_v48  ;;  %v5850_v57 = vsub.f32 %v5611_v62, %v5798_v48  ;;  %v5858_v25 = vsub.f32 %v5620_v0, %v5798_v48 }
 0x28c   : > { %v5862_v13 = vsub.f32 %v5629_v19, %v5798_v48  ;;  %v5868_v62 = vsub.f32 %v5638_v33, %v5798_v48  ;;  %v5874_v0 = vsub.f32 %v5647_v35, %v5798_v48  ;;  %v5880_v10 = vsub.f32 %v5658_v9, %v5798_v48 }
 0x28d   : > { %v2800_v21 = vmul.f32 %v5842_v39, %v5842_v39  ;;  %v2801_v5 = vmul.f32 %v5846_v31, %v5846_v31  ;;  %v2802_v49 = vmul.f32 %v5850_v57, %v5850_v57  ;;  %v2803_v26 = vmul.f32 %v5858_v25, %v5858_v25 }
 0x28e   : > { %v2804_v19 = vmul.f32 %v5862_v13, %v5862_v13  ;;  %v2805_v33 = vmul.f32 %v5868_v62, %v5868_v62  ;;  %v5886_v36 = vsub.f32 %v5665_v2, %v5798_v48  ;;  %v2806_v35 = vmul.f32 %v5874_v0, %v5874_v0 }
 0x28f   : > { %v2832_v55 = vadd.f32 %v2801_v5, %v2800_v21  ;;  %v5892_v11 = vsub.f32 %v5670_v41, %v5798_v48  ;;  %v2807_v9 = vmul.f32 %v5880_v10, %v5880_v10  ;;  %v5898_v61 = vsub.f32 %v5682_v6, %v5798_v48 }
 0x290   : > { %v2808_v2 = vmul.f32 %v5886_v36, %v5886_v36  ;;  %v5904_v45 = vsub.f32 %v5686_v24, %v5798_v48  ;;  %v5910_v12 = vsub.f32 %v5698_v14, %v5798_v48  ;;  %v5916_v4 = vsub.f32 %v5703_v23, %v5798_v48 }
 0x291   : > { %v2833_v50 = vadd.f32 %v2832_v55, %v2802_v49  ;;  %v2809_v41 = vmul.f32 %v5892_v11, %v5892_v11  ;;  %v2810_v6 = vmul.f32 %v5898_v61, %v5898_v61  ;;  %v5922_v28 = vsub.f32 %v5715_v58, %v5798_v48 }
 0x292   : > { %v2811_v24 = vmul.f32 %v5904_v45, %v5904_v45  ;;  %v2812_v14 = vmul.f32 %v5910_v12, %v5910_v12  ;;  %v5928_v30 = vsub.f32 %v5720_v22, %v5798_v48  ;;  %v2813_v23 = vmul.f32 %v5916_v4, %v5916_v4 }
 0x293   : > { %v2834_v53 = vadd.f32 %v2833_v50, %v2803_v26  ;;  %v5934_v51 = vsub.f32 %v5733_v40, %v5798_v48  ;;  %v2814_v58 = vmul.f32 %v5922_v28, %v5922_v28  ;;  %v5940_v52 = vsub.f32 %v5741_v3, %v5798_v48 }
 0x294   : > { %v2815_v22 = vmul.f32 %v5928_v30, %v5928_v30  ;;  %v5946_v5 = vsub.f32 %v5751_v56, %v5798_v48  ;;  %v5952_v55 = vsub.f32 %v5757_v32, %v5798_v48  ;;  %v2821_v32 = vmul.f32 %v5806_v37, %v5806_v37 }
 0x295   : > { %v2835_v47 = vadd.f32 %v2834_v53, %v2804_v19  ;;  %v2816_v40 = vmul.f32 %v5934_v51, %v5934_v51  ;;  %v2817_v3 = vmul.f32 %v5940_v52, %v5940_v52 }
 0x296   : > { %v2818_v50 = vmul.f32 %v5946_v5, %v5946_v5  ;;  %v2819_v56 = vmul.f32 %v5952_v55, %v5952_v55 }
 0x297   : > { %v2836_v46 = vadd.f32 %v2835_v47, %v2805_v33  ;;  %v2820_v33 = vmul.f32 %v5802_v17, %v5802_v17 }
 0x299   : > { %v2837_v8 = vadd.f32 %v2836_v46, %v2806_v35  ;;  %v2822_v35 = vmul.f32 %v5810_v60, %v5810_v60 }
 0x29b   : > { %v2838_v54 = vadd.f32 %v2837_v8, %v2807_v9  ;;  %v2823_v9 = vmul.f32 %v5814_v15, %v5814_v15 }
 0x29d   : > { %v2839_v20 = vadd.f32 %v2838_v54, %v2808_v2  ;;  %v2824_v2 = vmul.f32 %v5817_v29, %v5817_v29 }
 0x29f   : > { %v2840_v27 = vadd.f32 %v2839_v20, %v2809_v41  ;;  %v2825_v41 = vmul.f32 %v5820_v7, %v5820_v7 }
 0x2a1   : > { %v2841_v18 = vadd.f32 %v2840_v27, %v2810_v6  ;;  %v2826_v6 = vmul.f32 %v5823_v16, %v5823_v16 }
 0x2a3   : > { %v2842_v1 = vadd.f32 %v2841_v18, %v2811_v24  ;;  %v2827_v24 = vmul.f32 %v5826_v42, %v5826_v42 }
 0x2a5   : > { %v2843_v34 = vadd.f32 %v2842_v1, %v2812_v14  ;;  %v2828_v14 = vmul.f32 %v5829_v44, %v5829_v44 }
 0x2a7   : > { %v2844_v43 = vadd.f32 %v2843_v34, %v2813_v23  ;;  %v2829_v23 = vmul.f32 %v5832_v63, %v5832_v63 }
 0x2a9   : > { %v2845_v21 = vadd.f32 %v2844_v43, %v2814_v58  ;;  %v2830_v58 = vmul.f32 %v5835_v59, %v5835_v59 }
 0x2ab   : > { %v2846_v49 = vadd.f32 %v2845_v21, %v2815_v22  ;;  %v2831_v22 = vmul.f32 %v5838_v38, %v5838_v38 }
 0x2ad   : > { %v2847_v26 = vadd.f32 %v2846_v49, %v2816_v40 }
 0x2af   : > { %v2848_v19 = vadd.f32 %v2847_v26, %v2817_v3 }
 0x2b1   : > { %v2849_v53 = vadd.f32 %v2848_v19, %v2818_v50 }
 0x2b3   : > { %v2850_v47 = vadd.f32 %v2849_v53, %v2819_v56 }
 0x2b5   : > { %v2851_v48 = vadd.f32 %v2850_v47, %v2820_v33 }
 0x2b7   : > { %v2852_v46 = vadd.f32 %v2851_v48, %v2821_v32 }
 0x2b9   : > { %v2853_v8 = vadd.f32 %v2852_v46, %v2822_v35 }
 0x2bb   : > { %v2854_v54 = vadd.f32 %v2853_v8, %v2823_v9 }
 0x2bd   : > { %v2855_v20 = vadd.f32 %v2854_v54, %v2824_v2 }
 0x2bf   : > { %v2856_v27 = vadd.f32 %v2855_v20, %v2825_v41 }
 0x2c1   : > { %v2857_v18 = vadd.f32 %v2856_v27, %v2826_v6 }
 0x2c3   : > { %v2858_v1 = vadd.f32 %v2857_v18, %v2827_v24 }
 0x2c5   : > { %v2859_v34 = vadd.f32 %v2858_v1, %v2828_v14 }
 0x2c7   : > { %v2860_v43 = vadd.f32 %v2859_v34, %v2829_v23 }
 0x2c9   : > { %v2861_v21 = vadd.f32 %v2860_v43, %v2830_v58 }
 0x2cb   : > { %v2862_v40 = vadd.f32 %v2861_v21, %v2831_v22 }
 0x2cd   : > { %v2863_v49 = vrot.slane %v2862_v40, 4 }
 0x2cf   : > { %v2864_v3 = vadd.f32 %v2863_v49, %v2862_v40 }
 0x2d1   : > { %v2865_v26 = vrot.slane %v2864_v3, 2 }
 0x2d3   : > { %v2866_v50 = vadd.f32 %v2865_v26, %v2864_v3 }
 0x2d5   : > { %v2867_v19 = vrot.slane %v2866_v50, 1 }
 0x2d7   : > { %v2868_v56 = vadd.f32 %v2867_v19, %v2866_v50 }
 0x2d9   : > { %v2869_v53 = vmul.f32 0.00390625, %v2868_v56 }
 0x2db   : > { %v2870_v33 = vadd.f32 1e-05, %v2869_v53 }
 0x2dd   : > { %4435 = vrsqrt.f32 %v2870_v33 }
 0x2e7   : > { %v4436_v47 = vpop.eup %4435 }
 0x2e8   : > { %v5985_v32 = vmul.f32 %v4436_v47, %v5832_v63  ;;  %v5988_v48 = vmul.f32 %v4436_v47, %v5835_v59  ;;  %v5991_v35 = vmul.f32 %v4436_v47, %v5838_v38  ;;  %v5994_v46 = vmul.f32 %v4436_v47, %v5842_v39 }
 0x2e9   : > { %v5997_v9 = vmul.f32 %v4436_v47, %v5846_v31  ;;  %v6000_v8 = vmul.f32 %v4436_v47, %v5850_v57  ;;  %v6003_v2 = vmul.f32 %v4436_v47, %v5858_v25  ;;  %v6006_v63 = vmul.f32 %v4436_v47, %v5862_v13 }
 0x2ea   : > { %v6009_v59 = vmul.f32 %v4436_v47, %v5868_v62  ;;  %v6012_v38 = vmul.f32 %v4436_v47, %v5874_v0  ;;  %v6015_v39 = vmul.f32 %v4436_v47, %v5880_v10  ;;  %v6018_v31 = vmul.f32 %v4436_v47, %v5886_v36 }
 0x2eb   : > { %v6021_v57 = vmul.f32 %v4436_v47, %v5892_v11  ;;  %v6024_v25 = vmul.f32 %v4436_v47, %v5898_v61  ;;  %v6027_v13 = vmul.f32 %v4436_v47, %v5904_v45  ;;  %v6030_v62 = vmul.f32 %v4436_v47, %v5910_v12 }
 0x2ec   : > { %v6033_v0 = vmul.f32 %v4436_v47, %v5916_v4  ;;  %v6036_v10 = vmul.f32 %v4436_v47, %v5922_v28  ;;  %v6039_v36 = vmul.f32 %v4436_v47, %v5928_v30  ;;  %v6042_v11 = vmul.f32 %v4436_v47, %v5934_v51 }
 0x2ed   : > { %v6045_v61 = vmul.f32 %v4436_v47, %v5940_v52  ;;  %v6048_v45 = vmul.f32 %v4436_v47, %v5946_v5  ;;  %v6051_v12 = vmul.f32 %v4436_v47, %v5952_v55  ;;  %v6054_v4 = vmul.f32 %v4436_v47, %v5802_v17 }
 0x2ee   : > { %v6057_v28 = vmul.f32 %v4436_v47, %v5806_v37  ;;  %v6060_v30 = vmul.f32 %v4436_v47, %v5810_v60  ;;  %v6063_v51 = vmul.f32 %v4436_v47, %v5814_v15  ;;  %v6066_v52 = vmul.f32 %v4436_v47, %v5817_v29 }
 0x2ef   : > { %v2936_v5 = vmin.f32 %v5994_v46, 0.0  ;;  %v2937_v55 = vmin.f32 %v5997_v9, 0.0  ;;  %v2938_v54 = vmin.f32 %v6000_v8, 0.0  ;;  %v6072_v17 = vmul.f32 %v4436_v47, %v5820_v7 }
 0x2f0   : > { %v6075_v37 = vmul.f32 %v4436_v47, %v5823_v16  ;;  %v6078_v60 = vmul.f32 %v4436_v47, %v5826_v42  ;;  %v2939_v15 = vmin.f32 %v6003_v2, 0.0  ;;  %v2940_v29 = vmin.f32 %v6006_v63, 0.0 }
 0x2f1   : > { %v2941_v41 = vmin.f32 %v6009_v59, 0.0  ;;  %v2942_v20 = vmin.f32 %v6012_v38, 0.0  ;;  %v2943_v6 = vmin.f32 %v6015_v39, 0.0  ;;  %v2944_v27 = vmin.f32 %v6018_v31, 0.0 }
 0x2f2   : > { %v2945_v7 = vmin.f32 %v6021_v57, 0.0  ;;  %v2946_v16 = vmin.f32 %v6024_v25, 0.0  ;;  %v2947_v24 = vmin.f32 %v6027_v13, 0.0  ;;  %v6090_v42 = vmul.f32 %v4436_v47, %v5829_v44 }
 0x2f3   : > { %v2968_v18 = vmul.f32 1.442695, %v2936_v5  ;;  %v2970_v14 = vmul.f32 1.442695, %v2937_v55  ;;  %v2972_v1 = vmul.f32 1.442695, %v2938_v54 }
 0x2f4   : > { %v2948_v23 = vmin.f32 %v6030_v62, 0.0  ;;  %v2949_v34 = vmin.f32 %v6033_v0, 0.0  ;;  %v2950_v58 = vmin.f32 %v6036_v10, 0.0  ;;  %v2974_v43 = vmul.f32 1.442695, %v2939_v15 }
 0x2f5   : > { %v2951_v22 = vmin.f32 %v6039_v36, 0.0  ;;  %v2952_v21 = vmin.f32 %v6042_v11, 0.0  ;;  %4437 = vpow2.f32 %v2968_v18  ;;  %v2976_v40 = vmul.f32 1.442695, %v2940_v29 }
 0x2f6   : > { %v2953_v49 = vmin.f32 %v6045_v61, 0.0  ;;  %v2954_v44 = vmin.f32 %v6048_v45, 0.0  ;;  %4439 = vpow2.f32 %v2970_v14  ;;  %v2978_v3 = vmul.f32 1.442695, %v2941_v41 }
 0x2f7   : > { %v2955_v26 = vmin.f32 %v6051_v12, 0.0  ;;  %v2956_v50 = vmin.f32 %v6054_v4, 0.0  ;;  %4441 = vpow2.f32 %v2972_v1  ;;  %v2980_v19 = vmul.f32 1.442695, %v2942_v20 }
 0x2f8   : > { %v2957_v56 = vmin.f32 %v6057_v28, 0.0  ;;  %v2958_v53 = vmin.f32 %v6060_v30, 0.0  ;;  %4443 = vpow2.f32 %v2974_v43  ;;  %v2982_v33 = vmul.f32 1.442695, %v2943_v6 }
 0x2f9   : > { %vm2904_vm2 = vcmp.gt.f32.partialorder %v5994_v46, 0.0  ;;  %v2959_v47 = vmin.f32 %v6063_v51, 0.0  ;;  %v2960_v5 = vmin.f32 %v6066_v52, 0.0  ;;  %4445 = vpow2.f32 %v2976_v40 }
 0x2fa   : > { %v2984_v55 = vmul.f32 1.442695, %v2944_v27  ;;  %vm2905_vm3 = vcmp.gt.f32.partialorder %v5997_v9, 0.0  ;;  %v2961_v54 = vmin.f32 %v6072_v17, 0.0  ;;  %v2962_v15 = vmin.f32 %v6075_v37, 0.0 }
 0x2fb   : > { %4447 = vpow2.f32 %v2978_v3  ;;  %v2986_v29 = vmul.f32 1.442695, %v2945_v7  ;;  %vm2906_vm4 = vcmp.gt.f32.partialorder %v6000_v8, 0.0  ;;  %v2963_v41 = vmin.f32 %v6078_v60, 0.0 }
 0x2fc   : > { %v2964_v20 = vmin.f32 %v6090_v42, 0.0  ;;  %4449 = vpow2.f32 %v2980_v19  ;;  %v2988_v6 = vmul.f32 1.442695, %v2946_v16  ;;  %vm2907_vm5 = vcmp.gt.f32.partialorder %v6003_v2, 0.0 }
 0x2fd   : > { %4451 = vpow2.f32 %v2982_v33  ;;  %v2990_v14 = vmul.f32 1.442695, %v2947_v24  ;;  %vm2908_vm6 = vcmp.gt.f32.partialorder %v6006_v63, 0.0  ;;  %v2992_v1 = vmul.f32 1.442695, %v2948_v23 }
 0x2fe   : > { %4453 = vpow2.f32 %v2984_v55  ;;  %v2994_v43 = vmul.f32 1.442695, %v2949_v34  ;;  %vm2909_vm7 = vcmp.gt.f32.partialorder %v6009_v59, 0.0  ;;  %v2996_v16 = vmul.f32 1.442695, %v2950_v58 }
 0x2ff   : > { %4455 = vpow2.f32 %v2986_v29  ;;  %v2998_v40 = vmul.f32 1.442695, %v2951_v22  ;;  %v3000_v3 = vmul.f32 1.442695, %v2952_v21  ;;  %v4438_v19 = vpop.eup %4437  ;;  %vm2910_vm8 = vcmp.gt.f32.partialorder %v6012_v38, 0.0 }
 0x300   : > { %4457 = vpow2.f32 %v2988_v6  ;;  %v3002_v33 = vmul.f32 1.442695, %v2953_v49  ;;  %v3004_v24 = vmul.f32 1.442695, %v2954_v44  ;;  %v3006_v18 = vmul.f32 1.442695, %v2955_v26  ;;  %v4440_v27 = vpop.eup %4439 }
 0x301   : > { %vm2911_vm9 = vcmp.gt.f32.partialorder %v6015_v39, 0.0  ;;  %4459 = vpow2.f32 %v2990_v14  ;;  %v3008_v23 = vmul.f32 1.442695, %v2956_v50  ;;  %v3010_v34 = vmul.f32 1.442695, %v2957_v56  ;;  %v4442_v7 = vpop.eup %4441 }
 0x302   : > { %v3499_v55 = vadd.f32 -1.0, %v4438_v19  ;;  %vm2912_vm10 = vcmp.gt.f32.partialorder %v6018_v31, 0.0  ;;  %4461 = vpow2.f32 %v2992_v1  ;;  %v3012_v58 = vmul.f32 1.442695, %v2958_v53  ;;  %v4444_v29 = vpop.eup %4443 }
 0x303   : > { %v6122_v22 = vmul.f32 1.442695, %v2959_v47  ;;  %v3500_v21 = vadd.f32 -1.0, %v4440_v27  ;;  %vm2913_vm11 = vcmp.gt.f32.partialorder %v6021_v57, 0.0  ;;  %4463 = vpow2.f32 %v2994_v43  ;;  %v4446_v50 = vpop.eup %4445 }
 0x304   : > { %v6125_v49 = vmul.f32 1.442695, %v2960_v5  ;;  %v3501_v44 = vadd.f32 -1.0, %v4442_v7  ;;  %v3064_v26 = vsel %vm2904_vm2, %v5994_v46, %v3499_v55  ;;  %vm2914_vm12 = vcmp.gt.f32.partialorder %v6024_v25, 0.0 }
 0x305   : > { %4465 = vpow2.f32 %v2996_v16  ;;  %v6136_v56 = vmul.f32 1.442695, %v2961_v54  ;;  %v3502_v53 = vadd.f32 -1.0, %v4444_v29  ;;  %v3065_v47 = vsel %vm2905_vm3, %v5997_v9, %v3500_v21  ;;  %v4448_v5 = vpop.eup %4447 }
 0x306   : > { %vm2915_vm13 = vcmp.gt.f32.partialorder %v6027_v13, 0.0  ;;  %4467 = vpow2.f32 %v2998_v40  ;;  %v3503_v46 = vadd.f32 -1.0, %v4446_v50  ;;  %v3066_v6 = vsel %vm2906_vm4, %v6000_v8, %v3501_v44  ;;  %v4450_v14 = vpop.eup %4449 }
 0x307   : > { %v3601_v27 = vpack.c.bf16 %v3065_v47, %v3064_v26  ;;  %vm2916_vm14 = vcmp.gt.f32.partialorder %v6030_v62, 0.0  ;;  %4469 = vpow2.f32 %v3000_v3  ;;  %v3020_v54 = vmul.f32 1.442695, %v2962_v15  ;;  %v4452_v1 = vpop.eup %4451 }
 0x308   : > { %v3504_v7 = vadd.f32 -1.0, %v4448_v5  ;;  %v3067_v9 = vsel %vm2907_vm5, %v6003_v2, %v3502_v53  ;;  %vm2917_vm15 = vcmp.gt.f32.partialorder %v6033_v0, 0.0  ;;  %4471 = vpow2.f32 %v3002_v33  ;;  %v4454_v40 = vpop.eup %4453 }
 0x309   : > { %v3505_v43 = vadd.f32 -1.0, %v4450_v14  ;;  %v3068_v8 = vsel %vm2908_vm6, %v6006_v63, %v3503_v46  ;;  %3602 = vst [vmem:[%s6133_s6] sm:$0xff] %v3601_v27   ;;  %v3606_v16 = vpack.c.bf16 %v3067_v9, %v3066_v6  ;;  %vm2918_vm0 = vcmp.gt.f32.partialorder %v6036_v10, 0.0  ;;  %v4456_v19 = vpop.eup %4455 }
 0x30a   : > { %4473 = vpow2.f32 %v3004_v24  ;;  %v3022_v15 = vmul.f32 1.442695, %v2963_v41  ;;  %v3506_v2 = vadd.f32 -1.0, %v4452_v1  ;;  %v3069_v3 = vsel %vm2909_vm7, %v6009_v59, %v3504_v7  ;;  %v4458_v55 = vpop.eup %4457 }
 0x30b   : > { %vm2919_vm1 = vcmp.gt.f32.partialorder %v6039_v36, 0.0  ;;  %4475 = vpow2.f32 %v3006_v18  ;;  %v3507_v63 = vadd.f32 -1.0, %v4454_v40  ;;  %v3070_v33 = vsel %vm2910_vm8, %v6012_v38, %v3505_v43  ;;  %3678 = vst [vmem:[%s6133_s6 + $0x8] sm:$0xff] %v3606_v16   ;;  %v4460_v21 = vpop.eup %4459 }
 0x30c   : > { %v3611_v24 = vpack.c.bf16 %v3069_v3, %v3068_v8  ;;  %vm2920_vm2 = vcmp.gt.f32.partialorder %v6042_v11, 0.0  ;;  %4477 = vpow2.f32 %v3008_v23  ;;  %v3024_v41 = vmul.f32 1.442695, %v2964_v20  ;;  %v4462_v44 = vpop.eup %4461 }
 0x30d   : > { %v3508_v59 = vadd.f32 -1.0, %v4456_v19  ;;  %v3071_v18 = vsel %vm2911_vm9, %v6015_v39, %v3506_v2  ;;  %vm2921_vm3 = vcmp.gt.f32.partialorder %v6045_v61, 0.0  ;;  %4479 = vpow2.f32 %v3010_v34  ;;  %v4464_v53 = vpop.eup %4463 }
 0x30e   : > { %v3509_v38 = vadd.f32 -1.0, %v4458_v55  ;;  %v3072_v29 = vsel %vm2912_vm10, %v6018_v31, %v3507_v63  ;;  %3679 = vst [vmem:[%s6133_s6 + $0x10] sm:$0xff] %v3611_v24   ;;  %v3616_v23 = vpack.c.bf16 %v3071_v18, %v3070_v33  ;;  %4481 = vpow2.f32 %v3012_v58 }
 0x30f   : > { %v6264_v20 = vmin.f32 %v5985_v32, 0.0  ;;  %v3510_v50 = vadd.f32 -1.0, %v4460_v21  ;;  %v3073_v39 = vsel %vm2913_vm11, %v6021_v57, %v3508_v59  ;;  %4483 = vpow2.f32 %v6122_v22  ;;  %v4466_v58 = vpop.eup %4465 }
 0x310   : > { %v3511_v34 = vadd.f32 -1.0, %v4462_v44  ;;  %v3074_v31 = vsel %vm2914_vm12, %v6024_v25, %v3509_v38  ;;  %3680 = vst [vmem:[%s6133_s6 + $0x18] sm:$0xff] %v3616_v23   ;;  %v3621_v47 = vpack.c.bf16 %v3073_v39, %v3072_v29  ;;  %4485 = vpow2.f32 %v6125_v49  ;;  %v4468_v22 = vpop.eup %4467 }
 0x311   : > { %v3026_v26 = vmul.f32 1.442695, %v6264_v20  ;;  %v6265_v5 = vmin.f32 %v5988_v48, 0.0  ;;  %v3512_v6 = vadd.f32 -1.0, %v4464_v53  ;;  %v3075_v57 = vsel %vm2915_vm13, %v6027_v13, %v3510_v50  ;;  %v4470_v49 = vpop.eup %4469 }
 0x312   : > { %4487 = vpow2.f32 %v6136_v56  ;;  %v3513_v27 = vadd.f32 -1.0, %v4466_v58  ;;  %v3076_v25 = vsel %vm2916_vm14, %v6030_v62, %v3511_v34  ;;  %3681 = vst [vmem:[%s6133_s6 + $0x20] sm:$0xff] %v3621_v47   ;;  %v3626_v14 = vpack.c.bf16 %v3075_v57, %v3074_v31  ;;  %v4472_v43 = vpop.eup %4471 }
 0x313   : > { %v3028_v46 = vmul.f32 1.442695, %v6265_v5  ;;  %4489 = vpow2.f32 %v3020_v54  ;;  %v6266_v7 = vmin.f32 %v5991_v35, 0.0  ;;  %v3514_v1 = vadd.f32 -1.0, %v4468_v22 }
 0x314   : > { %v3077_v13 = vsel %vm2917_vm15, %v6033_v0, %v3512_v6  ;;  %4491 = vpow2.f32 %v3022_v15  ;;  %v3515_v56 = vadd.f32 -1.0, %v4470_v49  ;;  %v3078_v62 = vsel %vm2918_vm0, %v6036_v10, %v3513_v27  ;;  %3682 = vst [vmem:[%s6133_s6 + $0x28] sm:$0xff] %v3626_v14   ;;  %v4474_v16 = vpop.eup %4473 }
 0x315   : > { %v3030_v9 = vmul.f32 1.442695, %v6266_v7  ;;  %v3631_v8 = vpack.c.bf16 %v3077_v13, %v3076_v25  ;;  %vm2922_vm4 = vcmp.gt.f32.partialorder %v6048_v45, 0.0  ;;  %4493 = vpow2.f32 %v3024_v41  ;;  %v4476_v0 = vpop.eup %4475 }
 0x316   : > { %v3516_v54 = vadd.f32 -1.0, %v4472_v43  ;;  %v3079_v40 = vsel %vm2919_vm1, %v6039_v36, %v3514_v1  ;;  %4495 = vpow2.f32 %v3026_v26  ;;  %v3517_v15 = vadd.f32 -1.0, %v4474_v16  ;;  %v4478_v3 = vpop.eup %4477 }
 0x317   : > { %v3080_v2 = vsel %vm2920_vm2, %v6042_v11, %v3515_v56  ;;  %3683 = vst [vmem:[%s6133_s6 + $0x30] sm:$0xff] %v3631_v8   ;;  %v3636_v10 = vpack.c.bf16 %v3079_v40, %v3078_v62  ;;  %vm2923_vm5 = vcmp.gt.f32.partialorder %v6051_v12, 0.0  ;;  %4497 = vpow2.f32 %v3028_v46  ;;  %v4480_v63 = vpop.eup %4479 }
 0x318   : > { %v3518_v19 = vadd.f32 -1.0, %v4476_v0  ;;  %v3081_v36 = vsel %vm2921_vm3, %v6045_v61, %v3516_v54  ;;  %4499 = vpow2.f32 %v3030_v9  ;;  %v3519_v33 = vadd.f32 -1.0, %v4478_v3  ;;  %v4482_v55 = vpop.eup %4481 }
 0x319   : > { %v3082_v24 = vsel %vm2922_vm4, %v6048_v45, %v3517_v15  ;;  %3684 = vst [vmem:[%s6133_s6 + $0x38] sm:$0xff] %v3636_v10   ;;  %v3641_v11 = vpack.c.bf16 %v3081_v36, %v3080_v2  ;;  %vm2924_vm6 = vcmp.gt.f32.partialorder %v6054_v4, 0.0  ;;  %v3520_v41 = vadd.f32 -1.0, %v4480_v63  ;;  %v4484_v18 = vpop.eup %4483 }
 0x31a   : > { %v3083_v59 = vsel %vm2923_vm5, %v6051_v12, %v3518_v19  ;;  %vm2925_vm7 = vcmp.gt.f32.partialorder %v6057_v28, 0.0  ;;  %v3521_v61 = vadd.f32 -1.0, %v4482_v55  ;;  %v3084_v21 = vsel %vm2924_vm6, %v6054_v4, %v3519_v33  ;;  %v4486_v29 = vpop.eup %4485 }
 0x31b   : > { %3685 = vst [vmem:[%s6133_s6 + $0x40] sm:$0xff] %v3641_v11   ;;  %v3646_v38 = vpack.c.bf16 %v3083_v59, %v3082_v24  ;;  %vm2926_vm8 = vcmp.gt.f32.partialorder %v6060_v30, 0.0  ;;  %v3522_v45 = vadd.f32 -1.0, %v4484_v18  ;;  %v3085_v23 = vsel %vm2925_vm7, %v6057_v28, %v3520_v41 }
 0x31c   : > { %v4488_v44 = vpop.eup %4487  ;;  %vm2927_vm9 = vcmp.gt.f32.partialorder %v6063_v51, 0.0  ;;  %v3523_v20 = vadd.f32 -1.0, %v4486_v29  ;;  %v3086_v12 = vsel %vm2926_vm8, %v6060_v30, %v3521_v61  ;;  %v3651_v26 = vpack.c.bf16 %v3085_v23, %v3084_v21 }
 0x31d   : > { %3686 = vst [vmem:[%s6133_s6 + $0x48] sm:$0xff] %v3646_v38   ;;  %v4490_v50 = vpop.eup %4489  ;;  %vm2928_vm10 = vcmp.gt.f32.partialorder %v6066_v52, 0.0  ;;  %v3524_v4 = vadd.f32 -1.0, %v4488_v44  ;;  %v3087_v39 = vsel %vm2927_vm9, %v6063_v51, %v3522_v45  ;;  %vm2929_vm11 = vcmp.gt.f32.partialorder %v6072_v17, 0.0 }
 0x31e   : > { %v4492_v53 = vpop.eup %4491  ;;  %v3525_v34 = vadd.f32 -1.0, %v4490_v50  ;;  %v3088_v28 = vsel %vm2928_vm10, %v6066_v52, %v3523_v20  ;;  %3687 = vst [vmem:[%s6133_s6 + $0x50] sm:$0xff] %v3651_v26   ;;  %v3656_v31 = vpack.c.bf16 %v3087_v39, %v3086_v12  ;;  %vm2930_vm12 = vcmp.gt.f32.partialorder %v6075_v37, 0.0 }
 0x31f   : > { %v4494_v47 = vpop.eup %4493  ;;  %v3526_v30 = vadd.f32 -1.0, %v4492_v53  ;;  %v3089_v58 = vsel %vm2929_vm11, %v6072_v17, %v3524_v4  ;;  %vm2931_vm13 = vcmp.gt.f32.partialorder %v6078_v60, 0.0  ;;  %vm2932_vm14 = vcmp.gt.f32.partialorder %v6090_v42, 0.0 }
 0x320   : > { %v4496_v5 = vpop.eup %4495  ;;  %v3527_v46 = vadd.f32 -1.0, %v4494_v47  ;;  %v3090_v51 = vsel %vm2930_vm12, %v6075_v37, %v3525_v34  ;;  %3688 = vst [vmem:[%s6133_s6 + $0x58] sm:$0xff] %v3656_v31   ;;  %v3661_v6 = vpack.c.bf16 %v3089_v58, %v3088_v28  ;;  %vm2933_vm15 = vcmp.gt.f32.partialorder %v5985_v32, 0.0 }
 0x321   : > { %v4498_v57 = vpop.eup %4497  ;;  %v3528_v52 = vadd.f32 -1.0, %v4496_v5  ;;  %v3091_v22 = vsel %vm2931_vm13, %v6078_v60, %v3526_v30  ;;  %vm2934_vm0 = vcmp.gt.f32.partialorder %v5988_v48, 0.0  ;;  %vm2935_vm1 = vcmp.gt.f32.partialorder %v5991_v35, 0.0 }
 0x322   : > { %v4500_v27 = vpop.eup %4499  ;;  %v3529_v17 = vadd.f32 -1.0, %v4498_v57  ;;  %v3092_v25 = vsel %vm2932_vm14, %v6090_v42, %v3527_v46  ;;  %3689 = vst [vmem:[%s6133_s6 + $0x60] sm:$0xff] %v3661_v6   ;;  %v3666_v14 = vpack.c.bf16 %v3091_v22, %v3090_v51 }
 0x323   : > { %v3530_v37 = vadd.f32 -1.0, %v4500_v27  ;;  %v3093_v49 = vsel %vm2933_vm15, %v5985_v32, %v3528_v52 }
 0x324   : > { %v3094_v7 = vsel %vm2934_vm0, %v5988_v48, %v3529_v17  ;;  %3690 = vst [vmem:[%s6133_s6 + $0x68] sm:$0xff] %v3666_v14   ;;  %v3671_v60 = vpack.c.bf16 %v3093_v49, %v3092_v25 }
 0x325   : > { %v3095_v9 = vsel %vm2935_vm1, %v5991_v35, %v3530_v37 }
 0x326   : > { %3691 = vst [vmem:[%s6133_s6 + $0x70] sm:$0xff] %v3671_v60   ;;  %v3676_v1 = vpack.c.bf16 %v3095_v9, %v3094_v7 }
 0x328   : > { %3692 = vst [vmem:[%s6133_s6 + $0x78] sm:$0xff] %v3676_v1  }
 0x329 PF: > { %s13_s12 = sadd.s32 1, %s4540_s12  }
 0x32a   : > { %p10_p4 = scmp.ge.s32.totalorder %s13_s12, 4  }
 0x32c   :  { %12 = sbr.rel (!%p10_p4) target bundleno = 1 (0x1), region = 62 }

// kernel: res_gconv_block.3
= control target key start
LH: loop header
LB: loop body
LE: loop exit
PB: predicated region body
PF: predicated region fallthrough
CT: control target
= control target key end

     0   :  { %9 = vsyncpa [#allocation3], 0  ;;  %s5895_s0 = inlined_call_operand.vmem [shape: bf16[2,18,18,128], index: 0, kind: input, shape index: {}]   ;;  %s5896_s1 = inlined_call_operand.vmem [shape: bf16[1152,256], index: 1, kind: input, shape index: {}]   ;;  %s5897_s2 = inlined_call_operand.vmem [shape: f32[1,256], index: 2, kind: input, shape index: {}]   ;;  %s5898_s3 = inlined_call_operand.vmem [shape: f32[2,16,16,128], index: 3, kind: input, shape index: {}]   ;;  %s5899_s4 = inlined_call_operand.hbm [shape: f32[2,16,16,128], index: 4, kind: output, shape index: {}]  }
   0x1   :  { %11 = vsyncpa [#allocation3 + $0x1], 0  ;;  %s4231_s15 = smov 0   ;;  %s4233_s16 = smov 0  }
   0x2   :  { %s4235_s17 = smov 0   ;;  %s4237_s18 = smov 0  }
   0x3 LB: > { %s4252_s19 = sadd.s32 4294967295, %s4200_s18   ;;  %s3133_s20 = sadd.s32 4294967294, %s4200_s18   ;;  %s4200_s18 = sphi %s4237_s18, %s5905_s18   ;;  %s4196_s17 = sphi %s4235_s17, %s5904_s17   ;;  %s4192_s16 = sphi %s4233_s16, %s5903_s16   ;;  %s4188_s15 = sphi %s4231_s15, %s5902_s15  }
   0x4   : > { %s4256_s21 = sadd.s32 1, %s4200_s18   ;;  %s118_s22 = sadd.s32 1, %s4196_s17 }
   0x5   : > { %s115_s23 = ssub.s32 %s4200_s18, %s4256_s21  ;;  %p128_p0 = scmp.ne.s32.totalorder %s4196_s17, %s4192_s16 }
   0x6   : > { %p116_p1 = scmp.eq.s32.totalorder %s115_s23, 0  ;;  %p129_p2 = scmp.eq.s32.totalorder %s4252_s19, 1 }
   0x7   : > { %p134_p3 = scmp.ne.s32.totalorder %s4192_s16, %s4188_s15  ;;  %p135_p4 = scmp.eq.s32.totalorder %s3133_s20, 1 }
   0x8   : > { %s4267_s24 = scalar_select %p116_p1, %s4196_s17, %s118_s22  }
   0x9   : > { %p4269_p5 = por %p129_p2, %p128_p0  ;;  %p4273_p6 = por %p135_p4, %p134_p3 }
   0xa   : > { %p3136_p7 = scmp.ge.s32.totalorder %s4200_s18, 1  ;;  %p175_p8 = scmp.lt.s32.totalorder %s4200_s18, 3 }
   0xc   : > { %p176_p9 = pnand %p3136_p7, %p175_p8 }
   0xd   : > { %v3723_v0 = vld [vmem:[%s5896_s1 + $0x4] ss:$8 sps:$4 sm:$0xff] (!%p176_p9)   ;;  %v3727_v2 = vld [vmem:[%s5896_s1] ss:$8 sps:$4 sm:$0xff] (!%p176_p9)   ;;  %v3729_v4 = vld [vmem:[%s5896_s1 + $0x14] ss:$8 sps:$4 sm:$0xff] (!%p176_p9)  }
   0xe   : > { %179 = sbr.rel (%p176_p9) target bundleno = 792 (0x318), region = 36  ;;  %v3725_v1 = vld [vmem:[%s5896_s1 + $0x204] ss:$8 sps:$4 sm:$0xff] (!%p176_p9)   ;;  %1617 = vmatprep.subr.bf16.mxu1 (!%p176_p9), %v3723_v0  ;;  %v3728_v3 = vld [vmem:[%s5896_s1 + $0x200] ss:$8 sps:$4 sm:$0xff] (!%p176_p9)   ;;  %p206_p10 = scmp.lt.s32.totalorder (!%p176_p9), %s4252_s19, 1 }
   0xf   : > { %2003 = vmatprep.subr.bf16.mxu0 (!%p176_p9), %v3725_v1  ;;  %1618 = vmatpush1.bf16.msra.mxu1 (!%p176_p9), %v3727_v2  ;;  %v3731_v5 = vld [vmem:[%s5896_s1 + $0x214] ss:$8 sps:$4 sm:$0xff] (!%p176_p9)   ;;  %v3733_v6 = vld [vmem:[%s5896_s1 + $0x10] ss:$8 sps:$4 sm:$0xff] (!%p176_p9)   ;;  %v3735_v8 = vld [vmem:[%s5896_s1 + $0x24] ss:$8 sps:$4 sm:$0xff] (!%p176_p9)  }
  0x10   : > { %2004 = vmatpush1.bf16.msra.mxu0 (!%p176_p9), %v3728_v3  ;;  %1619 = vmatprep.subr.bf16.mxu1 (!%p176_p9), %v3729_v4  ;;  %v3734_v7 = vld [vmem:[%s5896_s1 + $0x210] ss:$8 sps:$4 sm:$0xff] (!%p176_p9)   ;;  %v3737_v9 = vld [vmem:[%s5896_s1 + $0x224] ss:$8 sps:$4 sm:$0xff] (!%p176_p9)   ;;  %v3739_v10 = vld [vmem:[%s5896_s1 + $0x20] ss:$8 sps:$4 sm:$0xff] (!%p176_p9)  }
  0x11   : > { %2005 = vmatprep.subr.bf16.mxu0 (!%p176_p9), %v3731_v5  ;;  %v3740_v11 = vld [vmem:[%s5896_s1 + $0x220] ss:$8 sps:$4 sm:$0xff] (!%p176_p9)   ;;  %v3741_v12 = vld [vmem:[%s5896_s1 + $0x34] ss:$8 sps:$4 sm:$0xff] (!%p176_p9)   ;;  %v3745_v14 = vld [vmem:[%s5896_s1 + $0x30] ss:$8 sps:$4 sm:$0xff] (!%p176_p9)  }
  0x12   : > { %v3743_v13 = vld [vmem:[%s5896_s1 + $0x234] ss:$8 sps:$4 sm:$0xff] (!%p176_p9)   ;;  %v3746_v15 = vld [vmem:[%s5896_s1 + $0x230] ss:$8 sps:$4 sm:$0xff] (!%p176_p9)   ;;  %v3747_v16 = vld [vmem:[%s5896_s1 + $0x44] ss:$8 sps:$4 sm:$0xff] (!%p176_p9)  }
  0x13   : > { %1620 = vmatpush1.bf16.msra.mxu1 (!%p176_p9), %v3733_v6  ;;  %v3749_v17 = vld [vmem:[%s5896_s1 + $0x244] ss:$8 sps:$4 sm:$0xff] (!%p176_p9)   ;;  %v3751_v18 = vld [vmem:[%s5896_s1 + $0x40] ss:$8 sps:$4 sm:$0xff] (!%p176_p9)   ;;  %v3753_v20 = vld [vmem:[%s5896_s1 + $0x54] ss:$8 sps:$4 sm:$0xff] (!%p176_p9)  }
  0x14   : > { %2006 = vmatpush1.bf16.msra.mxu0 (!%p176_p9), %v3734_v7  ;;  %1621 = vmatprep.subr.bf16.mxu1 (!%p176_p9), %v3735_v8  ;;  %v3752_v19 = vld [vmem:[%s5896_s1 + $0x240] ss:$8 sps:$4 sm:$0xff] (!%p176_p9)   ;;  %v3755_v21 = vld [vmem:[%s5896_s1 + $0x254] ss:$8 sps:$4 sm:$0xff] (!%p176_p9)   ;;  %v3757_v22 = vld [vmem:[%s5896_s1 + $0x50] ss:$8 sps:$4 sm:$0xff] (!%p176_p9)  }
  0x15   : > { %2007 = vmatprep.subr.bf16.mxu0 %v3737_v9  ;;  %v3758_v23 = vld [vmem:[%s5896_s1 + $0x250] ss:$8 sps:$4 sm:$0xff]   ;;  %v3759_v24 = vld [vmem:[%s5896_s1 + $0x64] ss:$8 sps:$4 sm:$0xff]   ;;  %v3763_v26 = vld [vmem:[%s5896_s1 + $0x60] ss:$8 sps:$4 sm:$0xff]  }
  0x16   : > { %v3761_v25 = vld [vmem:[%s5896_s1 + $0x264] ss:$8 sps:$4 sm:$0xff]   ;;  %v3764_v27 = vld [vmem:[%s5896_s1 + $0x260] ss:$8 sps:$4 sm:$0xff]   ;;  %v3765_v28 = vld [vmem:[%s5896_s1 + $0x74] ss:$8 sps:$4 sm:$0xff]  }
  0x17   : > { %1622 = vmatpush1.bf16.msra.mxu1 %v3739_v10  ;;  %v3767_v29 = vld [vmem:[%s5896_s1 + $0x274] ss:$8 sps:$4 sm:$0xff]   ;;  %v3769_v30 = vld [vmem:[%s5896_s1 + $0x70] ss:$8 sps:$4 sm:$0xff]   ;;  %v3771_v32 = vld [vmem:[%s5896_s1 + $0x84] ss:$8 sps:$4 sm:$0xff]  }
  0x18   : > { %2008 = vmatpush1.bf16.msra.mxu0 %v3740_v11  ;;  %1623 = vmatprep.subr.bf16.mxu1 %v3741_v12  ;;  %v3770_v31 = vld [vmem:[%s5896_s1 + $0x270] ss:$8 sps:$4 sm:$0xff]   ;;  %v3773_v33 = vld [vmem:[%s5896_s1 + $0x284] ss:$8 sps:$4 sm:$0xff]   ;;  %v3775_v34 = vld [vmem:[%s5896_s1 + $0x80] ss:$8 sps:$4 sm:$0xff]  }
  0x19   : > { %2009 = vmatprep.subr.bf16.mxu0 %v3743_v13  ;;  %v3776_v35 = vld [vmem:[%s5896_s1 + $0x280] ss:$8 sps:$4 sm:$0xff]   ;;  %v3777_v36 = vld [vmem:[%s5896_s1 + $0x94] ss:$8 sps:$4 sm:$0xff]   ;;  %s4392_s7 = scalar_select %p206_p10, %s4252_s19, 1  ;;  %vm668_vm1 = vcmask 1046528  }
  0x1a   : > { %v3779_v37 = vld [vmem:[%s5896_s1 + $0x294] ss:$8 sps:$4 sm:$0xff]   ;;  %v3781_v38 = vld [vmem:[%s5896_s1 + $0x90] ss:$8 sps:$4 sm:$0xff]   ;;  %v3783_v40 = vld [vmem:[%s5896_s1 + $0xa4] ss:$8 sps:$4 sm:$0xff]  }
  0x1b   : > { %1624 = vmatpush1.bf16.msra.mxu1 %v3745_v14  ;;  %v3782_v39 = vld [vmem:[%s5896_s1 + $0x290] ss:$8 sps:$4 sm:$0xff]   ;;  %s3680_s22 = smul.u32 216, %s4392_s7  ;;  %v3785_v41 = vld [vmem:[%s5896_s1 + $0x2a4] ss:$8 sps:$4 sm:$0xff]   ;;  %s3326_s28 = sshll.u32 %s4392_s7, 8 }
  0x1c   : > { %2010 = vmatpush1.bf16.msra.mxu0 %v3746_v15  ;;  %1625 = vmatprep.subr.bf16.mxu1 %v3747_v16  ;;  %v3787_v42 = vld [vmem:[%s5896_s1 + $0xa0] ss:$8 sps:$4 sm:$0xff]   ;;  %v3789_v44 = vld [vmem:[%s5896_s1 + $0xb4] ss:$8 sps:$4 sm:$0xff]   ;;  %vm433_vm0 = vsmask.f32 7424 }
  0x1d   : > { %2011 = vmatprep.subr.bf16.mxu0 %v3749_v17  ;;  %v3788_v43 = vld [vmem:[%s5896_s1 + $0x2a0] ss:$8 sps:$4 sm:$0xff]   ;;  %s4422_s11 = scalar_lea.vmem %s5895_s0, %s3680_s22  ;;  %v3791_v45 = vld [vmem:[%s5896_s1 + $0x2b4] ss:$8 sps:$4 sm:$0xff]   ;;  %v3793_v46 = vld [vmem:[%s5896_s1 + $0xb0] ss:$8 sps:$4 sm:$0xff]  }
  0x1e   : > { %v3794_v47 = vld [vmem:[%s5896_s1 + $0x2b0] ss:$8 sps:$4 sm:$0xff]   ;;  %v3795_v48 = vld [vmem:[%s5896_s1 + $0xc4] ss:$8 sps:$4 sm:$0xff]   ;;  %v3799_v58 = vld [vmem:[%s5896_s1 + $0xc0] ss:$8 sps:$4 sm:$0xff]  }
  0x1f   : > { %1626 = vmatpush1.bf16.msra.mxu1 %v3751_v18  ;;  %v3797_v49 = vld [vmem:[%s5896_s1 + $0x2c4] ss:$8 sps:$4 sm:$0xff]   ;;  %v4443_v51 = vld [vmem:[%s4422_s11 + $0x8] ss:$0 sps:$4 sm:$0x11]   ;;  %v4491_v14 = vld [vmem:[%s4422_s11 + $0x18] sm:$0xff]  }
  0x20   : > { %2012 = vmatpush1.bf16.msra.mxu0 %v3752_v19  ;;  %1627 = vmatprep.subr.bf16.mxu1 %v3753_v20  ;;  %v4440_v50 = vld [vmem:[%s4422_s11] sm:$0xff]   ;;  %v4446_v52 = vld [vmem:[%s4422_s11 + $0xc] sm:$0xff]   ;;  %v442_v55 = vshll.u32 %v4443_v51, 16  ;;  %v3822_v56 = vld [vmem:[%s4422_s11 + $0x14] ss:$0 sps:$4 sm:$0x11]  }
  0x21   : > { %2013 = vmatprep.subr.bf16.mxu0 %v3755_v21  ;;  %v435_v53 = vshrl.u32 %v4440_v50, 16  ;;  %v437_v54 = vshll.u32 %v4440_v50, 16  ;;  %v672_v57 = vrot.slane %v4446_v52, 1  ;;  %v3800_v60 = vld [vmem:[%s5896_s1 + $0x2c0] ss:$8 sps:$4 sm:$0xff]   ;;  %v673_v63 = vrot.slane %v3822_v56, 1 }
  0x22   : > { %v3801_v61 = vld [vmem:[%s5896_s1 + $0xd4] ss:$8 sps:$4 sm:$0xff]   ;;  %v444_v62 = vrot.slane %v442_v55, 1  ;;  %v3805_v2 = vld [vmem:[%s5896_s1 + $0xd0] ss:$8 sps:$4 sm:$0xff]   ;;  %v449_v7 = vshll.u32 %v4446_v52, 16 }
  0x23   : > { %1628 = vmatpush1.bf16.msra.mxu1 %v3757_v22  ;;  %v439_v59 = vrot.slane %v437_v54, 1  ;;  %v3803_v0 = vld [vmem:[%s5896_s1 + $0x2d4] ss:$8 sps:$4 sm:$0xff]   ;;  %v4469_v3 = vsel %vm668_vm1, %v672_v57, %v673_v63  ;;  %v3806_v4 = vld [vmem:[%s5896_s1 + $0x2d0] ss:$8 sps:$4 sm:$0xff]   ;;  %v447_v11 = vshrl.u32 %v4446_v52, 16 }
  0x24   : > { %2014 = vmatpush1.bf16.msra.mxu0 %v3758_v23  ;;  %1629 = vmatprep.subr.bf16.mxu1 %v3759_v24  ;;  %v3807_v5 = vld [vmem:[%s5896_s1 + $0xe4] ss:$8 sps:$4 sm:$0xff]   ;;  %v3811_v9 = vld [vmem:[%s5896_s1 + $0xe0] ss:$8 sps:$4 sm:$0xff]   ;;  %v451_v12 = vrot.slane %v449_v7, 1  ;;  %v454_v13 = vshll.u32 %v3822_v56, 16 }
  0x25   : > { %2015 = vmatprep.subr.bf16.mxu0 %v3761_v25  ;;  %v440_v1 = vor.u32 %v439_v59, %v435_v53  ;;  %2035 = vmatprep.mubr.bf16.mxu0 %v4469_v3  ;;  %v3809_v8 = vld [vmem:[%s5896_s1 + $0x2e4] ss:$8 sps:$4 sm:$0xff]   ;;  %v3812_v10 = vld [vmem:[%s5896_s1 + $0x2e0] ss:$8 sps:$4 sm:$0xff]   ;;  %v3813_v15 = vld [vmem:[%s5896_s1 + $0xf4] ss:$8 sps:$4 sm:$0xff]  }
  0x26   : > { %v3815_v16 = vld [vmem:[%s5896_s1 + $0x2f4] ss:$8 sps:$4 sm:$0xff]   ;;  %v670_v17 = vrot.slane %v4443_v51, 1  ;;  %v3817_v18 = vld [vmem:[%s5896_s1 + $0xf0] ss:$8 sps:$4 sm:$0xff]   ;;  %v452_v22 = vor.u32 %v451_v12, %v447_v11  ;;  %v456_v23 = vrot.slane %v454_v13, 1 }
  0x27   : > { %1630 = vmatpush1.bf16.msra.mxu1 %v3763_v26  ;;  %v445_v6 = vsel %vm433_vm0, %v440_v1, %v444_v62  ;;  %v3818_v19 = vld [vmem:[%s5896_s1 + $0x2f0] ss:$8 sps:$4 sm:$0xff]   ;;  %v3825_v20 = vld [vmem:[%s5896_s1 + $0x104] ss:$8 sps:$4 sm:$0xff]   ;;  %v461_v25 = vshll.u32 %v4491_v14, 16  ;;  %v669_v26 = vrot.slane %v4440_v50, 1 }
  0x28   : > { %2016 = vmatpush1.bf16.msra.mxu0 %v3764_v27  ;;  %1631 = vmatprep.subr.bf16.mxu1 %v3765_v28  ;;  %v3833_v21 = vld [vmem:[%s4422_s11 + $0x20] ss:$0 sps:$4 sm:$0x11]   ;;  %v3828_v24 = vld [vmem:[%s5896_s1 + $0x304] ss:$8 sps:$4 sm:$0xff]   ;;  %v4564_v56 = vld [vmem:[%s4422_s11 + $0x30] sm:$0xff]  }
  0x29   : > { %2017 = vmatprep.subr.bf16.mxu0 %v3767_v29  ;;  %1649 = vmatprep.mubr.bf16.mxu1 %v445_v6  ;;  %v3823_v27 = vld [vmem:[%s5896_s1 + $0x100] ss:$8 sps:$4 sm:$0xff]   ;;  %v4522_v29 = vsel %vm668_vm1, %v669_v26, %v670_v17  ;;  %v3842_v57 = vld [vmem:[%s5896_s1 + $0x334] ss:$8 sps:$4 sm:$0xff]   ;;  %v3840_v62 = vld [vmem:[%s5896_s1 + $0x330] ss:$8 sps:$4 sm:$0xff]  }
  0x2a   : > { %v3826_v28 = vld [vmem:[%s5896_s1 + $0x300] ss:$8 sps:$4 sm:$0xff]   ;;  %v3850_v1 = vld [vmem:[%s5896_s1 + $0x344] ss:$8 sps:$4 sm:$0xff]   ;;  %v3853_v7 = vld [vmem:[%s5896_s1 + $0x354] ss:$8 sps:$4 sm:$0xff]  }
  0x2b   : > { %1632 = vmatpush1.bf16.msra.mxu1 %v3769_v30  ;;  %v675_v30 = vrot.slane %v4491_v14, 1  ;;  %v3848_v6 = vld [vmem:[%s5896_s1 + $0x340] ss:$8 sps:$4 sm:$0xff]   ;;  %v3866_v13 = vld [vmem:[%s4422_s11 + $0x44] ss:$0 sps:$4 sm:$0x11]  }
  0x2c   : > { %2018 = vmatpush1.bf16.msra.mxu0 %v3770_v31  ;;  %1633 = vmatprep.subr.bf16.mxu1 %v3771_v32  ;;  %v676_v31 = vrot.slane %v3833_v21, 1  ;;  %v459_v32 = vshrl.u32 %v4491_v14, 16  ;;  %v4605_v12 = vld [vmem:[%s4422_s11 + $0x3c] sm:$0xff]   ;;  %v685_v26 = vrot.slane %v3866_v13, 1  ;;  %s203_s29 = sand.u32 1, %s4192_s16   ;;  %s3327_s8 = sshll.u32 %s4252_s19, 12 }
  0x2d   : > { %2019 = vmatprep.subr.bf16.mxu0 %v3773_v33  ;;  %v466_v33 = vshll.u32 %v3833_v21, 16  ;;  %v3867_v17 = vld [vmem:[%s5896_s1 + $0x140] ss:$8 sps:$4 sm:$0xff]   ;;  %v497_v21 = vshll.u32 %v4605_v12, 16  ;;  %s3137_s6 = sshll.u32 %s203_s29, 8  ;;  %s5830_s13 = scalar_lea.hbm %s5899_s4, %s3327_s8 }
  0x2e   : > { %s5722_s7 = scalar_lea.vmem [#allocation2], %s3137_s6  ;;  %s5854_s19 = scalar_lea.sflag [#allocation3], %s203_s29 }
  0x2f   : > { %1634 = vmatpush1.bf16.msra.mxu1 %v3775_v34  ;;  %v457_v34 = vsel %vm433_vm0, %v452_v22, %v456_v23  ;;  %v3880_v22 = vld [vmem:[%s5896_s1 + $0x154] ss:$8 sps:$4 sm:$0xff]   ;;  %v3861_v23 = vld [vmem:[%s5896_s1 + $0x364] ss:$8 sps:$4 sm:$0xff]   ;;  %s3059_s9 = sshll.u32 %s5722_s7, 4  ;;  %s4203_s20 = smov [#allocation2]   ;;  %s5834_s9 = int_to_ptr.vmem [resolvable:$true] %s3059_s9 }
  0x30   : > { %2020 = vmatpush1.bf16.msra.mxu0 %v3776_v35  ;;  %1635 = vmatprep.subr.bf16.mxu1 %v3777_v36  ;;  %v463_v35 = vrot.slane %v461_v25, 1  ;;  %v4528_v36 = vld [vmem:[%s4422_s11 + $0x24] sm:$0xff]   ;;  %v684_v25 = vrot.slane %v4605_v12, 1  ;;  %s4138_s14 = scalar_lea.vmem %s5834_s9, 4096  ;;  %s4142_s23 = sshll.u32 %s4203_s20, 4  ;;  %s4143_s23 = int_to_ptr.vmem [resolvable:$false] %s4142_s23 }
  0x31   : > { %2021 = vmatprep.subr.bf16.mxu0 %v3779_v37  ;;  %v3831_v37 = vld [vmem:[%s5896_s1 + $0x314] ss:$8 sps:$4 sm:$0xff]   ;;  %v471_v53 = vshrl.u32 %v4528_v36, 16  ;;  %p4139_p11 = scmp.ne.s32.totalorder %s5834_s9, %s4138_s14  ;;  %s4144_s27 = scalar_lea.vmem %s4143_s23, 8192 }
  0x32   : > { %p4145_p0 = scmp.lt.s32.totalorder %s5834_s9, %s4143_s23  ;;  %p4146_p1 = scmp.lt.s32.totalorder %s4144_s27, %s4138_s14 }
  0x33   : > { %1636 = vmatpush1.bf16.msra.mxu1 %v3781_v38  ;;  %v3836_v38 = vld [vmem:[%s5896_s1 + $0x114] ss:$8 sps:$4 sm:$0xff]   ;;  %p4140_p12 = pnand %p4139_p11, %p4269_p5 }
  0x34   : > { %2022 = vmatpush1.bf16.msra.mxu0 %v3782_v39  ;;  %1637 = vmatprep.subr.bf16.mxu1 %v3783_v40  ;;  %v3844_v39 = vld [vmem:[%s4422_s11 + $0x2c] ss:$0 sps:$4 sm:$0x11]   ;;  %v3829_v40 = vld [vmem:[%s5896_s1 + $0x310] ss:$8 sps:$4 sm:$0xff]   ;;  %p4147_p2 = por %p4146_p1, %p4145_p0 }
  0x35   : > { %2023 = vmatprep.subr.bf16.mxu0 %v3785_v41  ;;  %v4542_v41 = vsel %vm668_vm1, %v675_v30, %v676_v31  ;;  %v478_v55 = vshll.u32 %v3844_v39, 16  ;;  %v499_v31 = vrot.slane %v497_v21, 1  ;;  %v3919_v21 = vld [vmem:[%s5896_s1 + $0x194] ss:$8 sps:$4 sm:$0xff]   ;;  %p4141_p13 = pneg %p4140_p12 }
  0x37   : > { %1638 = vmatpush1.bf16.msra.mxu1 %v3787_v42  ;;  %v3834_v42 = vld [vmem:[%s5896_s1 + $0x110] ss:$8 sps:$4 sm:$0xff]   ;;  %p4148_p3 = pnand %p4147_p2, %p4141_p13 }
  0x38   : > { %2024 = vmatpush1.bf16.msra.mxu0 %v3788_v43  ;;  %1639 = vmatprep.subr.bf16.mxu1 %v3789_v44  ;;  %v464_v43 = vor.u32 %v463_v35, %v459_v32  ;;  %v468_v44 = vrot.slane %v466_v33, 1  ;;  %v502_v32 = vshll.u32 %v3866_v13, 16  ;;  %v4643_v33 = vld [vmem:[%s4422_s11 + $0x48] sm:$0xff]   ;;  %v4647_v35 = vsel %vm668_vm1, %v684_v25, %v685_v26 }
  0x39   : > { %2025 = vmatprep.subr.bf16.mxu0 %v3791_v45  ;;  %v3839_v45 = vld [vmem:[%s5896_s1 + $0x324] ss:$8 sps:$4 sm:$0xff]  }
  0x3a   : > { %v4560_v51 = vsel %vm433_vm0, %v464_v43, %v468_v44  ;;  %v509_v43 = vshll.u32 %v4643_v33, 16  ;;  %v3872_v44 = vld [vmem:[%s5896_s1 + $0x384] ss:$8 sps:$4 sm:$0xff]  }
  0x3b   : > { %1640 = vmatpush1.bf16.msra.mxu1 %v3793_v46  ;;  %v473_v46 = vshll.u32 %v4528_v36, 16  ;;  %v3894_v26 = vld [vmem:[%s5896_s1 + $0x3c4] ss:$8 sps:$4 sm:$0xff]  }
  0x3c   : > { %2026 = vmatpush1.bf16.msra.mxu0 %v3794_v47  ;;  %1641 = vmatprep.subr.bf16.mxu1 %v3795_v48  ;;  %v3847_v47 = vld [vmem:[%s5896_s1 + $0x124] ss:$8 sps:$4 sm:$0xff]   ;;  %v3837_v48 = vld [vmem:[%s5896_s1 + $0x320] ss:$8 sps:$4 sm:$0xff]  }
  0x3d   : > { %2027 = vmatprep.subr.bf16.mxu0 %v3797_v49  ;;  %v678_v49 = vrot.slane %v4528_v36, 1  ;;  %v475_v54 = vrot.slane %v473_v46, 1 }
  0x3f   : > { %1642 = vmatpush1.bf16.msra.mxu1 %v3799_v58  ;;  %v3845_v58 = vld [vmem:[%s5896_s1 + $0x120] ss:$8 sps:$4 sm:$0xff]   ;;  %v476_v63 = vor.u32 %v475_v54, %v471_v53  ;;  %v4675_v53 = vld [vmem:[%s4422_s11 + $0x54] sm:$0xff]  }
  0x40   : > { %2028 = vmatpush1.bf16.msra.mxu0 %v3800_v60  ;;  %1643 = vmatprep.subr.bf16.mxu1 %v3801_v61  ;;  %v3855_v60 = vld [vmem:[%s4422_s11 + $0x38] ss:$0 sps:$4 sm:$0x11]   ;;  %v3858_v61 = vld [vmem:[%s5896_s1 + $0x134] ss:$8 sps:$4 sm:$0xff]  }
  0x41   : > { %2029 = vmatprep.subr.bf16.mxu0 %v3803_v0  ;;  %v480_v0 = vrot.slane %v478_v55, 1  ;;  %v490_v11 = vshll.u32 %v3855_v60, 16  ;;  %v511_v55 = vrot.slane %v509_v43, 1  ;;  %v3924_v43 = vld [vmem:[%s5896_s1 + $0x1a4] ss:$8 sps:$4 sm:$0xff]  }
  0x43   : > { %1644 = vmatpush1.bf16.msra.mxu1 %v3805_v2  ;;  %v681_v2 = vrot.slane %v4564_v56, 1 }
  0x44   : > { %2030 = vmatpush1.bf16.msra.mxu0 %v3806_v4  ;;  %1645 = vmatprep.subr.bf16.mxu1 %v3807_v5  ;;  %v682_v4 = vrot.slane %v3855_v60, 1  ;;  %v3856_v5 = vld [vmem:[%s5896_s1 + $0x130] ss:$8 sps:$4 sm:$0xff]  }
  0x45   : > { %2031 = vmatprep.subr.bf16.mxu0 %v3809_v8  ;;  %v4601_v8 = vsel %vm433_vm0, %v476_v63, %v480_v0  ;;  %v3873_v60 = vld [vmem:[%s5896_s1 + $0x390] ss:$8 sps:$4 sm:$0xff]  }
  0x46   : > { %v3900_v63 = vld [vmem:[%s5896_s1 + $0x170] ss:$8 sps:$4 sm:$0xff]  }
  0x47   : > { %1646 = vmatpush1.bf16.msra.mxu1 %v3811_v9  ;;  %v483_v9 = vshrl.u32 %v4564_v56, 16 }
  0x48   : > { %2032 = vmatpush1.bf16.msra.mxu0 %v3812_v10  ;;  %1647 = vmatprep.subr.bf16.mxu1 %v3813_v15  ;;  %v3851_v15 = vld [vmem:[%s5896_s1 + $0x350] ss:$8 sps:$4 sm:$0xff]  }
  0x49   : > { %2033 = vmatprep.subr.bf16.mxu0 %v3815_v16  ;;  %v4612_v16 = vsel %vm668_vm1, %v681_v2, %v682_v4  ;;  %v521_v2 = vshll.u32 %v4675_v53, 16  ;;  %v3911_v4 = vld [vmem:[%s5896_s1 + $0x184] ss:$8 sps:$4 sm:$0xff]  }
  0x4b   : > { %1648 = vmatpush1.bf16.msra.mxu1 %v3817_v18  ;;  %v3869_v18 = vld [vmem:[%s5896_s1 + $0x144] ss:$8 sps:$4 sm:$0xff]   ;;  %v523_v13 = vrot.slane %v521_v2, 1  ;;  %v3930_v2 = vld [vmem:[%s5896_s1 + $0x1b0] ss:$8 sps:$4 sm:$0xff]  }
  0x4c   : > { %2034 = vmatpush1.bf16.msra.mxu0 %v3818_v19  ;;  %1810 = vmatprep.subr.bf16.mxu1 %v3825_v20  ;;  %v492_v20 = vrot.slane %v490_v11, 1  ;;  %v519_v11 = vshrl.u32 %v4675_v53, 16 }
  0x4d   : > { %2196 = vmatprep.subr.bf16.mxu0 %v3828_v24  ;;  %v3859_v24 = vld [vmem:[%s5896_s1 + $0x360] ss:$8 sps:$4 sm:$0xff]  }
  0x4e   : > { %1650 = vmatmul.mubr.bf16.vlgmr.msra.gmra.mrb[0].mxu1 %v4440_v50  ;;  %v679_v50 = vrot.slane %v3844_v39, 1  ;;  %v3862_v39 = vld [vmem:[%s5896_s1 + $0x370] ss:$8 sps:$4 sm:$0xff]  }
  0x4f   : > { %2036 = vmatmul.mubr.bf16.vlgmr.msra.gmra.mrb[0].mxu0 %v457_v34  ;;  %1811 = vmatpush1.bf16.msra.mxu1 %v3823_v27  ;;  %v3864_v27 = vld [vmem:[%s5896_s1 + $0x374] ss:$8 sps:$4 sm:$0xff]  }
  0x50   : > { %2197 = vmatpush1.bf16.msra.mxu0 %v3826_v28  ;;  %1659 = vmatprep.mubr.bf16.mxu1 %v457_v34  ;;  %v4573_v59 = vsel %vm668_vm1, %v678_v49, %v679_v50  ;;  %v495_v28 = vshrl.u32 %v4605_v12, 16  ;;  %v3877_v34 = vld [vmem:[%s4422_s11 + $0x50] ss:$0 sps:$4 sm:$0x11]   ;;  %v507_v49 = vshrl.u32 %v4643_v33, 16 }
  0x51   : > { %2198 = vmatprep.subr.bf16.mxu0 %v3831_v37  ;;  %2045 = vmatprep.mubr.bf16.mxu0 %v4542_v41  ;;  %v3878_v37 = vld [vmem:[%s5896_s1 + $0x150] ss:$8 sps:$4 sm:$0xff]   ;;  %v688_v46 = vrot.slane %v3877_v34, 1  ;;  %v514_v50 = vshll.u32 %v3877_v34, 16 }
  0x52   : > { %1812 = vmatprep.subr.bf16.mxu1 %v3836_v38  ;;  %v3891_v38 = vld [vmem:[%s5896_s1 + $0x164] ss:$8 sps:$4 sm:$0xff]   ;;  %v512_v0 = vor.u32 %v511_v55, %v507_v49  ;;  %v3932_v55 = vld [vmem:[%s5896_s1 + $0x1b4] ss:$8 sps:$4 sm:$0xff]  }
  0x53   : > { %1813 = vmatpush1.bf16.msra.mxu1 %v3834_v42  ;;  %v504_v42 = vrot.slane %v502_v32, 1 }
  0x54   : > { %2199 = vmatpush1.bf16.msra.mxu0 %v3829_v40  ;;  %1814 = vmatprep.subr.bf16.mxu1 %v3847_v47  ;;  %v500_v40 = vor.u32 %v499_v31, %v495_v28  ;;  %v3889_v47 = vld [vmem:[%s5896_s1 + $0x160] ss:$8 sps:$4 sm:$0xff]   ;;  %v3917_v31 = vld [vmem:[%s5896_s1 + $0x190] ss:$8 sps:$4 sm:$0xff]  }
  0x55   : > { %2200 = vmatprep.subr.bf16.mxu0 %v3839_v45  ;;  %v687_v45 = vrot.slane %v4643_v33, 1 }
  0x56   : > { %1660 = vmatmul.mubr.bf16.gmra.mrb[4].mxu1 %v4446_v52  ;;  %v485_v52 = vshll.u32 %v4564_v56, 16  ;;  %v4678_v54 = vsel %vm433_vm0, %v500_v40, %v504_v42  ;;  %v3897_v40 = vld [vmem:[%s5896_s1 + $0x3d4] ss:$8 sps:$4 sm:$0xff]   ;;  %v4757_v42 = vld [vmem:[%s4422_s11 + $0x6c] sm:$0xff]  }
  0x57   : > { %2046 = vmatmul.mubr.bf16.gmra.mrb[4].mxu0 %v4560_v51  ;;  %1669 = vmatprep.mubr.bf16.mxu1 %v4560_v51 }
  0x58   : > { %2201 = vmatpush1.bf16.msra.mxu0 %v3837_v48  ;;  %2055 = vmatprep.mubr.bf16.mxu0 %v4573_v59  ;;  %v487_v10 = vrot.slane %v485_v52, 1  ;;  %v3870_v48 = vld [vmem:[%s5896_s1 + $0x380] ss:$8 sps:$4 sm:$0xff]   ;;  %v3883_v52 = vld [vmem:[%s5896_s1 + $0x3a4] ss:$8 sps:$4 sm:$0xff]  }
  0x59   : > { %2202 = vmatprep.subr.bf16.mxu0 %v3842_v57  ;;  %1815 = vmatpush1.bf16.msra.mxu1 %v3845_v58  ;;  %v3888_v57 = vld [vmem:[%s4422_s11 + $0x5c] ss:$0 sps:$4 sm:$0x11]  }
  0x5a   : > { %1816 = vmatprep.subr.bf16.mxu1 %v3858_v61  ;;  %v488_v19 = vor.u32 %v487_v10, %v483_v9  ;;  %v3875_v58 = vld [vmem:[%s5896_s1 + $0x394] ss:$8 sps:$4 sm:$0xff]   ;;  %v4688_v61 = vsel %vm668_vm1, %v687_v45, %v688_v46 }
  0x5b   : > { %v3886_v9 = vld [vmem:[%s5896_s1 + $0x3b4] ss:$8 sps:$4 sm:$0xff]  }
  0x5c   : > { %2203 = vmatpush1.bf16.msra.mxu0 %v3840_v62  ;;  %v4640_v30 = vsel %vm433_vm0, %v488_v19, %v492_v20  ;;  %v3902_v62 = vld [vmem:[%s5896_s1 + $0x174] ss:$8 sps:$4 sm:$0xff]   ;;  %v3909_v19 = vld [vmem:[%s5896_s1 + $0x180] ss:$8 sps:$4 sm:$0xff]  }
  0x5d   : > { %2204 = vmatprep.subr.bf16.mxu0 %v3850_v1  ;;  %1817 = vmatpush1.bf16.msra.mxu1 %v3856_v5  ;;  %v516_v1 = vrot.slane %v514_v50, 1  ;;  %v3881_v5 = vld [vmem:[%s5896_s1 + $0x3a0] ss:$8 sps:$4 sm:$0xff]   ;;  %v4778_v50 = vld [vmem:[%s4422_s11 + $0x74] ss:$0 sps:$4 sm:$0x11]  }
  0x5e   : > { %1670 = vmatmul.mubr.bf16.gmra.mrb[8].mxu1 %v4491_v14  ;;  %1818 = vmatprep.subr.bf16.mxu1 %v3869_v18  ;;  %v3899_v18 = vld [vmem:[%s4422_s11 + $0x68] ss:$0 sps:$4 sm:$0x11]  }
  0x5f   : > { %2056 = vmatmul.mubr.bf16.gmra.mrb[8].mxu0 %v4601_v8  ;;  %1679 = vmatprep.mubr.bf16.mxu1 %v4601_v8  ;;  %v4715_v10 = vsel %vm433_vm0, %v512_v0, %v516_v1  ;;  %v694_v28 = vrot.slane %v3899_v18, 1  ;;  %v538_v32 = vshll.u32 %v3899_v18, 16  ;;  %v543_v0 = vshrl.u32 %v4757_v42, 16  ;;  %v3912_v18 = vld [vmem:[%s5896_s1 + $0x400] ss:$8 sps:$4 sm:$0xff]  }
  0x60   : > { %2205 = vmatpush1.bf16.msra.mxu0 %v3848_v6  ;;  %2065 = vmatprep.mubr.bf16.mxu0 %v4612_v16  ;;  %v690_v6 = vrot.slane %v4675_v53, 1 }
  0x61   : > { %2206 = vmatprep.subr.bf16.mxu0 %v3853_v7  ;;  %1819 = vmatpush1.bf16.msra.mxu1 %v3867_v17  ;;  %v691_v7 = vrot.slane %v3888_v57, 1  ;;  %v4719_v17 = vld [vmem:[%s4422_s11 + $0x60] sm:$0xff]   ;;  %v540_v46 = vrot.slane %v538_v32, 1 }
  0x62   : > { %1820 = vmatprep.subr.bf16.mxu1 %v3880_v22  ;;  %v3884_v22 = vld [vmem:[%s5896_s1 + $0x3b0] ss:$8 sps:$4 sm:$0xff]   ;;  %v533_v25 = vshll.u32 %v4719_v17, 16 }
  0x63   : > { %v4726_v20 = vsel %vm668_vm1, %v690_v6, %v691_v7  ;;  %v4812_v6 = vld [vmem:[%s4422_s11 + $0x80] ss:$0 sps:$4 sm:$0x11]  }
  0x64   : > { %2207 = vmatpush1.bf16.msra.mxu0 %v3851_v15  ;;  %v526_v15 = vshll.u32 %v3888_v57, 16  ;;  %v545_v57 = vshll.u32 %v4757_v42, 16 }
  0x65   : > { %2208 = vmatprep.subr.bf16.mxu0 %v3861_v23  ;;  %1821 = vmatpush1.bf16.msra.mxu1 %v3878_v37  ;;  %v524_v23 = vor.u32 %v523_v13, %v519_v11  ;;  %v3892_v37 = vld [vmem:[%s5896_s1 + $0x3c0] ss:$8 sps:$4 sm:$0xff]  }
  0x66   : > { %1680 = vmatmul.mubr.bf16.gmra.mrb[12].mxu1 %v4528_v36  ;;  %1822 = vmatprep.subr.bf16.mxu1 %v3891_v38  ;;  %v531_v38 = vshrl.u32 %v4719_v17, 16  ;;  %v547_v1 = vrot.slane %v545_v57, 1  ;;  %v4884_v57 = vld [vmem:[%s4422_s11 + $0x98] ss:$0 sps:$4 sm:$0x11]  }
  0x67   : > { %2066 = vmatmul.mubr.bf16.gmra.mrb[12].mxu0 %v4640_v30  ;;  %1689 = vmatprep.mubr.bf16.mxu1 %v4640_v30 }
  0x68   : > { %2209 = vmatpush1.bf16.msra.mxu0 %v3859_v24  ;;  %2075 = vmatprep.mubr.bf16.mxu0 %v4647_v35  ;;  %v528_v24 = vrot.slane %v526_v15, 1  ;;  %v548_v11 = vor.u32 %v547_v1, %v543_v0  ;;  %v3935_v15 = vld [vmem:[%s5896_s1 + $0x1c0] ss:$8 sps:$4 sm:$0xff]   ;;  %v3951_v1 = vld [vmem:[%s5896_s1 + $0x430] ss:$8 sps:$4 sm:$0xff]  }
  0x69   : > { %2210 = vmatprep.subr.bf16.mxu0 %v3864_v27  ;;  %1823 = vmatpush1.bf16.msra.mxu1 %v3889_v47  ;;  %v693_v27 = vrot.slane %v4719_v17, 1  ;;  %v3905_v47 = vld [vmem:[%s5896_s1 + $0x3e4] ss:$8 sps:$4 sm:$0xff]  }
  0x6a   : > { %1824 = vmatprep.subr.bf16.mxu1 %v3902_v62  ;;  %v4747_v34 = vsel %vm433_vm0, %v524_v23, %v528_v24  ;;  %v3908_v62 = vld [vmem:[%s5896_s1 + $0x3f4] ss:$8 sps:$4 sm:$0xff]   ;;  %v4831_v23 = vld [vmem:[%s4422_s11 + $0x84] sm:$0xff]  }
  0x6b   : > { %v4766_v45 = vsel %vm668_vm1, %v693_v27, %v694_v28  ;;  %v4845_v27 = vld [vmem:[%s4422_s11 + $0x8c] ss:$0 sps:$4 sm:$0x11]   ;;  %v3943_v28 = vld [vmem:[%s5896_s1 + $0x1d0] ss:$8 sps:$4 sm:$0xff]   ;;  %v569_v32 = vshll.u32 %v4831_v23, 16 }
  0x6c   : > { %2211 = vmatpush1.bf16.msra.mxu0 %v3862_v39  ;;  %v535_v39 = vrot.slane %v533_v25, 1  ;;  %v3925_v25 = vld [vmem:[%s5896_s1 + $0x410] ss:$8 sps:$4 sm:$0xff]  }
  0x6d   : > { %2212 = vmatprep.subr.bf16.mxu0 %v3872_v44  ;;  %1825 = vmatpush1.bf16.msra.mxu1 %v3900_v63  ;;  %v3895_v44 = vld [vmem:[%s5896_s1 + $0x3d0] ss:$8 sps:$4 sm:$0xff]  }
  0x6e   : > { %1690 = vmatmul.mubr.bf16.gmra.mrb[16].mxu1 %v4564_v56  ;;  %1826 = vmatprep.subr.bf16.mxu1 %v3911_v4  ;;  %v536_v49 = vor.u32 %v535_v39, %v531_v38  ;;  %v4795_v63 = vld [vmem:[%s4422_s11 + $0x78] sm:$0xff]   ;;  %v3940_v39 = vld [vmem:[%s5896_s1 + $0x424] ss:$8 sps:$4 sm:$0xff]  }
  0x6f   : > { %2076 = vmatmul.mubr.bf16.gmra.mrb[16].mxu0 %v4678_v54  ;;  %1699 = vmatprep.mubr.bf16.mxu1 %v4678_v54  ;;  %v3906_v4 = vld [vmem:[%s5896_s1 + $0x3f0] ss:$8 sps:$4 sm:$0xff]   ;;  %v557_v7 = vshll.u32 %v4795_v63, 16 }
  0x70   : > { %2213 = vmatpush1.bf16.msra.mxu0 %v3870_v48  ;;  %2085 = vmatprep.mubr.bf16.mxu0 %v4688_v61  ;;  %v3922_v48 = vld [vmem:[%s5896_s1 + $0x1a0] ss:$8 sps:$4 sm:$0xff]  }
  0x71   : > { %2214 = vmatprep.subr.bf16.mxu0 %v3875_v58  ;;  %1827 = vmatpush1.bf16.msra.mxu1 %v3909_v19  ;;  %v3903_v58 = vld [vmem:[%s5896_s1 + $0x3e0] ss:$8 sps:$4 sm:$0xff]   ;;  %v555_v19 = vshrl.u32 %v4795_v63, 16 }
  0x72   : > { %1828 = vmatprep.subr.bf16.mxu1 %v3919_v21  ;;  %v562_v21 = vshll.u32 %v4812_v6, 16 }
  0x74   : > { %2215 = vmatpush1.bf16.msra.mxu0 %v3873_v60  ;;  %v4789_v60 = vsel %vm433_vm0, %v536_v49, %v540_v46  ;;  %v571_v46 = vrot.slane %v569_v32, 1  ;;  %v3953_v49 = vld [vmem:[%s5896_s1 + $0x434] ss:$8 sps:$4 sm:$0xff]   ;;  %v4933_v32 = vld [vmem:[%s4422_s11 + $0xa8] sm:$0xff]  }
  0x75   : > { %2216 = vmatprep.subr.bf16.mxu0 %v3883_v52  ;;  %1829 = vmatpush1.bf16.msra.mxu1 %v3917_v31  ;;  %v550_v52 = vshll.u32 %v4778_v50, 16  ;;  %v564_v31 = vrot.slane %v562_v21, 1 }
  0x76   : > { %1700 = vmatmul.mubr.bf16.gmra.mrb[20].mxu1 %v4605_v12  ;;  %1830 = vmatprep.subr.bf16.mxu1 %v3924_v43  ;;  %v574_v43 = vshll.u32 %v4845_v27, 16 }
  0x77   : > { %2086 = vmatmul.mubr.bf16.gmra.mrb[20].mxu0 %v4715_v10  ;;  %1709 = vmatprep.mubr.bf16.mxu1 %v4715_v10  ;;  %v552_v13 = vrot.slane %v550_v52, 1  ;;  %v3956_v52 = vld [vmem:[%s5896_s1 + $0x1f0] ss:$8 sps:$4 sm:$0xff]  }
  0x78   : > { %2217 = vmatpush1.bf16.msra.mxu0 %v3881_v5  ;;  %2095 = vmatprep.mubr.bf16.mxu0 %v4726_v20  ;;  %v3937_v5 = vld [vmem:[%s5896_s1 + $0x1c4] ss:$8 sps:$4 sm:$0xff]  }
  0x79   : > { %2218 = vmatprep.subr.bf16.mxu0 %v3886_v9  ;;  %1831 = vmatpush1.bf16.msra.mxu1 %v3922_v48  ;;  %v3914_v9 = vld [vmem:[%s5896_s1 + $0x404] ss:$8 sps:$4 sm:$0xff]   ;;  %v4834_v24 = vsel %vm433_vm0, %v548_v11, %v552_v13  ;;  %v3948_v48 = vld [vmem:[%s5896_s1 + $0x1e0] ss:$8 sps:$4 sm:$0xff]  }
  0x7a   : > { %1832 = vmatprep.subr.bf16.mxu1 %v3932_v55  ;;  %v3958_v55 = vld [vmem:[%s5896_s1 + $0x1f4] ss:$8 sps:$4 sm:$0xff]   ;;  %v3959_v11 = vld [vmem:[%s5896_s1 + $0x440] ss:$8 sps:$4 sm:$0xff]   ;;  %v4105_v13 = vld [vmem:[%s5896_s1 + $0x204] ss:$8 sps:$4 sm:$0xff]  }
  0x7c   : > { %2219 = vmatpush1.bf16.msra.mxu0 %v3884_v22  ;;  %v3927_v22 = vld [vmem:[%s5896_s1 + $0x414] ss:$8 sps:$4 sm:$0xff]  }
  0x7d   : > { %2220 = vmatprep.subr.bf16.mxu0 %v3894_v26  ;;  %1833 = vmatpush1.bf16.msra.mxu1 %v3930_v2  ;;  %v3945_v26 = vld [vmem:[%s5896_s1 + $0x1d4] ss:$8 sps:$4 sm:$0xff]   ;;  %v586_v2 = vshll.u32 %v4884_v57, 16 }
  0x7e   : > { %1710 = vmatmul.mubr.bf16.gmra.mrb[24].mxu1 %v4643_v33  ;;  %1834 = vmatprep.subr.bf16.mxu1 %v3937_v5 }
  0x7f   : > { %2096 = vmatmul.mubr.bf16.gmra.mrb[24].mxu0 %v4747_v34  ;;  %1719 = vmatprep.mubr.bf16.mxu1 %v4747_v34 }
  0x80   : > { %2221 = vmatpush1.bf16.msra.mxu0 %v3892_v37  ;;  %2105 = vmatprep.mubr.bf16.mxu0 %v4766_v45  ;;  %v3950_v37 = vld [vmem:[%s5896_s1 + $0x1e4] ss:$8 sps:$4 sm:$0xff]  }
  0x81   : > { %2222 = vmatprep.subr.bf16.mxu0 %v3897_v40  ;;  %1835 = vmatpush1.bf16.msra.mxu1 %v3935_v15  ;;  %v567_v40 = vshrl.u32 %v4831_v23, 16  ;;  %v3964_v15 = vld [vmem:[%s5896_s1 + $0x454] ss:$8 sps:$4 sm:$0xff]  }
  0x82   : > { %1836 = vmatprep.subr.bf16.mxu1 %v3945_v26 }
  0x84   : > { %2223 = vmatpush1.bf16.msra.mxu0 %v3895_v44 }
  0x85   : > { %2224 = vmatprep.subr.bf16.mxu0 %v3905_v47  ;;  %1837 = vmatpush1.bf16.msra.mxu1 %v3943_v28  ;;  %v3938_v47 = vld [vmem:[%s5896_s1 + $0x420] ss:$8 sps:$4 sm:$0xff]  }
  0x86   : > { %1720 = vmatmul.mubr.bf16.gmra.mrb[28].mxu1 %v4675_v53  ;;  %1838 = vmatprep.subr.bf16.mxu1 %v3950_v37  ;;  %v3965_v37 = vld [vmem:[%s5896_s1 + $0x460] ss:$8 sps:$4 sm:$0xff]  }
  0x87   : > { %2106 = vmatmul.mubr.bf16.gmra.mrb[28].mxu0 %v4789_v60  ;;  %1729 = vmatprep.mubr.bf16.mxu1 %v4789_v60 }
  0x88   : > { %2225 = vmatpush1.bf16.msra.mxu0 %v3903_v58  ;;  %2228 = vmatprep.mubr.bf16.mxu0 %v4560_v51  ;;  %v559_v51 = vrot.slane %v557_v7, 1  ;;  %v572_v58 = vor.u32 %v571_v46, %v567_v40  ;;  %v605_v46 = vshll.u32 %v4933_v32, 16 }
  0x89   : > { %2226 = vmatprep.subr.bf16.mxu0 %v3908_v62  ;;  %v576_v62 = vrot.slane %v574_v43, 1  ;;  %1839 = vmatpush1.bf16.msra.mxu1 %v3948_v48 }
  0x8a   : > { %v560_v38 = vor.u32 %v559_v51, %v555_v19  ;;  %1840 = vmatprep.subr.bf16.mxu1 %v3958_v55  ;;  %v4918_v51 = vld [vmem:[%s4422_s11 + $0xa4] ss:$0 sps:$4 sm:$0x11]   ;;  %v607_v55 = vrot.slane %v605_v46, 1 }
  0x8c   : > { %2227 = vmatpush1.bf16.msra.mxu0 %v3906_v4  ;;  %v4862_v44 = vsel %vm433_vm0, %v560_v38, %v564_v31  ;;  %v4898_v4 = vsel %vm433_vm0, %v572_v58, %v576_v62  ;;  %v598_v31 = vshll.u32 %v4918_v51, 16  ;;  %v3972_v38 = vld [vmem:[%s5896_s1 + $0x474] ss:$8 sps:$4 sm:$0xff]  }
  0x8d   : > { %2389 = vmatprep.subr.bf16.mxu0 %v3914_v9  ;;  %v4902_v9 = vld [vmem:[%s4422_s11 + $0x9c] sm:$0xff]   ;;  %1841 = vmatpush1.bf16.msra.mxu1 %v3956_v52  ;;  %v4958_v58 = vld [vmem:[%s4422_s11 + $0xb4] sm:$0xff]  }
  0x8e   : > { %1730 = vmatmul.mubr.bf16.gmra.mrb[32].mxu1 %v4719_v17  ;;  %3328 = vmatprep.subr.bf16.mxu1 %v4105_v13  ;;  %v593_v21 = vshll.u32 %v4902_v9, 16  ;;  %v600_v43 = vrot.slane %v598_v31, 1  ;;  %v617_v52 = vshll.u32 %v4958_v58, 16  ;;  %v5044_v31 = vld [vmem:[%s4422_s11 + $0xc8] ss:$0 sps:$4 sm:$0x11]  }
  0x8f   : > { %2229 = vmatmul.mubr.bf16.vlgmr.msra.gmra.mrb[0].mxu0 %v4491_v14  ;;  %1739 = vmatprep.mubr.bf16.mxu1 %v4834_v24  ;;  %v634_v46 = vshll.u32 %v5044_v31, 16 }
  0x90   : > { %2390 = vmatpush1.bf16.msra.mxu0 %v3912_v18  ;;  %2238 = vmatprep.mubr.bf16.mxu0 %v4601_v8  ;;  %v4865_v8 = vld [vmem:[%s4422_s11 + $0x90] sm:$0xff]   ;;  %v588_v18 = vrot.slane %v586_v2, 1  ;;  %v595_v28 = vrot.slane %v593_v21, 1  ;;  %v615_v2 = vshrl.u32 %v4958_v58, 16 }
  0x91   : > { %2391 = vmatprep.subr.bf16.mxu0 %v3927_v22  ;;  %v581_v0 = vshll.u32 %v4865_v8, 16  ;;  %v579_v5 = vshrl.u32 %v4865_v8, 16  ;;  %v3962_v22 = vld [vmem:[%s5896_s1 + $0x450] ss:$8 sps:$4 sm:$0xff]   ;;  %v4112_v21 = vld [vmem:[%s5896_s1 + $0x234] ss:$8 sps:$4 sm:$0xff]  }
  0x93   : > { %v583_v7 = vrot.slane %v581_v0, 1 }
  0x94   : > { %2392 = vmatpush1.bf16.msra.mxu0 %v3925_v25  ;;  %v3967_v25 = vld [vmem:[%s5896_s1 + $0x464] ss:$8 sps:$4 sm:$0xff]  }
  0x95   : > { %2393 = vmatprep.subr.bf16.mxu0 %v3940_v39  ;;  %v584_v19 = vor.u32 %v583_v7, %v579_v5  ;;  %v4946_v39 = vld [vmem:[%s4422_s11 + $0xb0] ss:$0 sps:$4 sm:$0x11]   ;;  %v619_v5 = vrot.slane %v617_v52, 1 }
  0x96   : > { %1740 = vmatmul.mubr.bf16.gmra.mrb[36].mxu1 %v4757_v42 }
  0x97   : > { %2239 = vmatmul.mubr.bf16.gmra.mrb[4].mxu0 %v4528_v36  ;;  %1749 = vmatprep.mubr.bf16.mxu1 %v4862_v44  ;;  %v4928_v26 = vsel %vm433_vm0, %v584_v19, %v588_v18  ;;  %v4108_v18 = vld [vmem:[%s5896_s1 + $0x214] ss:$8 sps:$4 sm:$0xff]   ;;  %v4110_v19 = vld [vmem:[%s5896_s1 + $0x224] ss:$8 sps:$4 sm:$0xff]  }
  0x98   : > { %2248 = vmatprep.mubr.bf16.mxu0 %v4640_v30  ;;  %2394 = vmatpush1.bf16.msra.mxu0 %v3938_v47  ;;  %v3961_v30 = vld [vmem:[%s5896_s1 + $0x444] ss:$8 sps:$4 sm:$0xff]   ;;  %v3970_v47 = vld [vmem:[%s5896_s1 + $0x470] ss:$8 sps:$4 sm:$0xff]  }
  0x99   : > { %2395 = vmatprep.subr.bf16.mxu0 %v3953_v49  ;;  %v603_v49 = vshrl.u32 %v4933_v32, 16 }
  0x9b   : > { %v608_v62 = vor.u32 %v607_v55, %v603_v49  ;;  %v4121_v49 = vld [vmem:[%s5896_s1 + $0x270] ss:$8 sps:$4 sm:$0xff]   ;;  %v4122_v55 = vld [vmem:[%s5896_s1 + $0x284] ss:$8 sps:$4 sm:$0xff]  }
  0x9c   : > { %2396 = vmatpush1.bf16.msra.mxu0 %v3951_v1  ;;  %v4965_v1 = vld [vmem:[%s4422_s11 + $0xbc] ss:$0 sps:$4 sm:$0x11]  }
  0x9d   : > { %2397 = vmatprep.subr.bf16.mxu0 %v3961_v30  ;;  %v622_v7 = vshll.u32 %v4965_v1, 16 }
  0x9e   : > { %1750 = vmatmul.mubr.bf16.gmra.mrb[40].mxu1 %v4795_v63 }
  0x9f   : > { %2249 = vmatmul.mubr.bf16.gmra.mrb[8].mxu0 %v4564_v56  ;;  %1759 = vmatprep.mubr.bf16.mxu1 %v4898_v4 }
  0xa0   : > { %2258 = vmatprep.mubr.bf16.mxu0 %v4678_v54  ;;  %2398 = vmatpush1.bf16.msra.mxu0 %v3959_v11  ;;  %v591_v54 = vshrl.u32 %v4902_v9, 16  ;;  %v624_v11 = vrot.slane %v622_v7, 1 }
  0xa1   : > { %2399 = vmatprep.subr.bf16.mxu0 %v3964_v15  ;;  %v4106_v15 = vld [vmem:[%s4422_s11 + $0xc] sm:$0xff]  }
  0xa2   : > { %v596_v40 = vor.u32 %v595_v28, %v591_v54  ;;  %v4117_v54 = vld [vmem:[%s5896_s1 + $0x250] ss:$8 sps:$4 sm:$0xff]   ;;  %v5034_v28 = vld [vmem:[%s4422_s11 + $0xc0] sm:$0xff]  }
  0xa4   : > { %2400 = vmatpush1.bf16.msra.mxu0 %v3962_v22  ;;  %v4953_v48 = vsel %vm433_vm0, %v596_v40, %v600_v43  ;;  %v4115_v22 = vld [vmem:[%s5896_s1 + $0x240] ss:$8 sps:$4 sm:$0xff]   ;;  %v4120_v40 = vld [vmem:[%s5896_s1 + $0x274] ss:$8 sps:$4 sm:$0xff]   ;;  %v627_v43 = vshrl.u32 %v5034_v28, 16 }
  0xa5   : > { %2401 = vmatprep.subr.bf16.mxu0 %v3967_v25  ;;  %v4116_v25 = vld [vmem:[%s5896_s1 + $0x254] ss:$8 sps:$4 sm:$0xff]  }
  0xa6   : > { %1760 = vmatmul.mubr.bf16.gmra.mrb[44].mxu1 %v4831_v23 }
  0xa7   : > { %2259 = vmatmul.mubr.bf16.gmra.mrb[12].mxu0 %v4605_v12  ;;  %1769 = vmatprep.mubr.bf16.mxu1 %v4928_v26 }
  0xa8   : > { %2268 = vmatprep.mubr.bf16.mxu0 %v4715_v10  ;;  %2402 = vmatpush1.bf16.msra.mxu0 %v3965_v37  ;;  %v610_v10 = vshll.u32 %v4946_v39, 16  ;;  %v629_v37 = vshll.u32 %v5034_v28, 16 }
  0xa9   : > { %2403 = vmatprep.subr.bf16.mxu0 %v3972_v38  ;;  %v4119_v38 = vld [vmem:[%s5896_s1 + $0x260] ss:$8 sps:$4 sm:$0xff]  }
  0xaa   : > { %v612_v0 = vrot.slane %v610_v10, 1 }
  0xac   : > { %2404 = vmatpush1.bf16.msra.mxu0 %v3970_v47  ;;  %v4969_v30 = vsel %vm433_vm0, %v608_v62, %v612_v0  ;;  %v5056_v47 = vld [vmem:[%s4422_s11 + $0xcc] sm:$0xff]   ;;  %v636_v62 = vrot.slane %v634_v46, 1  ;;  %v5069_v0 = vld [vmem:[%s4422_s11 + $0xd4] ss:$0 sps:$4 sm:$0x11]   ;;  %v699_v46 = vrot.slane %v4795_v63, 1  ;;  %s5695_s11 = scalar_lea.vmem %s5898_s3, %s3326_s28 }
  0xad   : > { %v641_v52 = vshll.u32 %v5056_v47, 16  ;;  %v639_v7 = vshrl.u32 %v5056_v47, 16 }
  0xae   : > { %1770 = vmatmul.mubr.bf16.gmra.mrb[48].mxu1 %v4865_v8 }
  0xaf   : > { %2269 = vmatmul.mubr.bf16.gmra.mrb[16].mxu0 %v4643_v33  ;;  %1779 = vmatprep.mubr.bf16.mxu1 %v4953_v48 }
  0xb0   : > { %2278 = vmatprep.mubr.bf16.mxu0 %v4747_v34  ;;  %v620_v34 = vor.u32 %v619_v5, %v615_v2  ;;  %v4123_v2 = vld [vmem:[%s5896_s1 + $0x280] ss:$8 sps:$4 sm:$0xff]   ;;  %v4124_v5 = vld [vmem:[%s5896_s1 + $0x294] ss:$8 sps:$4 sm:$0xff]  }
  0xb2   : > { %v4978_v13 = vsel %vm433_vm0, %v620_v34, %v624_v11  ;;  %v643_v34 = vrot.slane %v641_v52, 1  ;;  %v646_v11 = vshll.u32 %v5069_v0, 16 }
  0xb6   : > { %1780 = vmatmul.mubr.bf16.gmra.mrb[52].mxu1 %v4902_v9 }
  0xb7   : > { %2279 = vmatmul.mubr.bf16.gmra.mrb[20].mxu0 %v4675_v53  ;;  %1789 = vmatprep.mubr.bf16.mxu1 %v4969_v30 }
  0xb8   : > { %2288 = vmatprep.mubr.bf16.mxu0 %v4789_v60  ;;  %v4107_v60 = vld [vmem:[%s5896_s1 + $0x200] ss:$8 sps:$4 sm:$0xff]  }
  0xbe   : > { %1790 = vmatmul.mubr.bf16.gmra.mrb[56].mxu1 %v4933_v32 }
  0xbf   : > { %2289 = vmatmul.mubr.bf16.gmra.mrb[24].mxu0 %v4719_v17  ;;  %1799 = vmatprep.mubr.bf16.mxu1 %v4978_v13 }
  0xc0   : > { %2298 = vmatprep.mubr.bf16.mxu0 %v4834_v24 }
  0xc6   : > { %1800 = vmatmul.mubr.bf16.gmra.mrb[60].mxu1 %v4958_v58 }
  0xc7   : > { %2299 = vmatmul.mubr.bf16.gmra.mrb[28].mxu0 %v4757_v42  ;;  %1842 = vmatprep.mubr.bf16.mxu1 %v4106_v15  ;;  %v4125_v15 = vld [vmem:[%s5896_s1 + $0x290] ss:$8 sps:$4 sm:$0xff]  }
  0xc8   : > { %2308 = vmatprep.mubr.bf16.mxu0 %v4862_v44 }
  0xce   : > { %1843 = vmatmul.mubr.bf16.vlgmr.msra.gmra.mrb[0].mxu1 %v4522_v29  ;;  %v4109_v29 = vld [vmem:[%s5896_s1 + $0x210] ss:$8 sps:$4 sm:$0xff]  }
  0xcf   : > { %2309 = vmatmul.mubr.bf16.gmra.mrb[32].mxu0 %v4795_v63  ;;  %3344 = vmatpush1.bf16.msra.mxu1 %v4107_v60  ;;  %v4126_v60 = vld [vmem:[%s5896_s1 + $0x2a4] ss:$8 sps:$4 sm:$0xff]  }
  0xd0   : > { %1852 = vmatprep.mubr.bf16.mxu1 %v4491_v14  ;;  %2318 = vmatprep.mubr.bf16.mxu0 %v4898_v4  ;;  %v4111_v14 = vld [vmem:[%s5896_s1 + $0x220] ss:$8 sps:$4 sm:$0xff]  }
  0xd1   : > { %3329 = vmatprep.subr.bf16.mxu1 %v4108_v18  ;;  %v644_v18 = vor.u32 %v643_v34, %v639_v7 }
  0xd3   : > { %3345 = vmatpush1.bf16.msra.mxu1 %v4109_v29  ;;  %v648_v29 = vrot.slane %v646_v11, 1 }
  0xd4   : > { %3330 = vmatprep.subr.bf16.mxu1 %v4110_v19  ;;  %v4127_v19 = vld [vmem:[%s5896_s1 + $0x2a0] ss:$8 sps:$4 sm:$0xff]  }
  0xd6   : > { %1853 = vmatmul.mubr.bf16.gmra.mrb[4].mxu1 %v4469_v3  ;;  %v4113_v3 = vld [vmem:[%s5896_s1 + $0x230] ss:$8 sps:$4 sm:$0xff]  }
  0xd7   : > { %2319 = vmatmul.mubr.bf16.gmra.mrb[36].mxu0 %v4831_v23  ;;  %1862 = vmatprep.mubr.bf16.mxu1 %v4528_v36  ;;  %v4114_v36 = vld [vmem:[%s5896_s1 + $0x244] ss:$8 sps:$4 sm:$0xff]  }
  0xd8   : > { %2328 = vmatprep.mubr.bf16.mxu0 %v4928_v26  ;;  %3346 = vmatpush1.bf16.msra.mxu1 %v4111_v14  ;;  %v4128_v14 = vld [vmem:[%s5896_s1 + $0x2b4] ss:$8 sps:$4 sm:$0xff]  }
  0xd9   : > { %3331 = vmatprep.subr.bf16.mxu1 %v4112_v21  ;;  %v649_v21 = vsel %vm433_vm0, %v644_v18, %v648_v29 }
  0xdc   : > { %3347 = vmatpush1.bf16.msra.mxu1 %v4113_v3  ;;  %v4130_v3 = vld [vmem:[%s5896_s1 + $0x2c4] ss:$8 sps:$4 sm:$0xff]  }
  0xdd   : > { %3332 = vmatprep.subr.bf16.mxu1 %v4114_v36  ;;  %v4131_v36 = vld [vmem:[%s5896_s1 + $0x2c0] ss:$8 sps:$4 sm:$0xff]  }
  0xde   : > { %1863 = vmatmul.mubr.bf16.gmra.mrb[8].mxu1 %v4542_v41 }
  0xdf   : > { %2329 = vmatmul.mubr.bf16.gmra.mrb[40].mxu0 %v4865_v8  ;;  %1872 = vmatprep.mubr.bf16.mxu1 %v4564_v56  ;;  %v4118_v56 = vld [vmem:[%s5896_s1 + $0x264] ss:$8 sps:$4 sm:$0xff]  }
  0xe0   : > { %2338 = vmatprep.mubr.bf16.mxu0 %v4953_v48  ;;  %3348 = vmatpush1.bf16.msra.mxu1 %v4115_v22  ;;  %v4132_v22 = vld [vmem:[%s5896_s1 + $0x2d4] ss:$8 sps:$4 sm:$0xff]  }
  0xe1   : > { %3333 = vmatprep.subr.bf16.mxu1 %v4116_v25  ;;  %v4133_v25 = vld [vmem:[%s5896_s1 + $0x2d0] ss:$8 sps:$4 sm:$0xff]  }
  0xe4   : > { %3349 = vmatpush1.bf16.msra.mxu1 %v4117_v54  ;;  %v4202_v54 = vmov 0  }
  0xe5   : > { %3334 = vmatprep.subr.bf16.mxu1 %v4118_v56  ;;  %v4135_v56 = vld [vmem:[%s5896_s1 + $0x2e0] ss:$8 sps:$4 sm:$0xff]  }
  0xe6   : > { %1873 = vmatmul.mubr.bf16.gmra.mrb[12].mxu1 %v4573_v59 }
  0xe7   : > { %2339 = vmatmul.mubr.bf16.gmra.mrb[44].mxu0 %v4902_v9  ;;  %1882 = vmatprep.mubr.bf16.mxu1 %v4605_v12  ;;  %v631_v12 = vrot.slane %v629_v37, 1  ;;  %v4136_v37 = vld [vmem:[%s5896_s1 + $0x2f4] ss:$8 sps:$4 sm:$0xff]  }
  0xe8   : > { %2348 = vmatprep.mubr.bf16.mxu0 %v4969_v30  ;;  %3350 = vmatpush1.bf16.msra.mxu1 %v4119_v38  ;;  %v4137_v38 = vld [vmem:[%s5896_s1 + $0x2f0] ss:$8 sps:$4 sm:$0xff]  }
  0xe9   : > { %3335 = vmatprep.subr.bf16.mxu1 %v4120_v40  ;;  %v632_v10 = vor.u32 %v631_v12, %v627_v43  ;;  %v696_v40 = vrot.slane %v4757_v42, 1  ;;  %v697_v43 = vrot.slane %v4778_v50, 1 }
  0xeb   : > { %v698_v12 = vsel %vm668_vm1, %v696_v40, %v697_v43 }
  0xec   : > { %3351 = vmatpush1.bf16.msra.mxu1 %v4121_v49 }
  0xed   : > { %3336 = vmatprep.subr.bf16.mxu1 %v4122_v55 }
  0xee   : > { %1883 = vmatmul.mubr.bf16.gmra.mrb[16].mxu1 %v4612_v16 }
  0xef   : > { %2349 = vmatmul.mubr.bf16.gmra.mrb[48].mxu0 %v4933_v32  ;;  %1892 = vmatprep.mubr.bf16.mxu1 %v4643_v33  ;;  %v5079_v33 = vsel %vm433_vm0, %v632_v10, %v636_v62 }
  0xf0   : > { %2358 = vmatprep.mubr.bf16.mxu0 %v4978_v13  ;;  %3352 = vmatpush1.bf16.msra.mxu1 %v4123_v2 }
  0xf1   : > { %3337 = vmatprep.subr.bf16.mxu1 %v4124_v5 }
  0xf4   : > { %3353 = vmatpush1.bf16.msra.mxu1 %v4125_v15 }
  0xf5   : > { %3338 = vmatprep.subr.bf16.mxu1 %v4126_v60 }
  0xf6   : > { %1893 = vmatmul.mubr.bf16.gmra.mrb[20].mxu1 %v4647_v35 }
  0xf7   : > { %2359 = vmatmul.mubr.bf16.gmra.mrb[52].mxu0 %v4958_v58  ;;  %1902 = vmatprep.mubr.bf16.mxu1 %v4675_v53  ;;  %v4129_v53 = vld [vmem:[%s5896_s1 + $0x2b0] ss:$8 sps:$4 sm:$0xff]  }
  0xf8   : > { %2368 = vmatprep.mubr.bf16.mxu0 %v5079_v33  ;;  %3354 = vmatpush1.bf16.msra.mxu1 %v4127_v19  ;;  %v887_v19 = vlaneseq }
  0xf9   : > { %3339 = vmatprep.subr.bf16.mxu1 %v4128_v14 }
  0xfc   : > { %3355 = vmatpush1.bf16.msra.mxu1 %v4129_v53 }
  0xfd   : > { %3340 = vmatprep.subr.bf16.mxu1 %v4130_v3  ;;  %v888_v3 = vshrl.u32 %v887_v19, 7 }
  0xfe   : > { %1903 = vmatmul.mubr.bf16.gmra.mrb[24].mxu1 %v4688_v61 }
  0xff   : > { %2369 = vmatmul.mubr.bf16.gmra.mrb[56].mxu0 %v5034_v28  ;;  %1912 = vmatprep.mubr.bf16.mxu1 %v4719_v17  ;;  %v4134_v17 = vld [vmem:[%s5896_s1 + $0x2e4] ss:$8 sps:$4 sm:$0xff]  }
 0x100   : > { %2378 = vmatprep.mubr.bf16.mxu0 %v649_v21  ;;  %3356 = vmatpush1.bf16.msra.mxu1 %v4131_v36 }
 0x101   : > { %3341 = vmatprep.subr.bf16.mxu1 %v4132_v22  ;;  %v889_v22 = vsub.s32 0, %v888_v3 }
 0x104   : > { %3357 = vmatpush1.bf16.msra.mxu1 %v4133_v25  ;;  %v885_v25 = vld [vmem:[%s5897_s2] sm:$0x3] }
 0x105   : > { %3342 = vmatprep.subr.bf16.mxu1 %v4134_v17  ;;  %v893_v17 = vsub.s32 1, %v888_v3 }
 0x106   : > { %1913 = vmatmul.mubr.bf16.gmra.mrb[28].mxu1 %v4726_v20 }
 0x107   : > { %2379 = vmatmul.mubr.bf16.gmra.mrb[60].mxu0 %v5056_v47  ;;  %1922 = vmatprep.mubr.bf16.mxu1 %v4757_v42  ;;  %v702_v42 = vrot.slane %v4831_v23, 1  ;;  %v5252_v43 = vrot.slane %v885_v25, %v893_v17 }
 0x108   : > { %2421 = vmatprep.mubr.bf16.mxu0 %v4202_v54  ;;  %3358 = vmatpush1.bf16.msra.mxu1 %v4135_v56 }
 0x109   : > { %3343 = vmatprep.subr.bf16.mxu1 %v4136_v37 }
 0x10c   : > { %3359 = vmatpush1.bf16.msra.mxu1 %v4137_v38  ;;  %v5248_v38 = vrot.slane %v885_v25, %v889_v22 }
 0x10e   : > { %1923 = vmatmul.mubr.bf16.gmra.mrb[32].mxu1 %v4766_v45 }
 0x10f   : > { %2422 = vmatmul.mubr.bf16.vlgmr.msra.gmra.mrb[0].mxu0 %v4542_v41  ;;  %1932 = vmatprep.mubr.bf16.mxu1 %v4795_v63  ;;  %v700_v41 = vrot.slane %v4812_v6, 1  ;;  %v705_v63 = vrot.slane %v4865_v8, 1 }
 0x110   : > { %2431 = vmatprep.mubr.bf16.mxu0 %v4202_v54 }
 0x111   : > { %v701_v49 = vsel %vm668_vm1, %v699_v46, %v700_v41 }
 0x116   : > { %1933 = vmatmul.mubr.bf16.gmra.mrb[36].mxu1 %v698_v12 }
 0x117   : > { %2432 = vmatmul.mubr.bf16.gmra.mrb[4].mxu0 %v4573_v59  ;;  %1942 = vmatprep.mubr.bf16.mxu1 %v4831_v23  ;;  %v703_v59 = vrot.slane %v4845_v27, 1  ;;  %v708_v23 = vrot.slane %v4902_v9, 1 }
 0x118   : > { %2441 = vmatprep.mubr.bf16.mxu0 %v4202_v54 }
 0x119   : > { %v704_v50 = vsel %vm668_vm1, %v702_v42, %v703_v59 }
 0x11e   : > { %1943 = vmatmul.mubr.bf16.gmra.mrb[40].mxu1 %v701_v49 }
 0x11f   : > { %2442 = vmatmul.mubr.bf16.gmra.mrb[8].mxu0 %v4612_v16  ;;  %1952 = vmatprep.mubr.bf16.mxu1 %v4865_v8  ;;  %v706_v16 = vrot.slane %v4884_v57, 1  ;;  %v711_v8 = vrot.slane %v4933_v32, 1 }
 0x120   : > { %2451 = vmatprep.mubr.bf16.mxu0 %v4202_v54 }
 0x121   : > { %v707_v6 = vsel %vm668_vm1, %v705_v63, %v706_v16 }
 0x126   : > { %1953 = vmatmul.mubr.bf16.gmra.mrb[44].mxu1 %v704_v50 }
 0x127   : > { %2452 = vmatmul.mubr.bf16.gmra.mrb[12].mxu0 %v4647_v35  ;;  %1962 = vmatprep.mubr.bf16.mxu1 %v4902_v9  ;;  %v709_v35 = vrot.slane %v4918_v51, 1  ;;  %v714_v9 = vrot.slane %v4958_v58, 1 }
 0x128   : > { %2461 = vmatprep.mubr.bf16.mxu0 %v4202_v54 }
 0x129   : > { %v710_v27 = vsel %vm668_vm1, %v708_v23, %v709_v35 }
 0x12e   : > { %1963 = vmatmul.mubr.bf16.gmra.mrb[48].mxu1 %v707_v6 }
 0x12f   : > { %2462 = vmatmul.mubr.bf16.gmra.mrb[16].mxu0 %v4688_v61  ;;  %1972 = vmatprep.mubr.bf16.mxu1 %v4933_v32  ;;  %v712_v61 = vrot.slane %v4946_v39, 1 }
 0x130   : > { %2471 = vmatprep.mubr.bf16.mxu0 %v4202_v54 }
 0x131   : > { %v713_v57 = vsel %vm668_vm1, %v711_v8, %v712_v61 }
 0x136   : > { %1973 = vmatmul.mubr.bf16.gmra.mrb[52].mxu1 %v710_v27 }
 0x137   : > { %2472 = vmatmul.mubr.bf16.gmra.mrb[20].mxu0 %v4726_v20  ;;  %1982 = vmatprep.mubr.bf16.mxu1 %v4958_v58  ;;  %v715_v20 = vrot.slane %v4965_v1, 1 }
 0x138   : > { %2481 = vmatprep.mubr.bf16.mxu0 %v4202_v54 }
 0x139   : > { %v716_v51 = vsel %vm668_vm1, %v714_v9, %v715_v20 }
 0x13e   : > { %1983 = vmatmul.mubr.bf16.gmra.mrb[56].mxu1 %v713_v57 }
 0x13f   : > { %2482 = vmatmul.mubr.bf16.gmra.mrb[24].mxu0 %v4766_v45  ;;  %1992 = vmatprep.mubr.bf16.mxu1 %v5034_v28  ;;  %v717_v45 = vrot.slane %v5034_v28, 1 }
 0x140   : > { %2491 = vmatprep.mubr.bf16.mxu0 %v4202_v54 }
 0x146   : > { %1993 = vmatmul.mubr.bf16.gmra.mrb[60].mxu1 %v716_v51 }
 0x147   : > { %2492 = vmatmul.mubr.bf16.gmra.mrb[28].mxu0 %v698_v12  ;;  %2115 = vmatprep.mubr.bf16.mxu1 %v698_v12 }
 0x148   : > { %2501 = vmatprep.mubr.bf16.mxu0 %v4202_v54 }
 0x14e   : > { %2116 = vmatmul.mubr.bf16.vlgmr.msra.gmra.mrb[32].mxu1 %v4834_v24  ;;  %v718_v24 = vrot.slane %v5044_v31, 1 }
 0x14f   : > { %2502 = vmatmul.mubr.bf16.gmra.mrb[32].mxu0 %v701_v49  ;;  %2125 = vmatprep.mubr.bf16.mxu1 %v701_v49 }
 0x150   : > { %2511 = vmatprep.mubr.bf16.mxu0 %v4202_v54 }
 0x156   : > { %2126 = vmatmul.mubr.bf16.gmra.mrb[36].mxu1 %v4862_v44  ;;  %v719_v44 = vsel %vm668_vm1, %v717_v45, %v718_v24 }
 0x157   : > { %2512 = vmatmul.mubr.bf16.gmra.mrb[36].mxu0 %v704_v50  ;;  %2135 = vmatprep.mubr.bf16.mxu1 %v704_v50 }
 0x158   : > { %2521 = vmatprep.mubr.bf16.mxu0 %v4202_v54 }
 0x15e   : > { %2136 = vmatmul.mubr.bf16.gmra.mrb[40].mxu1 %v4898_v4  ;;  %v720_v4 = vrot.slane %v5056_v47, 1 }
 0x15f   : > { %2522 = vmatmul.mubr.bf16.gmra.mrb[40].mxu0 %v707_v6  ;;  %2145 = vmatprep.mubr.bf16.mxu1 %v707_v6 }
 0x160   : > { %2531 = vmatprep.mubr.bf16.mxu0 %v4202_v54 }
 0x166   : > { %2146 = vmatmul.mubr.bf16.gmra.mrb[44].mxu1 %v4928_v26  ;;  %v721_v26 = vrot.slane %v5069_v0, 1 }
 0x167   : > { %2532 = vmatmul.mubr.bf16.gmra.mrb[44].mxu0 %v710_v27  ;;  %2155 = vmatprep.mubr.bf16.mxu1 %v710_v27 }
 0x168   : > { %2541 = vmatprep.mubr.bf16.mxu0 %v4202_v54  ;;  %v722_v32 = vsel %vm668_vm1, %v720_v4, %v721_v26 }
 0x16e   : > { %2156 = vmatmul.mubr.bf16.gmra.mrb[48].mxu1 %v4953_v48 }
 0x16f   : > { %2542 = vmatmul.mubr.bf16.gmra.mrb[48].mxu0 %v713_v57  ;;  %2165 = vmatprep.mubr.bf16.mxu1 %v713_v57 }
 0x170   : > { %2551 = vmatprep.mubr.bf16.mxu0 %v4202_v54 }
 0x176   : > { %2166 = vmatmul.mubr.bf16.gmra.mrb[52].mxu1 %v4969_v30 }
 0x177   : > { %2552 = vmatmul.mubr.bf16.gmra.mrb[52].mxu0 %v716_v51  ;;  %2175 = vmatprep.mubr.bf16.mxu1 %v716_v51 }
 0x178   : > { %2561 = vmatprep.mubr.bf16.mxu0 %v4202_v54 }
 0x17e   : > { %2176 = vmatmul.mubr.bf16.gmra.mrb[56].mxu1 %v4978_v13 }
 0x17f   : > { %2562 = vmatmul.mubr.bf16.gmra.mrb[56].mxu0 %v719_v44  ;;  %2185 = vmatprep.mubr.bf16.mxu1 %v719_v44 }
 0x180   : > { %2571 = vmatprep.mubr.bf16.mxu0 %v4202_v54 }
 0x186   : > { %2186 = vmatmul.mubr.bf16.gmra.mrb[60].mxu1 %v5079_v33 }
 0x187   : > { %2572 = vmatmul.mubr.bf16.gmra.mrb[60].mxu0 %v722_v32 }
 0x1a1   : > { %v1844_v39 = vpop.f32.mrb[0].mxu1 }
 0x1a2   : > { %v1846_v48 = vpop.f32.mrb[1].mxu1  ;;  %v3360_v12 = vadd.f32 %v1844_v39, %v5248_v38 }
 0x1a3   : > { %v1848_v58 = vpop.f32.mrb[2].mxu1  ;;  %v3362_v46 = vadd.f32 %v1846_v48, %v5252_v43 }
 0x1a4   : > { %v1850_v1 = vpop.f32.mrb[3].mxu1  ;;  %v3364_v49 = vadd.f32 %v1848_v58, %v5248_v38 }
 0x1a5   : > { %v3366_v50 = vadd.f32 %v1850_v1, %v5252_v43 }
 0x1a9   : > { %v1854_v30 = vpop.f32.mrb[4].mxu1 }
 0x1aa   : > { %v1856_v28 = vpop.f32.mrb[5].mxu1  ;;  %v3368_v57 = vadd.f32 %v1854_v30, %v5248_v38 }
 0x1ab   : > { %v1858_v13 = vpop.f32.mrb[6].mxu1  ;;  %v3370_v9 = vadd.f32 %v1856_v28, %v5252_v43 }
 0x1ac   : > { %v1860_v31 = vpop.f32.mrb[7].mxu1  ;;  %v3372_v45 = vadd.f32 %v1858_v13, %v5248_v38 }
 0x1ad   : > { %v3374_v4 = vadd.f32 %v1860_v31, %v5252_v43 }
 0x1b1   : > { %v5199_v55 = vpop.f32.mrb[8].mxu1 }
 0x1b2   : > { %v5201_v10 = vpop.f32.mrb[9].mxu1  ;;  %v3376_v19 = vadd.f32 %v5199_v55, %v5248_v38 }
 0x1b3   : > { %v5203_v47 = vpop.f32.mrb[10].mxu1  ;;  %v3378_v13 = vadd.f32 %v5201_v10, %v5252_v43 }
 0x1b4   : > { %v5205_v62 = vpop.f32.mrb[11].mxu1  ;;  %v3380_v31 = vadd.f32 %v5203_v47, %v5248_v38 }
 0x1b9   : > { %v5207_v0 = vpop.f32.mrb[12].mxu1 }
 0x1ba   : > { %v5209_v52 = vpop.f32.mrb[13].mxu1 }
 0x1bb   : > { %v5211_v2 = vpop.f32.mrb[14].mxu1 }
 0x1bc   : > { %v5213_v5 = vpop.f32.mrb[15].mxu1 }
 0x1c1   : > { %v5215_v33 = vpop.f32.mrb[16].mxu1 }
 0x1c2   : > { %v5217_v7 = vpop.f32.mrb[17].mxu1 }
 0x1c3   : > { %v5219_v34 = vpop.f32.mrb[18].mxu1 }
 0x1c4   : > { %v5221_v11 = vpop.f32.mrb[19].mxu1 }
 0x1c9   : > { %v5223_v15 = vpop.f32.mrb[20].mxu1 }
 0x1ca   : > { %v5225_v60 = vpop.f32.mrb[21].mxu1 }
 0x1cb   : > { %v5227_v18 = vpop.f32.mrb[22].mxu1 }
 0x1cc   : > { %v5229_v29 = vpop.f32.mrb[23].mxu1 }
 0x1d1   : > { %v5231_v14 = vpop.f32.mrb[24].mxu1 }
 0x1d2   : > { %v5233_v21 = vpop.f32.mrb[25].mxu1 }
 0x1d3   : > { %v5235_v53 = vpop.f32.mrb[26].mxu1 }
 0x1d4   : > { %v5237_v36 = vpop.f32.mrb[27].mxu1 }
 0x1d9   : > { %v5242_v54 = vpop.f32.mrb[28].mxu1 }
 0x1da   : > { %v5244_v56 = vpop.f32.mrb[29].mxu1 }
 0x1db   : > { %v5246_v37 = vpop.f32.mrb[30].mxu1 }
 0x1dc   : > { %v5250_v40 = vpop.f32.mrb[31].mxu1 }
 0x1e2   : > { %v2423_v41 = vpop.f32.mrb[0].mxu0 }
 0x1e3   : > { %v5257_v42 = vadd.f32 %v3360_v12, %v2423_v41  ;;  %v2425_v59 = vpop.f32.mrb[1].mxu0 }
 0x1e4   : > { %v3363_v63 = vadd.f32 %v3362_v46, %v2425_v59  ;;  %v2427_v16 = vpop.f32.mrb[2].mxu0  ;;  %v3382_v46 = vadd.f32 %v5205_v62, %v5252_v43  ;;  %v3386_v62 = vadd.f32 %v5209_v52, %v5252_v43 }
 0x1e5   : > { %v5260_v6 = vadd.f32 %v3364_v49, %v2427_v16  ;;  %v2429_v23 = vpop.f32.mrb[3].mxu0 }
 0x1e6   : > { %v2582_v35 = vsub.f32 0.0, %v3363_v63  ;;  %v3367_v27 = vadd.f32 %v3366_v50, %v2429_v23 }
 0x1e8   : > { %v2614_v8 = vmul.f32 1.442695, %v2582_v35  ;;  %v2583_v61 = vsub.f32 0.0, %v3367_v27  ;;  %v3384_v27 = vadd.f32 %v5207_v0, %v5248_v38 }
 0x1ea   : > { %3975 = vpow2.f32 %v2614_v8  ;;  %v2616_v20 = vmul.f32 1.442695, %v2583_v61  ;;  %v2433_v51 = vpop.f32.mrb[4].mxu0 }
 0x1eb   : > { %v5265_v24 = vadd.f32 %v3368_v57, %v2433_v51  ;;  %v2435_v44 = vpop.f32.mrb[5].mxu0  ;;  %v3388_v57 = vadd.f32 %v5211_v2, %v5248_v38 }
 0x1ec   : > { %3977 = vpow2.f32 %v2616_v20  ;;  %v3371_v26 = vadd.f32 %v3370_v9, %v2435_v44  ;;  %v2437_v32 = vpop.f32.mrb[6].mxu0 }
 0x1ed   : > { %v5268_v39 = vadd.f32 %v3372_v45, %v2437_v32  ;;  %v2439_v48 = vpop.f32.mrb[7].mxu0  ;;  %v3390_v45 = vadd.f32 %v5213_v5, %v5252_v43  ;;  %v3394_v5 = vadd.f32 %v5217_v7, %v5252_v43 }
 0x1ee   : > { %v2584_v58 = vsub.f32 0.0, %v3371_v26  ;;  %v3375_v1 = vadd.f32 %v3374_v4, %v2439_v48 }
 0x1f0   : > { %v2618_v30 = vmul.f32 1.442695, %v2584_v58  ;;  %v2585_v28 = vsub.f32 0.0, %v3375_v1 }
 0x1f2   : > { %3979 = vpow2.f32 %v2618_v30  ;;  %v2620_v3 = vmul.f32 1.442695, %v2585_v28  ;;  %v2443_v22 = vpop.f32.mrb[8].mxu0 }
 0x1f3   : > { %v5276_v25 = vadd.f32 %v3376_v19, %v2443_v22  ;;  %v2445_v17 = vpop.f32.mrb[9].mxu0  ;;  %v3392_v19 = vadd.f32 %v5215_v33, %v5248_v38  ;;  %v3398_v33 = vadd.f32 %v5221_v11, %v5252_v43  ;;  %v3400_v11 = vadd.f32 %v5223_v15, %v5248_v38 }
 0x1f4   : > { %v3976_v12 = vpop.eup %3975  ;;  %3981 = vpow2.f32 %v2620_v3  ;;  %v3379_v41 = vadd.f32 %v3378_v13, %v2445_v17  ;;  %v2447_v49 = vpop.f32.mrb[10].mxu0  ;;  %v3396_v17 = vadd.f32 %v5219_v34, %v5248_v38  ;;  %v3406_v15 = vadd.f32 %v5229_v29, %v5252_v43 }
 0x1f5   : > { %v2678_v55 = vadd.f32 1.0, %v3976_v12  ;;  %v5280_v59 = vadd.f32 %v3380_v31, %v2447_v49  ;;  %v2449_v10 = vpop.f32.mrb[11].mxu0  ;;  %v3408_v29 = vadd.f32 %v5231_v14, %v5248_v38  ;;  %v3414_v14 = vadd.f32 %v5237_v36, %v5252_v43 }
 0x1f6   : > { %v3978_v50 = vpop.eup %3977  ;;  %v2586_v63 = vsub.f32 0.0, %v3379_v41  ;;  %v3383_v16 = vadd.f32 %v3382_v46, %v2449_v10  ;;  %v3416_v36 = vadd.f32 %v5242_v54, %v5248_v38 }
 0x1f7   : > { %3983 = vrcp.f32 %v2678_v55  ;;  %v2679_v23 = vadd.f32 1.0, %v3978_v50 }
 0x1f8   : > { %v2622_v47 = vmul.f32 1.442695, %v2586_v63  ;;  %v2587_v35 = vsub.f32 0.0, %v3383_v16 }
 0x1f9   : > { %3985 = vrcp.f32 %v2679_v23 }
 0x1fa   : > { %3987 = vpow2.f32 %v2622_v47  ;;  %v2624_v8 = vmul.f32 1.442695, %v2587_v35  ;;  %v2453_v61 = vpop.f32.mrb[12].mxu0 }
 0x1fb   : > { %v5288_v9 = vadd.f32 %v3384_v27, %v2453_v61  ;;  %v2455_v20 = vpop.f32.mrb[13].mxu0 }
 0x1fc   : > { %v3980_v51 = vpop.eup %3979  ;;  %3989 = vpow2.f32 %v2624_v8  ;;  %v3387_v44 = vadd.f32 %v3386_v62, %v2455_v20  ;;  %v2457_v0 = vpop.f32.mrb[14].mxu0  ;;  %v3404_v20 = vadd.f32 %v5227_v18, %v5248_v38 }
 0x1fd   : > { %v2680_v4 = vadd.f32 1.0, %v3980_v51  ;;  %v5292_v26 = vadd.f32 %v3388_v57, %v2457_v0  ;;  %v2459_v52 = vpop.f32.mrb[15].mxu0 }
 0x1fe   : > { %v3982_v32 = vpop.eup %3981  ;;  %v2588_v48 = vsub.f32 0.0, %v3387_v44  ;;  %v3391_v58 = vadd.f32 %v3390_v45, %v2459_v52 }
 0x1ff   : > { %3991 = vrcp.f32 %v2680_v4  ;;  %v2681_v1 = vadd.f32 1.0, %v3982_v32 }
 0x200   : > { %v2626_v2 = vmul.f32 1.442695, %v2588_v48  ;;  %v2589_v30 = vsub.f32 0.0, %v3391_v58 }
 0x201   : > { %v3984_v28 = vpop.eup %3983  ;;  %3993 = vrcp.f32 %v2681_v1 }
 0x202   : > { %v5299_v13 = vmul.f32 %v3984_v28, %v5257_v42  ;;  %3995 = vpow2.f32 %v2626_v2  ;;  %v2628_v3 = vmul.f32 1.442695, %v2589_v30  ;;  %v2463_v22 = vpop.f32.mrb[16].mxu0 }
 0x203   : > { %v3986_v31 = vpop.eup %3985  ;;  %v5303_v12 = vadd.f32 %v3392_v19, %v2463_v22  ;;  %v2465_v46 = vpop.f32.mrb[17].mxu0 }
 0x204   : > { %v3988_v41 = vpop.eup %3987  ;;  %v5308_v49 = vmul.f32 %v3986_v31, %v5260_v6  ;;  %3997 = vpow2.f32 %v2628_v3  ;;  %v3395_v7 = vadd.f32 %v3394_v5, %v2465_v46  ;;  %v2467_v42 = vpop.f32.mrb[18].mxu0  ;;  %v3402_v6 = vadd.f32 %v5225_v60, %v5252_v43 }
 0x205   : > { %v2682_v55 = vadd.f32 1.0, %v3988_v41  ;;  %v5310_v10 = vadd.f32 %v3396_v17, %v2467_v42  ;;  %v2469_v50 = vpop.f32.mrb[19].mxu0  ;;  %v3412_v31 = vadd.f32 %v5235_v53, %v5248_v38 }
 0x206   : > { %v3990_v63 = vpop.eup %3989  ;;  %v2590_v16 = vsub.f32 0.0, %v3395_v7  ;;  %v3399_v34 = vadd.f32 %v3398_v33, %v2469_v50 }
 0x207   : > { %3999 = vrcp.f32 %v2682_v55  ;;  %v2683_v23 = vadd.f32 1.0, %v3990_v63 }
 0x208   : > { %v2630_v47 = vmul.f32 1.442695, %v2590_v16  ;;  %v2591_v35 = vsub.f32 0.0, %v3399_v34 }
 0x209   : > { %v3992_v27 = vpop.eup %3991  ;;  %4001 = vrcp.f32 %v2683_v23 }
 0x20a   : > { %v5317_v62 = vmul.f32 %v3992_v27, %v5265_v24  ;;  %4003 = vpow2.f32 %v2630_v47  ;;  %v2632_v8 = vmul.f32 1.442695, %v2591_v35  ;;  %v2473_v61 = vpop.f32.mrb[20].mxu0 }
 0x20b   : > { %v3994_v57 = vpop.eup %3993  ;;  %v5321_v51 = vadd.f32 %v3400_v11, %v2473_v61  ;;  %v2475_v45 = vpop.f32.mrb[21].mxu0  ;;  %v3422_v61 = vadd.f32 %v5250_v40, %v5252_v43 }
 0x20c   : > { %v3996_v44 = vpop.eup %3995  ;;  %v5326_v0 = vmul.f32 %v3994_v57, %v5268_v39  ;;  %4005 = vpow2.f32 %v2632_v8  ;;  %v3403_v60 = vadd.f32 %v3402_v6, %v2475_v45  ;;  %v2477_v24 = vpop.f32.mrb[22].mxu0  ;;  %v3410_v39 = vadd.f32 %v5233_v21, %v5252_v43 }
 0x20d   : > { %v2684_v4 = vadd.f32 1.0, %v3996_v44  ;;  %v5328_v52 = vadd.f32 %v3404_v20, %v2477_v24  ;;  %v2479_v32 = vpop.f32.mrb[23].mxu0  ;;  %v3420_v8 = vadd.f32 %v5246_v37, %v5248_v38 }
 0x20e   : > { %v3998_v48 = vpop.eup %3997  ;;  %v2592_v58 = vsub.f32 0.0, %v3403_v60  ;;  %v3407_v18 = vadd.f32 %v3406_v15, %v2479_v32 }
 0x20f   : > { %4007 = vrcp.f32 %v2684_v4  ;;  %v2685_v1 = vadd.f32 1.0, %v3998_v48 }
 0x210   : > { %v2634_v2 = vmul.f32 1.442695, %v2592_v58  ;;  %v2593_v30 = vsub.f32 0.0, %v3407_v18 }
 0x211   : > { %v4000_v28 = vpop.eup %3999  ;;  %4009 = vrcp.f32 %v2685_v1 }
 0x212   : > { %v5335_v19 = vmul.f32 %v4000_v28, %v5276_v25  ;;  %4011 = vpow2.f32 %v2634_v2  ;;  %v2636_v5 = vmul.f32 1.442695, %v2593_v30  ;;  %v2483_v3 = vpop.f32.mrb[24].mxu0 }
 0x213   : > { %v4002_v22 = vpop.eup %4001  ;;  %v5339_v17 = vadd.f32 %v3408_v29, %v2483_v3  ;;  %v2485_v46 = vpop.f32.mrb[25].mxu0 }
 0x214   : > { %v4004_v41 = vpop.eup %4003  ;;  %v5344_v33 = vmul.f32 %v4002_v22, %v5280_v59  ;;  %4013 = vpow2.f32 %v2636_v5  ;;  %v3411_v21 = vadd.f32 %v3410_v39, %v2485_v46  ;;  %v2487_v25 = vpop.f32.mrb[26].mxu0  ;;  %v3418_v59 = vadd.f32 %v5244_v56, %v5252_v43 }
 0x215   : > { %v2686_v7 = vadd.f32 1.0, %v4004_v41  ;;  %v5346_v42 = vadd.f32 %v3412_v31, %v2487_v25  ;;  %v2489_v55 = vpop.f32.mrb[27].mxu0  ;;  %v2774_v56 = vadd.f32 %v5308_v49, %v5299_v13 }
 0x216   : > { %v4006_v50 = vpop.eup %4005  ;;  %v2594_v63 = vsub.f32 0.0, %v3411_v21  ;;  %v3415_v53 = vadd.f32 %v3414_v14, %v2489_v55 }
 0x217   : > { %4015 = vrcp.f32 %v2686_v7  ;;  %v2687_v16 = vadd.f32 1.0, %v4006_v50  ;;  %v2775_v40 = vadd.f32 %v2774_v56, %v5317_v62 }
 0x218   : > { %v2638_v34 = vmul.f32 1.442695, %v2594_v63  ;;  %v2595_v23 = vsub.f32 0.0, %v3415_v53 }
 0x219   : > { %v4008_v47 = vpop.eup %4007  ;;  %4017 = vrcp.f32 %v2687_v16 }
 0x21a   : > { %v5353_v35 = vmul.f32 %v4008_v47, %v5288_v9  ;;  %4019 = vpow2.f32 %v2638_v34  ;;  %v2640_v27 = vmul.f32 1.442695, %v2595_v23  ;;  %v2493_v11 = vpop.f32.mrb[28].mxu0 }
 0x21b   : > { %v4010_v6 = vpop.eup %4009  ;;  %v5359_v57 = vadd.f32 %v3416_v36, %v2493_v11  ;;  %v2495_v54 = vpop.f32.mrb[29].mxu0 }
 0x21c   : > { %v4012_v20 = vpop.eup %4011  ;;  %v5364_v9 = vmul.f32 %v4010_v6, %v5292_v26  ;;  %4021 = vpow2.f32 %v2640_v27  ;;  %v3419_v45 = vadd.f32 %v3418_v59, %v2495_v54  ;;  %v2497_v44 = vpop.f32.mrb[30].mxu0  ;;  %v2776_v26 = vadd.f32 %v2775_v40, %v5326_v0 }
 0x21d   : > { %v2688_v15 = vadd.f32 1.0, %v4012_v20  ;;  %v5366_v60 = vadd.f32 %v3420_v8, %v2497_v44  ;;  %v2499_v37 = vpop.f32.mrb[31].mxu0 }
 0x21e   : > { %v4014_v24 = vpop.eup %4013  ;;  %v2596_v4 = vsub.f32 0.0, %v3419_v45  ;;  %v3423_v32 = vadd.f32 %v3422_v61, %v2499_v37  ;;  %v2777_v46 = vadd.f32 %v2776_v26, %v5335_v19 }
 0x21f   : > { %4023 = vrcp.f32 %v2688_v15  ;;  %v2689_v48 = vadd.f32 1.0, %v4014_v24 }
 0x220   : > { %v2642_v58 = vmul.f32 1.442695, %v2596_v4  ;;  %v2597_v18 = vsub.f32 0.0, %v3423_v32  ;;  %v2778_v47 = vadd.f32 %v2777_v46, %v5344_v33 }
 0x221   : > { %v4016_v1 = vpop.eup %4015  ;;  %4025 = vrcp.f32 %v2689_v48  ;;  %v2117_v28 = vpop.f32.mrb[32].mxu1 }
 0x222   : > { %v5371_v2 = vmul.f32 %v4016_v1, %v5303_v12  ;;  %4027 = vpow2.f32 %v2642_v58  ;;  %v2644_v30 = vmul.f32 1.442695, %v2597_v18  ;;  %v2503_v29 = vpop.f32.mrb[32].mxu0  ;;  %v3424_v5 = vadd.f32 %v2117_v28, %v5248_v38  ;;  %v2119_v3 = vpop.f32.mrb[33].mxu1 }
 0x223   : > { %v4018_v39 = vpop.eup %4017  ;;  %v2505_v22 = vpop.f32.mrb[33].mxu0  ;;  %v3426_v14 = vadd.f32 %v2119_v3, %v5252_v43  ;;  %v2779_v11 = vadd.f32 %v2778_v47, %v5353_v35 }
 0x224   : > { %v4020_v31 = vpop.eup %4019  ;;  %v5376_v41 = vmul.f32 %v4018_v39, %v5310_v10  ;;  %4029 = vpow2.f32 %v2644_v30  ;;  %v2121_v12 = vpop.f32.mrb[34].mxu1  ;;  %v5379_v7 = vadd.f32 %v3424_v5, %v2503_v29 }
 0x225   : > { %v2507_v21 = vpop.f32.mrb[34].mxu0  ;;  %v2690_v25 = vadd.f32 1.0, %v4020_v31  ;;  %v3428_v55 = vadd.f32 %v2121_v12, %v5248_v38  ;;  %v2123_v50 = vpop.f32.mrb[35].mxu1  ;;  %v3427_v16 = vadd.f32 %v3426_v14, %v2505_v22  ;;  %v2780_v28 = vadd.f32 %v2779_v11, %v5364_v9 }
 0x226   : > { %v2509_v63 = vpop.f32.mrb[35].mxu0  ;;  %v4022_v53 = vpop.eup %4021  ;;  %v3430_v34 = vadd.f32 %v2123_v50, %v5252_v43 }
 0x227   : > { %4031 = vrcp.f32 %v2690_v25  ;;  %v2691_v23 = vadd.f32 1.0, %v4022_v53  ;;  %v5383_v10 = vadd.f32 %v3428_v55, %v2507_v21  ;;  %v2598_v36 = vsub.f32 0.0, %v3427_v16 }
 0x228   : > { %v3431_v59 = vadd.f32 %v3430_v34, %v2509_v63  ;;  %v2781_v3 = vadd.f32 %v2780_v28, %v5371_v2 }
 0x229   : > { %v4024_v27 = vpop.eup %4023  ;;  %4033 = vrcp.f32 %v2691_v23  ;;  %v2646_v8 = vmul.f32 1.442695, %v2598_v36  ;;  %v2127_v54 = vpop.f32.mrb[36].mxu1 }
 0x22a   : > { %v5388_v6 = vmul.f32 %v4024_v27, %v5321_v51  ;;  %v2599_v61 = vsub.f32 0.0, %v3431_v59  ;;  %v2513_v20 = vpop.f32.mrb[36].mxu0  ;;  %v3432_v45 = vadd.f32 %v2127_v54, %v5248_v38  ;;  %v2129_v44 = vpop.f32.mrb[37].mxu1  ;;  %v2782_v34 = vadd.f32 %v2781_v3, %v5376_v41 }
 0x22b   : > { %v4026_v56 = vpop.eup %4025  ;;  %v2515_v15 = vpop.f32.mrb[37].mxu0  ;;  %4035 = vpow2.f32 %v2646_v8  ;;  %v3434_v58 = vadd.f32 %v2129_v44, %v5252_v43 }
 0x22c   : > { %v4028_v37 = vpop.eup %4027  ;;  %v5392_v24 = vmul.f32 %v4026_v56, %v5328_v52  ;;  %v2648_v40 = vmul.f32 1.442695, %v2599_v61  ;;  %v2131_v4 = vpop.f32.mrb[38].mxu1  ;;  %v5394_v51 = vadd.f32 %v3432_v45, %v2513_v20  ;;  %v2783_v20 = vadd.f32 %v2782_v34, %v5388_v6 }
 0x22d   : > { %v2517_v32 = vpop.f32.mrb[38].mxu0  ;;  %v2692_v48 = vadd.f32 1.0, %v4028_v37  ;;  %v3436_v18 = vadd.f32 %v2131_v4, %v5248_v38  ;;  %v2133_v1 = vpop.f32.mrb[39].mxu1  ;;  %v3435_v39 = vadd.f32 %v3434_v58, %v2515_v15 }
 0x22e   : > { %v2519_v26 = vpop.f32.mrb[39].mxu0  ;;  %v4030_v30 = vpop.eup %4029  ;;  %4037 = vpow2.f32 %v2648_v40  ;;  %v3438_v52 = vadd.f32 %v2133_v1, %v5252_v43 }
 0x22f   : > { %4039 = vrcp.f32 %v2692_v48  ;;  %v2693_v29 = vadd.f32 1.0, %v4030_v30  ;;  %v5400_v5 = vadd.f32 %v3436_v18, %v2517_v32  ;;  %v2600_v46 = vsub.f32 0.0, %v3435_v39 }
 0x230   : > { %v3439_v22 = vadd.f32 %v3438_v52, %v2519_v26  ;;  %v2784_v48 = vadd.f32 %v2783_v20, %v5392_v24 }
 0x231   : > { %v4032_v31 = vpop.eup %4031  ;;  %4041 = vrcp.f32 %v2693_v29  ;;  %v2137_v21 = vpop.f32.mrb[40].mxu1  ;;  %v2650_v50 = vmul.f32 1.442695, %v2600_v46 }
 0x232   : > { %v5404_v14 = vmul.f32 %v4032_v31, %v5339_v17  ;;  %v2601_v12 = vsub.f32 0.0, %v3439_v22  ;;  %v2523_v25 = vpop.f32.mrb[40].mxu0  ;;  %v3440_v63 = vadd.f32 %v2137_v21, %v5248_v38  ;;  %v2139_v53 = vpop.f32.mrb[41].mxu1 }
 0x233   : > { %v4034_v55 = vpop.eup %4033  ;;  %v2525_v16 = vpop.f32.mrb[41].mxu0  ;;  %v3442_v36 = vadd.f32 %v2139_v53, %v5252_v43  ;;  %4043 = vpow2.f32 %v2650_v50 }
 0x234   : > { %v5409_v23 = vmul.f32 %v4034_v55, %v5346_v42  ;;  %v2652_v47 = vmul.f32 1.442695, %v2601_v12  ;;  %v2141_v59 = vpop.f32.mrb[42].mxu1  ;;  %v2527_v17 = vpop.f32.mrb[42].mxu0  ;;  %v5412_v27 = vadd.f32 %v3440_v63, %v2523_v25  ;;  %v2785_v3 = vadd.f32 %v2784_v48, %v5404_v14 }
 0x235   : > { %v3444_v11 = vadd.f32 %v2141_v59, %v5248_v38  ;;  %v2143_v8 = vpop.f32.mrb[43].mxu1  ;;  %v2529_v61 = vpop.f32.mrb[43].mxu0  ;;  %v3443_v56 = vadd.f32 %v3442_v36, %v2525_v16 }
 0x236   : > { %v4036_v54 = vpop.eup %4035  ;;  %4045 = vpow2.f32 %v2652_v47  ;;  %v3446_v42 = vadd.f32 %v2143_v8, %v5252_v43  ;;  %v2786_v47 = vadd.f32 %v2785_v3, %v5409_v23 }
 0x237   : > { %v2694_v45 = vadd.f32 1.0, %v4036_v54  ;;  %v5417_v44 = vadd.f32 %v3444_v11, %v2527_v17  ;;  %v2602_v37 = vsub.f32 0.0, %v3443_v56 }
 0x238   : > { %v4038_v15 = vpop.eup %4037  ;;  %v3447_v40 = vadd.f32 %v3446_v42, %v2529_v61 }
 0x239   : > { %v4040_v4 = vpop.eup %4039  ;;  %4047 = vrcp.f32 %v2694_v45  ;;  %v2695_v32 = vadd.f32 1.0, %v4038_v15  ;;  %v2654_v18 = vmul.f32 1.442695, %v2602_v37  ;;  %v2147_v26 = vpop.f32.mrb[44].mxu1 }
 0x23a   : > { %v5421_v58 = vmul.f32 %v4040_v4, %v5359_v57  ;;  %v2603_v1 = vsub.f32 0.0, %v3447_v40  ;;  %v2533_v30 = vpop.f32.mrb[44].mxu0  ;;  %v3448_v52 = vadd.f32 %v2147_v26, %v5248_v38  ;;  %v2149_v29 = vpop.f32.mrb[45].mxu1 }
 0x23b   : > { %v4042_v28 = vpop.eup %4041  ;;  %4049 = vrcp.f32 %v2695_v32  ;;  %v2535_v39 = vpop.f32.mrb[45].mxu0  ;;  %v3450_v21 = vadd.f32 %v2149_v29, %v5252_v43 }
 0x23c   : > { %v5426_v22 = vmul.f32 %v4042_v28, %v5366_v60  ;;  %4051 = vpow2.f32 %v2654_v18  ;;  %v2656_v31 = vmul.f32 1.442695, %v2603_v1  ;;  %v2151_v46 = vpop.f32.mrb[46].mxu1  ;;  %v2537_v57 = vpop.f32.mrb[46].mxu0  ;;  %v5428_v12 = vadd.f32 %v3448_v52, %v2533_v30 }
 0x23d   : > { %v3452_v25 = vadd.f32 %v2151_v46, %v5248_v38  ;;  %v2153_v55 = vpop.f32.mrb[47].mxu1  ;;  %v2539_v50 = vpop.f32.mrb[47].mxu0  ;;  %v3451_v16 = vadd.f32 %v3450_v21, %v2535_v39  ;;  %v2787_v8 = vadd.f32 %v2786_v47, %v5421_v58 }
 0x23e   : > { %4053 = vpow2.f32 %v2656_v31  ;;  %v3454_v63 = vadd.f32 %v2153_v55, %v5252_v43  ;;  %v4044_v53 = vpop.eup %4043 }
 0x23f   : > { %v5433_v34 = vadd.f32 %v3452_v25, %v2537_v57  ;;  %v2696_v36 = vadd.f32 1.0, %v4044_v53  ;;  %v2604_v11 = vsub.f32 0.0, %v3451_v16  ;;  %v2788_v39 = vadd.f32 %v2787_v8, %v5426_v22 }
 0x240   : > { %v4046_v60 = vpop.eup %4045  ;;  %v3455_v59 = vadd.f32 %v3454_v63, %v2539_v50 }
 0x241   : > { %v2697_v17 = vadd.f32 1.0, %v4046_v60  ;;  %4055 = vrcp.f32 %v2696_v36  ;;  %v2157_v54 = vpop.f32.mrb[48].mxu1  ;;  %v2658_v42 = vmul.f32 1.442695, %v2604_v11 }
 0x242   : > { %v2605_v61 = vsub.f32 0.0, %v3455_v59  ;;  %v2543_v20 = vpop.f32.mrb[48].mxu0  ;;  %v3456_v45 = vadd.f32 %v2157_v54, %v5248_v38  ;;  %v2159_v15 = vpop.f32.mrb[49].mxu1 }
 0x243   : > { %v4048_v56 = vpop.eup %4047  ;;  %4057 = vrcp.f32 %v2697_v17  ;;  %v2545_v37 = vpop.f32.mrb[49].mxu0  ;;  %v3458_v32 = vadd.f32 %v2159_v15, %v5252_v43 }
 0x244   : > { %v5439_v40 = vmul.f32 %v4048_v56, %v5379_v7  ;;  %v2660_v4 = vmul.f32 1.442695, %v2605_v61  ;;  %v2161_v48 = vpop.f32.mrb[50].mxu1  ;;  %v2547_v18 = vpop.f32.mrb[50].mxu0  ;;  %4059 = vpow2.f32 %v2658_v42  ;;  %v5442_v26 = vadd.f32 %v3456_v45, %v2543_v20 }
 0x245   : > { %v4050_v1 = vpop.eup %4049  ;;  %v3460_v30 = vadd.f32 %v2161_v48, %v5248_v38  ;;  %v2163_v28 = vpop.f32.mrb[51].mxu1  ;;  %v3459_v7 = vadd.f32 %v3458_v32, %v2545_v37 }
 0x246   : > { %v2549_v52 = vpop.f32.mrb[51].mxu0  ;;  %v4052_v29 = vpop.eup %4051  ;;  %v5447_v3 = vmul.f32 %v4050_v1, %v5383_v10  ;;  %4061 = vpow2.f32 %v2660_v4  ;;  %v3462_v57 = vadd.f32 %v2163_v28, %v5252_v43  ;;  %v2789_v25 = vadd.f32 %v2788_v39, %v5439_v40 }
 0x247   : > { %v2698_v31 = vadd.f32 1.0, %v4052_v29  ;;  %v5449_v46 = vadd.f32 %v3460_v30, %v2547_v18  ;;  %v2606_v55 = vsub.f32 0.0, %v3459_v7 }
 0x248   : > { %v4054_v21 = vpop.eup %4053  ;;  %v3463_v63 = vadd.f32 %v3462_v57, %v2549_v52  ;;  %v2790_v11 = vadd.f32 %v2789_v25, %v5447_v3 }
 0x249   : > { %4063 = vrcp.f32 %v2698_v31  ;;  %v2699_v50 = vadd.f32 1.0, %v4054_v21  ;;  %v2662_v53 = vmul.f32 1.442695, %v2606_v55  ;;  %v2167_v16 = vpop.f32.mrb[52].mxu1 }
 0x24a   : > { %v2553_v60 = vpop.f32.mrb[52].mxu0  ;;  %v2607_v10 = vsub.f32 0.0, %v3463_v63  ;;  %v3464_v47 = vadd.f32 %v2167_v16, %v5248_v38  ;;  %v2169_v36 = vpop.f32.mrb[53].mxu1 }
 0x24b   : > { %4065 = vrcp.f32 %v2699_v50  ;;  %v2555_v59 = vpop.f32.mrb[53].mxu0  ;;  %v4056_v17 = vpop.eup %4055  ;;  %v3466_v8 = vadd.f32 %v2169_v36, %v5252_v43 }
 0x24c   : > { %4067 = vpow2.f32 %v2662_v53  ;;  %v2171_v61 = vpop.f32.mrb[54].mxu1  ;;  %v2557_v54 = vpop.f32.mrb[54].mxu0  ;;  %v5457_v56 = vmul.f32 %v4056_v17, %v5394_v51  ;;  %v2664_v42 = vmul.f32 1.442695, %v2607_v10  ;;  %v5459_v45 = vadd.f32 %v3464_v47, %v2553_v60 }
 0x24d   : > { %v4058_v20 = vpop.eup %4057  ;;  %v3468_v15 = vadd.f32 %v2171_v61, %v5248_v38  ;;  %v2173_v37 = vpop.f32.mrb[55].mxu1  ;;  %v3467_v48 = vadd.f32 %v3466_v8, %v2555_v59 }
 0x24e   : > { %v2559_v4 = vpop.f32.mrb[55].mxu0  ;;  %v5463_v32 = vmul.f32 %v4058_v20, %v5400_v5  ;;  %v3470_v18 = vadd.f32 %v2173_v37, %v5252_v43  ;;  %v4060_v1 = vpop.eup %4059  ;;  %v2791_v30 = vadd.f32 %v2790_v11, %v5457_v56  ;;  %4069 = vpow2.f32 %v2664_v42 }
 0x24f   : > { %v5467_v28 = vadd.f32 %v3468_v15, %v2557_v54  ;;  %v2700_v52 = vadd.f32 1.0, %v4060_v1  ;;  %v2608_v29 = vsub.f32 0.0, %v3467_v48 }
 0x250   : > { %v4062_v51 = vpop.eup %4061  ;;  %v3471_v39 = vadd.f32 %v3470_v18, %v2559_v4  ;;  %v2792_v55 = vadd.f32 %v2791_v30, %v5463_v32 }
 0x251   : > { %v2701_v7 = vadd.f32 1.0, %v4062_v51  ;;  %4071 = vrcp.f32 %v2700_v52  ;;  %v2666_v31 = vmul.f32 1.442695, %v2608_v29  ;;  %v2177_v21 = vpop.f32.mrb[56].mxu1 }
 0x252   : > { %v2609_v57 = vsub.f32 0.0, %v3471_v39  ;;  %v2563_v5 = vpop.f32.mrb[56].mxu0  ;;  %v3472_v50 = vadd.f32 %v2177_v21, %v5248_v38  ;;  %v2179_v63 = vpop.f32.mrb[57].mxu1 }
 0x253   : > { %v4064_v25 = vpop.eup %4063  ;;  %4073 = vrcp.f32 %v2701_v7  ;;  %v2565_v53 = vpop.f32.mrb[57].mxu0  ;;  %v3474_v10 = vadd.f32 %v2179_v63, %v5252_v43 }
 0x254   : > { %v5472_v16 = vmul.f32 %v4064_v25, %v5412_v27  ;;  %4075 = vpow2.f32 %v2666_v31  ;;  %v2668_v60 = vmul.f32 1.442695, %v2609_v57  ;;  %v2181_v47 = vpop.f32.mrb[58].mxu1  ;;  %v2567_v36 = vpop.f32.mrb[58].mxu0  ;;  %v5475_v17 = vadd.f32 %v3472_v50, %v2563_v5 }
 0x255   : > { %v4066_v59 = vpop.eup %4065  ;;  %v3476_v11 = vadd.f32 %v2181_v47, %v5248_v38  ;;  %v2183_v8 = vpop.f32.mrb[59].mxu1  ;;  %v3475_v27 = vadd.f32 %v3474_v10, %v2565_v53 }
 0x256   : > { %v2569_v61 = vpop.f32.mrb[59].mxu0  ;;  %v4068_v54 = vpop.eup %4067  ;;  %v2793_v20 = vadd.f32 %v2792_v55, %v5472_v16  ;;  %v5480_v42 = vmul.f32 %v4066_v59, %v5417_v44  ;;  %4077 = vpow2.f32 %v2668_v60  ;;  %v3478_v4 = vadd.f32 %v2183_v8, %v5252_v43 }
 0x257   : > { %v2702_v15 = vadd.f32 1.0, %v4068_v54  ;;  %v5482_v37 = vadd.f32 %v3476_v11, %v2567_v36  ;;  %v2610_v18 = vsub.f32 0.0, %v3475_v27 }
 0x258   : > { %v2794_v48 = vadd.f32 %v2793_v20, %v5480_v42  ;;  %v4070_v1 = vpop.eup %4069  ;;  %v3479_v30 = vadd.f32 %v3478_v4, %v2569_v61 }
 0x259   : > { %4079 = vrcp.f32 %v2702_v15  ;;  %v2703_v51 = vadd.f32 1.0, %v4070_v1  ;;  %v2670_v52 = vmul.f32 1.442695, %v2610_v18  ;;  %v2187_v29 = vpop.f32.mrb[60].mxu1 }
 0x25a   : > { %v2573_v39 = vpop.f32.mrb[60].mxu0  ;;  %v2611_v7 = vsub.f32 0.0, %v3479_v30  ;;  %v3480_v44 = vadd.f32 %v2187_v29, %v5248_v38  ;;  %v2189_v31 = vpop.f32.mrb[61].mxu1 }
 0x25b   : > { %v2575_v57 = vpop.f32.mrb[61].mxu0  ;;  %v4072_v21 = vpop.eup %4071  ;;  %4081 = vrcp.f32 %v2703_v51  ;;  %v3482_v5 = vadd.f32 %v2189_v31, %v5252_v43 }
 0x25c   : > { %v2191_v25 = vpop.f32.mrb[62].mxu1  ;;  %v2577_v55 = vpop.f32.mrb[62].mxu0  ;;  %v5489_v63 = vmul.f32 %v4072_v21, %v5428_v12  ;;  %4083 = vpow2.f32 %v2670_v52  ;;  %v2672_v53 = vmul.f32 1.442695, %v2611_v7  ;;  %v3481_v60 = vadd.f32 %v3480_v44, %v2573_v39 }
 0x25d   : > { %v4074_v50 = vpop.eup %4073  ;;  %v2193_v10 = vpop.f32.mrb[63].mxu1  ;;  %v3483_v11 = vadd.f32 %v3482_v5, %v2575_v57  ;;  %v3484_v8 = vadd.f32 %v2191_v25, %v5248_v38 }
 0x25e   : > { %v2579_v47 = vpop.f32.mrb[63].mxu0  ;;  %v4076_v36 = vpop.eup %4075  ;;  %v5492_v59 = vmul.f32 %v4074_v50, %v5433_v34  ;;  %v3486_v61 = vadd.f32 %v2193_v10, %v5252_v43  ;;  %v2795_v54 = vadd.f32 %v2794_v48, %v5489_v63  ;;  %4085 = vpow2.f32 %v2672_v53 }
 0x25f   : > { %v2704_v20 = vadd.f32 1.0, %v4076_v36  ;;  %v2612_v27 = vsub.f32 0.0, %v3483_v11  ;;  %v3485_v15 = vadd.f32 %v3484_v8, %v2577_v55 }
 0x260   : > { %v4078_v12 = vpop.eup %4077  ;;  %v3487_v4 = vadd.f32 %v3486_v61, %v2579_v47  ;;  %v2796_v18 = vadd.f32 %v2795_v54, %v5492_v59 }
 0x261   : > { %4087 = vrcp.f32 %v2704_v20  ;;  %v2705_v1 = vadd.f32 1.0, %v4078_v12  ;;  %v2674_v30 = vmul.f32 1.442695, %v2612_v27 }
 0x262   : > { %v2613_v34 = vsub.f32 0.0, %v3487_v4 }
 0x263   : > { %v4080_v51 = vpop.eup %4079  ;;  %4089 = vrcp.f32 %v2705_v1 }
 0x264   : > { %v2766_v38 = vmul.f32 %v4080_v51, %v5442_v26  ;;  %4091 = vpow2.f32 %v2674_v30  ;;  %v2676_v43 = vmul.f32 1.442695, %v2613_v34 }
 0x265   : > { %v4082_v52 = vpop.eup %4081 }
 0x266   : > { %v2797_v48 = vadd.f32 %v2796_v18, %v2766_v38  ;;  %4093 = vpow2.f32 %v2676_v43  ;;  %v4084_v29 = vpop.eup %4083  ;;  %v2767_v39 = vmul.f32 %v4082_v52, %v5449_v46 }
 0x267   : > { %v2706_v7 = vadd.f32 1.0, %v4084_v29 }
 0x268   : > { %v4086_v44 = vpop.eup %4085  ;;  %v2798_v31 = vadd.f32 %v2797_v48, %v2767_v39 }
 0x269   : > { %4095 = vrcp.f32 %v2706_v7  ;;  %v2707_v57 = vadd.f32 1.0, %v4086_v44 }
 0x26b   : > { %v4088_v21 = vpop.eup %4087  ;;  %4097 = vrcp.f32 %v2707_v57 }
 0x26c   : > { %v2768_v5 = vmul.f32 %v4088_v21, %v5459_v45 }
 0x26d   : > { %v4090_v25 = vpop.eup %4089 }
 0x26e   : > { %v4092_v55 = vpop.eup %4091  ;;  %v2799_v26 = vadd.f32 %v2798_v31, %v2768_v5  ;;  %v2769_v50 = vmul.f32 %v4090_v25, %v5467_v28 }
 0x26f   : > { %v2708_v53 = vadd.f32 1.0, %v4092_v55 }
 0x270   : > { %v4094_v10 = vpop.eup %4093  ;;  %v2800_v47 = vadd.f32 %v2799_v26, %v2769_v50 }
 0x271   : > { %4099 = vrcp.f32 %v2708_v53  ;;  %v2709_v36 = vadd.f32 1.0, %v4094_v10 }
 0x273   : > { %4101 = vrcp.f32 %v2709_v36  ;;  %v4096_v46 = vpop.eup %4095 }
 0x274   : > { %v2770_v11 = vmul.f32 %v4096_v46, %v5475_v17 }
 0x275   : > { %v4098_v8 = vpop.eup %4097 }
 0x276   : > { %v2801_v61 = vadd.f32 %v2800_v47, %v2770_v11  ;;  %v2771_v54 = vmul.f32 %v4098_v8, %v5482_v37 }
 0x278   : > { %v2802_v45 = vadd.f32 %v2801_v61, %v2771_v54 }
 0x27b   : > { %v4100_v20 = vpop.eup %4099 }
 0x27c   : > { %v2772_v12 = vmul.f32 %v4100_v20, %v3481_v60 }
 0x27d   : > { %v4102_v27 = vpop.eup %4101 }
 0x27e   : > { %v2803_v4 = vadd.f32 %v2802_v45, %v2772_v12  ;;  %v2773_v18 = vmul.f32 %v4102_v27, %v3485_v15 }
 0x280   : > { %v2804_v28 = vadd.f32 %v2803_v4, %v2773_v18 }
 0x282   : > { %v2805_v1 = vrot.slane %v2804_v28, 4 }
 0x284   : > { %v2806_v30 = vadd.f32 %v2805_v1, %v2804_v28 }
 0x286   : > { %v2807_v34 = vrot.slane %v2806_v30, 2 }
 0x288   : > { %v2808_v51 = vadd.f32 %v2807_v34, %v2806_v30 }
 0x28a   : > { %v2809_v43 = vrot.slane %v2808_v51, 1 }
 0x28c   : > { %v2810_v52 = vadd.f32 %v2809_v43, %v2808_v51 }
 0x28e   : > { %v5504_v48 = vmul.f32 0.00390625, %v2810_v52 }
 0x290   : > { %v5508_v17 = vsub.f32 %v5472_v16, %v5504_v48  ;;  %v5512_v37 = vsub.f32 %v5480_v42, %v5504_v48  ;;  %v5516_v60 = vsub.f32 %v5489_v63, %v5504_v48  ;;  %v5520_v15 = vsub.f32 %v5492_v59, %v5504_v48 }
 0x291   : > { %v5523_v29 = vsub.f32 %v2766_v38, %v5504_v48  ;;  %v5526_v7 = vsub.f32 %v2767_v39, %v5504_v48  ;;  %v5529_v16 = vsub.f32 %v2768_v5, %v5504_v48  ;;  %v5532_v42 = vsub.f32 %v2769_v50, %v5504_v48 }
 0x292   : > { %v5535_v44 = vsub.f32 %v2770_v11, %v5504_v48  ;;  %v5538_v63 = vsub.f32 %v2771_v54, %v5504_v48  ;;  %v5541_v59 = vsub.f32 %v2772_v12, %v5504_v48  ;;  %v5544_v38 = vsub.f32 %v2773_v18, %v5504_v48 }
 0x293   : > { %v5548_v39 = vsub.f32 %v5299_v13, %v5504_v48  ;;  %v5552_v31 = vsub.f32 %v5308_v49, %v5504_v48  ;;  %v5556_v57 = vsub.f32 %v5317_v62, %v5504_v48  ;;  %v5564_v25 = vsub.f32 %v5326_v0, %v5504_v48 }
 0x294   : > { %v5568_v13 = vsub.f32 %v5335_v19, %v5504_v48  ;;  %v5574_v62 = vsub.f32 %v5344_v33, %v5504_v48  ;;  %v5580_v0 = vsub.f32 %v5353_v35, %v5504_v48  ;;  %v5586_v10 = vsub.f32 %v5364_v9, %v5504_v48 }
 0x295   : > { %v2845_v21 = vmul.f32 %v5548_v39, %v5548_v39  ;;  %v2846_v5 = vmul.f32 %v5552_v31, %v5552_v31  ;;  %v2847_v49 = vmul.f32 %v5556_v57, %v5556_v57  ;;  %v2848_v26 = vmul.f32 %v5564_v25, %v5564_v25 }
 0x296   : > { %v2849_v19 = vmul.f32 %v5568_v13, %v5568_v13  ;;  %v2850_v33 = vmul.f32 %v5574_v62, %v5574_v62  ;;  %v5592_v36 = vsub.f32 %v5371_v2, %v5504_v48  ;;  %v2851_v35 = vmul.f32 %v5580_v0, %v5580_v0 }
 0x297   : > { %v2877_v55 = vadd.f32 %v2846_v5, %v2845_v21  ;;  %v5598_v11 = vsub.f32 %v5376_v41, %v5504_v48  ;;  %v2852_v9 = vmul.f32 %v5586_v10, %v5586_v10  ;;  %v5604_v61 = vsub.f32 %v5388_v6, %v5504_v48 }
 0x298   : > { %v2853_v2 = vmul.f32 %v5592_v36, %v5592_v36  ;;  %v5610_v45 = vsub.f32 %v5392_v24, %v5504_v48  ;;  %v5616_v12 = vsub.f32 %v5404_v14, %v5504_v48  ;;  %v5622_v4 = vsub.f32 %v5409_v23, %v5504_v48 }
 0x299   : > { %v2878_v50 = vadd.f32 %v2877_v55, %v2847_v49  ;;  %v2854_v41 = vmul.f32 %v5598_v11, %v5598_v11  ;;  %v2855_v6 = vmul.f32 %v5604_v61, %v5604_v61  ;;  %v5628_v28 = vsub.f32 %v5421_v58, %v5504_v48 }
 0x29a   : > { %v2856_v24 = vmul.f32 %v5610_v45, %v5610_v45  ;;  %v2857_v14 = vmul.f32 %v5616_v12, %v5616_v12  ;;  %v5634_v30 = vsub.f32 %v5426_v22, %v5504_v48  ;;  %v2858_v23 = vmul.f32 %v5622_v4, %v5622_v4 }
 0x29b   : > { %v2879_v53 = vadd.f32 %v2878_v50, %v2848_v26  ;;  %v5640_v51 = vsub.f32 %v5439_v40, %v5504_v48  ;;  %v2859_v58 = vmul.f32 %v5628_v28, %v5628_v28  ;;  %v5646_v52 = vsub.f32 %v5447_v3, %v5504_v48 }
 0x29c   : > { %v2860_v22 = vmul.f32 %v5634_v30, %v5634_v30  ;;  %v5652_v5 = vsub.f32 %v5457_v56, %v5504_v48  ;;  %v5658_v55 = vsub.f32 %v5463_v32, %v5504_v48  ;;  %v2866_v32 = vmul.f32 %v5512_v37, %v5512_v37 }
 0x29d   : > { %v2880_v47 = vadd.f32 %v2879_v53, %v2849_v19  ;;  %v2861_v40 = vmul.f32 %v5640_v51, %v5640_v51  ;;  %v2862_v3 = vmul.f32 %v5646_v52, %v5646_v52 }
 0x29e   : > { %v2863_v50 = vmul.f32 %v5652_v5, %v5652_v5  ;;  %v2864_v56 = vmul.f32 %v5658_v55, %v5658_v55 }
 0x29f   : > { %v2881_v46 = vadd.f32 %v2880_v47, %v2850_v33  ;;  %v2865_v33 = vmul.f32 %v5508_v17, %v5508_v17 }
 0x2a1   : > { %v2882_v8 = vadd.f32 %v2881_v46, %v2851_v35  ;;  %v2867_v35 = vmul.f32 %v5516_v60, %v5516_v60 }
 0x2a3   : > { %v2883_v54 = vadd.f32 %v2882_v8, %v2852_v9  ;;  %v2868_v9 = vmul.f32 %v5520_v15, %v5520_v15 }
 0x2a5   : > { %v2884_v20 = vadd.f32 %v2883_v54, %v2853_v2  ;;  %v2869_v2 = vmul.f32 %v5523_v29, %v5523_v29 }
 0x2a7   : > { %v2885_v27 = vadd.f32 %v2884_v20, %v2854_v41  ;;  %v2870_v41 = vmul.f32 %v5526_v7, %v5526_v7 }
 0x2a9   : > { %v2886_v18 = vadd.f32 %v2885_v27, %v2855_v6  ;;  %v2871_v6 = vmul.f32 %v5529_v16, %v5529_v16 }
 0x2ab   : > { %v2887_v1 = vadd.f32 %v2886_v18, %v2856_v24  ;;  %v2872_v24 = vmul.f32 %v5532_v42, %v5532_v42 }
 0x2ad   : > { %v2888_v34 = vadd.f32 %v2887_v1, %v2857_v14  ;;  %v2873_v14 = vmul.f32 %v5535_v44, %v5535_v44 }
 0x2af   : > { %v2889_v43 = vadd.f32 %v2888_v34, %v2858_v23  ;;  %v2874_v23 = vmul.f32 %v5538_v63, %v5538_v63 }
 0x2b1   : > { %v2890_v21 = vadd.f32 %v2889_v43, %v2859_v58  ;;  %v2875_v58 = vmul.f32 %v5541_v59, %v5541_v59 }
 0x2b3   : > { %v2891_v49 = vadd.f32 %v2890_v21, %v2860_v22  ;;  %v2876_v22 = vmul.f32 %v5544_v38, %v5544_v38 }
 0x2b5   : > { %v2892_v26 = vadd.f32 %v2891_v49, %v2861_v40 }
 0x2b7   : > { %v2893_v19 = vadd.f32 %v2892_v26, %v2862_v3 }
 0x2b9   : > { %v2894_v53 = vadd.f32 %v2893_v19, %v2863_v50 }
 0x2bb   : > { %v2895_v47 = vadd.f32 %v2894_v53, %v2864_v56 }
 0x2bd   : > { %v2896_v48 = vadd.f32 %v2895_v47, %v2865_v33 }
 0x2bf   : > { %v2897_v46 = vadd.f32 %v2896_v48, %v2866_v32  ;;  %v2980_v32 = vld [vmem:[%s5695_s11 + $0xf8] sm:$0xff] }
 0x2c1   : > { %v2898_v8 = vadd.f32 %v2897_v46, %v2867_v35 }
 0x2c3   : > { %v2899_v54 = vadd.f32 %v2898_v8, %v2868_v9 }
 0x2c5   : > { %v2900_v20 = vadd.f32 %v2899_v54, %v2869_v2 }
 0x2c7   : > { %v2901_v27 = vadd.f32 %v2900_v20, %v2870_v41 }
 0x2c9   : > { %v2902_v18 = vadd.f32 %v2901_v27, %v2871_v6  ;;  %v2950_v6 = vld [vmem:[%s5695_s11 + $0x8] sm:$0xff] }
 0x2cb   : > { %v2903_v1 = vadd.f32 %v2902_v18, %v2872_v24  ;;  %v2952_v24 = vld [vmem:[%s5695_s11 + $0x18] sm:$0xff] }
 0x2cd   : > { %v2904_v34 = vadd.f32 %v2903_v1, %v2873_v14  ;;  %v2957_v14 = vld [vmem:[%s5695_s11 + $0x40] sm:$0xff]  ;;  %v2958_v1 = vld [vmem:[%s5695_s11 + $0x48] sm:$0xff] }
 0x2cf   : > { %v2905_v43 = vadd.f32 %v2904_v34, %v2874_v23 }
 0x2d1   : > { %v2906_v21 = vadd.f32 %v2905_v43, %v2875_v58  ;;  %v2961_v58 = vld [vmem:[%s5695_s11 + $0x60] sm:$0xff] }
 0x2d3   : > { %v2907_v40 = vadd.f32 %v2906_v21, %v2876_v22  ;;  %v2964_v21 = vld [vmem:[%s5695_s11 + $0x78] sm:$0xff] }
 0x2d5   : > { %v2908_v49 = vrot.slane %v2907_v40, 4 }
 0x2d7   : > { %v2909_v3 = vadd.f32 %v2908_v49, %v2907_v40  ;;  %v2966_v49 = vld [vmem:[%s5695_s11 + $0x88] sm:$0xff] }
 0x2d9   : > { %v2910_v26 = vrot.slane %v2909_v3, 2 }
 0x2db   : > { %v2911_v50 = vadd.f32 %v2910_v26, %v2909_v3  ;;  %v2967_v3 = vld [vmem:[%s5695_s11 + $0x90] sm:$0xff] }
 0x2dd   : > { %v2912_v19 = vrot.slane %v2911_v50, 1 }
 0x2df   : > { %v2913_v56 = vadd.f32 %v2912_v19, %v2911_v50  ;;  %v2968_v19 = vld [vmem:[%s5695_s11 + $0x98] sm:$0xff] }
 0x2e1   : > { %v2914_v53 = vmul.f32 0.00390625, %v2913_v56  ;;  %v2970_v56 = vld [vmem:[%s5695_s11 + $0xa8] sm:$0xff] }
 0x2e3   : > { %v2915_v33 = vadd.f32 1e-05, %v2914_v53 }
 0x2e5   : > { %4103 = vrsqrt.f32 %v2915_v33 }
 0x2ef   : > { %v4104_v47 = vpop.eup %4103 }
 0x2f0   : > { %v2948_v48 = vmul.f32 %v4104_v47, %v5544_v38  ;;  %v2917_v35 = vmul.f32 %v4104_v47, %v5548_v39  ;;  %v2918_v46 = vmul.f32 %v4104_v47, %v5552_v31  ;;  %v2919_v9 = vmul.f32 %v4104_v47, %v5556_v57  ;;  %v2949_v57 = vld [vmem:[%s5695_s11] sm:$0xff] }
 0x2f1   : > { %v2920_v8 = vmul.f32 %v4104_v47, %v5564_v25  ;;  %v2921_v2 = vmul.f32 %v4104_v47, %v5568_v13  ;;  %v2922_v54 = vmul.f32 %v4104_v47, %v5574_v62  ;;  %v2923_v41 = vmul.f32 %v4104_v47, %v5580_v0  ;;  %v2951_v25 = vld [vmem:[%s5695_s11 + $0x10] sm:$0xff] }
 0x2f2   : > { %v3012_v20 = vadd.f32 %v2980_v32, %v2948_v48  ;;  %v2924_v38 = vmul.f32 %v4104_v47, %v5586_v10  ;;  %v2925_v39 = vmul.f32 %v4104_v47, %v5592_v36  ;;  %v2926_v31 = vmul.f32 %v4104_v47, %v5598_v11  ;;  %v2953_v10 = vld [vmem:[%s5695_s11 + $0x20] sm:$0xff]  ;;  %v2954_v36 = vld [vmem:[%s5695_s11 + $0x28] sm:$0xff]  ;;  %v2955_v11 = vld [vmem:[%s5695_s11 + $0x30] sm:$0xff] }
 0x2f3   : > { %v2927_v13 = vmul.f32 %v4104_v47, %v5604_v61  ;;  %v2928_v62 = vmul.f32 %v4104_v47, %v5610_v45  ;;  %v2929_v27 = vmul.f32 %v4104_v47, %v5616_v12  ;;  %v2930_v0 = vmul.f32 %v4104_v47, %v5622_v4  ;;  %v2956_v4 = vld [vmem:[%s5695_s11 + $0x38] sm:$0xff]  ;;  %v2971_v48 = vld [vmem:[%s5695_s11 + $0xb0] sm:$0xff] }
 0x2f4   : > { %3044 = vst [vmem:[%s5722_s7 + $0xf8] sm:$0xff] %v3012_v20  ;;  %v2931_v61 = vmul.f32 %v4104_v47, %v5628_v28  ;;  %v5727_v18 = vmul.f32 %v4104_v47, %v5634_v30  ;;  %v5730_v45 = vmul.f32 %v4104_v47, %v5640_v51  ;;  %v5733_v12 = vmul.f32 %v4104_v47, %v5646_v52  ;;  %v2959_v51 = vld [vmem:[%s5695_s11 + $0x50] sm:$0xff]  ;;  %v2960_v52 = vld [vmem:[%s5695_s11 + $0x58] sm:$0xff] }
 0x2f5   : > { %v2935_v23 = vmul.f32 %v4104_v47, %v5652_v5  ;;  %v5740_v34 = vmul.f32 %v4104_v47, %v5658_v55  ;;  %v5743_v28 = vmul.f32 %v4104_v47, %v5508_v17  ;;  %v5746_v30 = vmul.f32 %v4104_v47, %v5512_v37  ;;  %v2962_v37 = vld [vmem:[%s5695_s11 + $0x68] sm:$0xff]  ;;  %v2963_v55 = vld [vmem:[%s5695_s11 + $0x70] sm:$0xff]  ;;  %v2972_v20 = vld [vmem:[%s5695_s11 + $0xb8] sm:$0xff] }
 0x2f6   : > { %v2939_v43 = vmul.f32 %v4104_v47, %v5516_v60  ;;  %v5753_v22 = vmul.f32 %v4104_v47, %v5520_v15  ;;  %v5756_v5 = vmul.f32 %v4104_v47, %v5523_v29  ;;  %v5759_v17 = vmul.f32 %v4104_v47, %v5526_v7  ;;  %v2965_v7 = vld [vmem:[%s5695_s11 + $0x80] sm:$0xff] }
 0x2f7   : > { %v5765_v40 = vmul.f32 %v4104_v47, %v5529_v16  ;;  %v5768_v60 = vmul.f32 %v4104_v47, %v5532_v42  ;;  %v5771_v15 = vmul.f32 %v4104_v47, %v5535_v44  ;;  %v5774_v29 = vmul.f32 %v4104_v47, %v5538_v63  ;;  %v2969_v44 = vld [vmem:[%s5695_s11 + $0xa0] sm:$0xff] }
 0x2f8   : > { %v5780_v26 = vmul.f32 %v4104_v47, %v5541_v59  ;;  %v2981_v16 = vadd.f32 %v2949_v57, %v2917_v35  ;;  %v2982_v50 = vadd.f32 %v2950_v6, %v2918_v46  ;;  %v2983_v42 = vadd.f32 %v2951_v25, %v2919_v9  ;;  %v2973_v59 = vld [vmem:[%s5695_s11 + $0xc0] sm:$0xff]  ;;  %v2978_v6 = vld [vmem:[%s5695_s11 + $0xe8] sm:$0xff]  ;;  %v2979_v25 = vld [vmem:[%s5695_s11 + $0xf0] sm:$0xff] }
 0x2f9   : > { %v2984_v63 = vadd.f32 %v2952_v24, %v2920_v8  ;;  %v2985_v53 = vadd.f32 %v2953_v10, %v2921_v2  ;;  %v2986_v33 = vadd.f32 %v2954_v36, %v2922_v54  ;;  %v2987_v32 = vadd.f32 %v2955_v11, %v2923_v41  ;;  %v2974_v8 = vld [vmem:[%s5695_s11 + $0xc8] sm:$0xff]  ;;  %v2975_v2 = vld [vmem:[%s5695_s11 + $0xd0] sm:$0xff]  ;;  %v2976_v54 = vld [vmem:[%s5695_s11 + $0xd8] sm:$0xff] }
 0x2fa   : > { %v2988_v47 = vadd.f32 %v2956_v4, %v2924_v38  ;;  %v2989_v35 = vadd.f32 %v2957_v14, %v2925_v39  ;;  %v2990_v46 = vadd.f32 %v2958_v1, %v2926_v31  ;;  %v2991_v9 = vadd.f32 %v2959_v51, %v2927_v13  ;;  %3013 = vst [vmem:[%s5722_s7] sm:$0xff] %v2981_v16  ;;  %v2977_v31 = vld [vmem:[%s5695_s11 + $0xe0] sm:$0xff] }
 0x2fb   : > { %3014 = vst [vmem:[%s5722_s7 + $0x8] sm:$0xff] %v2982_v50  ;;  %3015 = vst [vmem:[%s5722_s7 + $0x10] sm:$0xff] %v2983_v42  ;;  %v2992_v41 = vadd.f32 %v2960_v52, %v2928_v62  ;;  %v2993_v57 = vadd.f32 %v2961_v58, %v2929_v27  ;;  %v2994_v38 = vadd.f32 %v2962_v37, %v2930_v0 }
 0x2fc   : > { %v2995_v39 = vadd.f32 %v2963_v55, %v2931_v61  ;;  %3016 = vst [vmem:[%s5722_s7 + $0x18] sm:$0xff] %v2984_v63  ;;  %3017 = vst [vmem:[%s5722_s7 + $0x20] sm:$0xff] %v2985_v53  ;;  %v2996_v13 = vadd.f32 %v2964_v21, %v5727_v18  ;;  %v2997_v62 = vadd.f32 %v2965_v7, %v5730_v45 }
 0x2fd   : > { %3018 = vst [vmem:[%s5722_s7 + $0x28] sm:$0xff] %v2986_v33  ;;  %3019 = vst [vmem:[%s5722_s7 + $0x30] sm:$0xff] %v2987_v32  ;;  %v2998_v27 = vadd.f32 %v2966_v49, %v5733_v12  ;;  %v2999_v0 = vadd.f32 %v2967_v3, %v2935_v23  ;;  %v3000_v24 = vadd.f32 %v2968_v19, %v5740_v34 }
 0x2fe   : > { %3020 = vst [vmem:[%s5722_s7 + $0x38] sm:$0xff] %v2988_v47  ;;  %3021 = vst [vmem:[%s5722_s7 + $0x40] sm:$0xff] %v2989_v35  ;;  %v3001_v10 = vadd.f32 %v2969_v44, %v5743_v28  ;;  %v3002_v36 = vadd.f32 %v2970_v56, %v5746_v30  ;;  %v3003_v11 = vadd.f32 %v2971_v48, %v2939_v43 }
 0x2ff   : > { %3022 = vst [vmem:[%s5722_s7 + $0x48] sm:$0xff] %v2990_v46  ;;  %3023 = vst [vmem:[%s5722_s7 + $0x50] sm:$0xff] %v2991_v9  ;;  %v3004_v61 = vadd.f32 %v2972_v20, %v5753_v22  ;;  %v3005_v18 = vadd.f32 %v2973_v59, %v5756_v5  ;;  %v3006_v45 = vadd.f32 %v2974_v8, %v5759_v17 }
 0x300   : > { %3024 = vst [vmem:[%s5722_s7 + $0x58] sm:$0xff] %v2992_v41  ;;  %3025 = vst [vmem:[%s5722_s7 + $0x60] sm:$0xff] %v2993_v57  ;;  %v3007_v12 = vadd.f32 %v2975_v2, %v5765_v40  ;;  %v3008_v4 = vadd.f32 %v2976_v54, %v5768_v60  ;;  %v3009_v14 = vadd.f32 %v2977_v31, %v5771_v15 }
 0x301   : > { %3026 = vst [vmem:[%s5722_s7 + $0x68] sm:$0xff] %v2994_v38  ;;  %3027 = vst [vmem:[%s5722_s7 + $0x70] sm:$0xff] %v2995_v39  ;;  %v3010_v1 = vadd.f32 %v2978_v6, %v5774_v29  ;;  %v3011_v23 = vadd.f32 %v2979_v25, %v5780_v26 }
 0x302   : > { %3028 = vst [vmem:[%s5722_s7 + $0x78] sm:$0xff] %v2996_v13  ;;  %3029 = vst [vmem:[%s5722_s7 + $0x80] sm:$0xff] %v2997_v62 }
 0x303   : > { %3030 = vst [vmem:[%s5722_s7 + $0x88] sm:$0xff] %v2998_v27  ;;  %3031 = vst [vmem:[%s5722_s7 + $0x90] sm:$0xff] %v2999_v0 }
 0x304   : > { %3032 = vst [vmem:[%s5722_s7 + $0x98] sm:$0xff] %v3000_v24  ;;  %3033 = vst [vmem:[%s5722_s7 + $0xa0] sm:$0xff] %v3001_v10 }
 0x305   : > { %3034 = vst [vmem:[%s5722_s7 + $0xa8] sm:$0xff] %v3002_v36  ;;  %3035 = vst [vmem:[%s5722_s7 + $0xb0] sm:$0xff] %v3003_v11 }
 0x306   : > { %3036 = vst [vmem:[%s5722_s7 + $0xb8] sm:$0xff] %v3004_v61  ;;  %3037 = vst [vmem:[%s5722_s7 + $0xc0] sm:$0xff] %v3005_v18 }
 0x307   : > { %3038 = vst [vmem:[%s5722_s7 + $0xc8] sm:$0xff] %v3006_v45  ;;  %3039 = vst [vmem:[%s5722_s7 + $0xd0] sm:$0xff] %v3007_v12 }
 0x308   : > { %3040 = vst [vmem:[%s5722_s7 + $0xd8] sm:$0xff] %v3008_v4  ;;  %3041 = vst [vmem:[%s5722_s7 + $0xe0] sm:$0xff] %v3009_v14 }
 0x309   : > { %3042 = vst [vmem:[%s5722_s7 + $0xe8] sm:$0xff] %v3010_v1  ;;  %3043 = vst [vmem:[%s5722_s7 + $0xf0] sm:$0xff] %v3011_v23 }
 0x30a   : > { %4151 = shalt.err (!%p4148_p3)
}
 0x30b   : > { %s4152_s22 = scalar_lea.hbm %s5830_s13, 4096  ;;  %s4156_s30 = scalar_lea.hbm %s5899_s4, 8192 }
 0x30c   : > { %p4153_p4 = scmp.ne.s32.totalorder %s5830_s13, %s4152_s22  ;;  %p4157_p9 = scmp.lt.u32.totalorder %s5830_s13, %s5899_s4 }
 0x30d   : > { %p4158_p10 = scmp.lt.u32.totalorder %s4156_s30, %s4152_s22  ;;  %p4160_p12 = scmp.lt.u32.totalorder %s4152_s22, %s5830_s13 }
 0x30e   : > { %p4154_p7 = pnand %p4153_p4, %p4269_p5 }
 0x30f   : > { %p4159_p11 = por %p4158_p10, %p4157_p9 }
 0x310   : > { %p4155_p8 = pneg %p4154_p7 }
 0x311   : > { %p4161_p13 = por %p4160_p12, %p4159_p11 }
 0x313   : > { %p4162_p0 = pnand %p4161_p13, %p4155_p8 }
 0x315   : > { %4165 = shalt.err (!%p4162_p0)
}
 0x316   : > { %s4204_s6 = smov 128   ;;  %s4205_s7 = smov 8  }
 0x317   : > { %3681 = dma.vmem_to_hbm [thread:$0]  (%p4269_p5), %s5834_s9, 4096, %s5830_s13, %s5854_s19, %s4204_s6, %s4204_s6, %s4205_s7  }
 0x318 PF: > { %p3687_p1 = scmp.ge.s32.totalorder %s4200_s18, 2  ;;  %s3074_s8 = sand.u32 1, %s4188_s15  }
 0x319   : > { %s3075_s10 = scalar_lea.sflag [#allocation3], %s3074_s8 }
 0x31a   : > { %p3684_p2 = pnand %p3687_p1, %p4273_p6 }
 0x31c   : > { %4183 = dma.done.wait (!%p3684_p2), %s3075_s10, 4096  }
 0x31d   : > { %4185 = vsyncadd (!%p3684_p2), %s3075_s10, 4294963200  ;;  %p14_p3 = scmp.ge.s32.totalorder %s4256_s21, 4   ;;  %s5902_s15 = smov %s4192_s16 }
 0x31e   : > { %s5903_s16 = smov %s4196_s17  ;;  %s5904_s17 = smov %s4267_s24 }
 0x31f   : > { %s5905_s18 = smov %s4256_s21  ;;  %16 = sbr.rel (!%p14_p3) target bundleno = 3 (0x3), region = 74 }
 0x326   :  { %3080 = vsyncpa [#allocation3], 1 }
 0x327   :  { %3082 = vsyncpa [#allocation3 + $0x1], 1 }

</bundles_post_ra>
